<compile_context>
chip_gen: v7x
topology: tpu7x:2x2x1
jax: 0.10.0
libtpu: 0.0.40
codegen_flags: <defaults>
</compile_context>

<pallas_src>
import numpy as np
import jax
import jax.numpy as jnp
from jax.experimental import pallas as pl
from jax.experimental.pallas import tpu as pltpu

INPUT_DIM = 22
L1, P1 = INPUT_DIM - 2, (INPUT_DIM - 2) // 2   # 20, 10
L2, P2 = P1 - 2, (P1 - 2) // 2                 # 8, 4
L3, P3 = P2 - 2, (P2 - 2) // 2                 # 2, 1
TB = 256                                       # batch tile on the lane axis


def _pool2(h, t_len, tb):
    # h: (C, t_len*tb), column layout t*tb + b.  MaxPool1d(2) over time is a max
    # of adjacent tb-wide (128-aligned) lane blocks -> pure VPU max + tile copies.
    cols = [jnp.maximum(h[:, (2 * t) * tb:(2 * t + 1) * tb],
                        h[:, (2 * t + 1) * tb:(2 * t + 2) * tb])
            for t in range(t_len // 2)]
    return cols[0] if len(cols) == 1 else jnp.concatenate(cols, axis=1)


def cnn_kernel(x_ref, w1_ref, b1_ref, w2_ref, b2_ref, w3_ref, b3_ref,
               fw1_ref, fb1_ref, fw2_ref, fb2_ref, out_ref):
    tb = x_ref.shape[1]
    x = x_ref[...]                                              # (22, TB)

    # conv1 (1->32, k=3) + relu : im2col over k -> one (32,3)@(3, L1*TB) matmul
    r1 = jnp.concatenate(
        [x[k:k + L1, :].reshape(1, L1 * tb) for k in range(3)], axis=0)
    h1 = jnp.maximum(
        jnp.dot(w1_ref[...], r1, preferred_element_type=jnp.float32)
        + b1_ref[...], 0.0)                                     # (32, L1*TB)
    p1 = _pool2(h1, L1, tb)                                     # (32, P1*TB)

    # conv2 (32->64, k=3) + relu : im2col stacks Cin along sublanes per tap
    r2 = jnp.concatenate(
        [p1[:, k * tb:(k + L2) * tb] for k in range(3)], axis=0)  # (96, L2*TB)
    h2 = jnp.maximum(
        jnp.dot(w2_ref[...], r2, preferred_element_type=jnp.float32)
        + b2_ref[...], 0.0)                                     # (64, L2*TB)
    p2 = _pool2(h2, L2, tb)                                     # (64, P2*TB)

    # conv3 (64->128, k=3) + relu
    r3 = jnp.concatenate(
        [p2[:, k * tb:(k + L3) * tb] for k in range(3)], axis=0)  # (192, L3*TB)
    h3 = jnp.maximum(
        jnp.dot(w3_ref[...], r3, preferred_element_type=jnp.float32)
        + b3_ref[...], 0.0)                                     # (128, L3*TB)
    p3 = _pool2(h3, L3, tb)                                     # (128, TB)

    # fc1 (128->64) + relu, fc2 (64->5) — batch stays on lanes, output (5, TB)
    f1 = jnp.maximum(
        jnp.dot(fw1_ref[...], p3, preferred_element_type=jnp.float32)
        + fb1_ref[...], 0.0)                                    # (64, TB)
    out_ref[...] = (jnp.dot(fw2_ref[...], f1, preferred_element_type=jnp.float32)
                    + fb2_ref[...])                             # (5, TB)


def cnn_forward(x, kernel_params, tb=TB):
    (w1, b1, w2f, b2, w3f, b3, fw1, fb1, fw2, fb2) = kernel_params
    B = x.shape[0]
    n_tiles = pl.cdiv(B, tb)
    b_pad = n_tiles * tb

    # (B, 22) -> (22, B_pad): time on sublanes, batch on lanes, zero-padded.
    xt = jnp.pad(x.astype(jnp.float32).T, ((0, 0), (0, b_pad - B)))

    def full_spec(shape):
        n = len(shape)
        return pl.BlockSpec(shape, lambda i, _n=n: (0,) * _n)

    out = pl.pallas_call(
        cnn_kernel,
        out_shape=jax.ShapeDtypeStruct((5, b_pad), jnp.float32),
        grid=(n_tiles,),
        in_specs=[
            pl.BlockSpec((INPUT_DIM, tb), lambda i: (0, i)),   # x tile
            full_spec((32, 3)), full_spec((32, 1)),            # conv1
            full_spec((64, 96)), full_spec((64, 1)),           # conv2 (im2col)
            full_spec((128, 192)), full_spec((128, 1)),        # conv3 (im2col)
            full_spec((64, 128)), full_spec((64, 1)),          # fc1
            full_spec((5, 64)), full_spec((5, 1)),             # fc2
        ],
        out_specs=pl.BlockSpec((5, tb), lambda i: (0, i)),     # lane-dense output
        compiler_params=pltpu.CompilerParams(
            dimension_semantics=("parallel",)),
    )(xt, w1, b1, w2f, b2, w3f, b3, fw1, fb1, fw2, fb2)

    return out.T[:B]                                           # (B, 5)


def init_params(key):
    """Deterministic synthetic weights in PyTorch layout + kernel layout."""
    ks = jax.random.split(key, 10)
    s = 0.1
    w1_t = jax.random.normal(ks[0], (32, 1, 3), jnp.float32) * s
    b1_t = jax.random.normal(ks[1], (32,), jnp.float32) * s
    w2_t = jax.random.normal(ks[2], (64, 32, 3), jnp.float32) * s
    b2_t = jax.random.normal(ks[3], (64,), jnp.float32) * s
    w3_t = jax.random.normal(ks[4], (128, 64, 3), jnp.float32) * s
    b3_t = jax.random.normal(ks[5], (128,), jnp.float32) * s
    fw1_t = jax.random.normal(ks[6], (64, 128), jnp.float32) * s
    fb1_t = jax.random.normal(ks[7], (64,), jnp.float32) * s
    fw2_t = jax.random.normal(ks[8], (5, 64), jnp.float32) * s
    fb2_t = jax.random.normal(ks[9], (5,), jnp.float32) * s
    torch_params = (w1_t, b1_t, w2_t, b2_t, w3_t, b3_t, fw1_t, fb1_t, fw2_t, fb2_t)

    # Kernel layout: im2col contraction index = k*Cin + ci.
    kernel_params = (
        w1_t[:, 0, :],                                      # (32, 3)
        b1_t[:, None],                                      # (32, 1)
        jnp.transpose(w2_t, (0, 2, 1)).reshape(64, 96),     # (64, k*32+ci)
        b2_t[:, None],
        jnp.transpose(w3_t, (0, 2, 1)).reshape(128, 192),   # (128, k*64+ci)
        b3_t[:, None],
        fw1_t, fb1_t[:, None],
        fw2_t, fb2_t[:, None],
    )
    return torch_params, kernel_params


def reference_forward(x_np, torch_params):
    """Plain numpy re-implementation of the PyTorch forward (for verification)."""
    w1, b1, w2, b2, w3, b3, fw1, fb1, fw2, fb2 = [np.asarray(p, np.float32)
                                                  for p in torch_params]

    def conv1d(x, w, b):
        cout, cin, k = w.shape
        lout = x.shape[1] - k + 1
        out = np.empty((cout, lout), np.float32)
        for t in range(lout):
            out[:, t] = np.tensordot(w, x[:, t:t + k], axes=([1, 2], [0, 1])) + b
        return out

    def relu(a):
        return np.maximum(a, 0.0)

    def pool(a):
        t = a.shape[1] // 2
        return a[:, :2 * t].reshape(a.shape[0], t, 2).max(axis=2)

    outs = []
    for i in range(x_np.shape[0]):
        h = x_np[i][None, :]
        h = pool(relu(conv1d(h, w1, b1)))
        h = pool(relu(conv1d(h, w2, b2)))
        h = pool(relu(conv1d(h, w3, b3)))
        feat = h[:, 0]                    # (128,)
        f1 = relu(fw1 @ feat + fb1)
        outs.append(fw2 @ f1 + fb2)
    return np.stack(outs, axis=0)


if __name__ == "__main__":
    key = jax.random.PRNGKey(0)
    kx, kp = jax.random.split(key)
    x = jax.random.normal(kx, (2, INPUT_DIM), jnp.float32)   # (B, input_dim)
    torch_params, kernel_params = init_params(kp)

    out = cnn_forward(x, kernel_params)
    out = jax.block_until_ready(out)

    ref = reference_forward(np.asarray(x), torch_params)
    assert out.shape == (2, 5)
    np.testing.assert_allclose(np.asarray(out), ref, rtol=2e-2, atol=2e-2)
    print("KERNEL_OK")
</pallas_src>

<mosaic_0001>
module attributes {stable_mosaic.version = 11 : i64} {
  func.func @cnn_kernel(%arg0: i32, %arg1: memref<22x256xf32, #tpu.memory_space<vmem>>, %arg2: memref<32x3xf32, #tpu.memory_space<vmem>>, %arg3: memref<32x1xf32, #tpu.memory_space<vmem>>, %arg4: memref<64x96xf32, #tpu.memory_space<vmem>>, %arg5: memref<64x1xf32, #tpu.memory_space<vmem>>, %arg6: memref<128x192xf32, #tpu.memory_space<vmem>>, %arg7: memref<128x1xf32, #tpu.memory_space<vmem>>, %arg8: memref<64x128xf32, #tpu.memory_space<vmem>>, %arg9: memref<64x1xf32, #tpu.memory_space<vmem>>, %arg10: memref<5x64xf32, #tpu.memory_space<vmem>>, %arg11: memref<5x1xf32, #tpu.memory_space<vmem>>, %arg12: memref<5x256xf32, #tpu.memory_space<vmem>>) attributes {dimension_semantics = [#tpu.dimension_semantics<parallel>], iteration_bounds = array<i64: 1>, scalar_prefetch = 0 : i64, scratch_operands = 0 : i64, tpu.core_type = #tpu.core_type<tc>, window_params = [{transform_indices = @transform_0, window_bounds = array<i64: 22, 256>}, {pipeline_mode = #tpu.pipeline_mode<synchronous>, transform_indices = @transform_1, window_bounds = array<i64: 32, 3>}, {pipeline_mode = #tpu.pipeline_mode<synchronous>, transform_indices = @transform_2, window_bounds = array<i64: 32, 1>}, {pipeline_mode = #tpu.pipeline_mode<synchronous>, transform_indices = @transform_3, window_bounds = array<i64: 64, 96>}, {pipeline_mode = #tpu.pipeline_mode<synchronous>, transform_indices = @transform_4, window_bounds = array<i64: 64, 1>}, {pipeline_mode = #tpu.pipeline_mode<synchronous>, transform_indices = @transform_5, window_bounds = array<i64: 128, 192>}, {pipeline_mode = #tpu.pipeline_mode<synchronous>, transform_indices = @transform_6, window_bounds = array<i64: 128, 1>}, {pipeline_mode = #tpu.pipeline_mode<synchronous>, transform_indices = @transform_7, window_bounds = array<i64: 64, 128>}, {pipeline_mode = #tpu.pipeline_mode<synchronous>, transform_indices = @transform_8, window_bounds = array<i64: 64, 1>}, {pipeline_mode = #tpu.pipeline_mode<synchronous>, transform_indices = @transform_9, window_bounds = array<i64: 5, 64>}, {pipeline_mode = #tpu.pipeline_mode<synchronous>, transform_indices = @transform_10, window_bounds = array<i64: 5, 1>}, {transform_indices = @transform_11, window_bounds = array<i64: 5, 256>}]} {
    %c0 = arith.constant 0 : index
    %c0_0 = arith.constant 0 : index
    %0 = vector.load %arg1[%c0, %c0_0] : memref<22x256xf32, #tpu.memory_space<vmem>>, vector<22x256xf32>
    %1 = vector.extract_strided_slice %0 {offsets = [0, 0], sizes = [20, 256], strides = [1, 1]} : vector<22x256xf32> to vector<20x256xf32>
    %2 = vector.shape_cast %1 : vector<20x256xf32> to vector<1x5120xf32>
    %3 = vector.extract_strided_slice %0 {offsets = [1, 0], sizes = [20, 256], strides = [1, 1]} : vector<22x256xf32> to vector<20x256xf32>
    %4 = vector.shape_cast %3 : vector<20x256xf32> to vector<1x5120xf32>
    %5 = vector.extract_strided_slice %0 {offsets = [2, 0], sizes = [20, 256], strides = [1, 1]} : vector<22x256xf32> to vector<20x256xf32>
    %6 = vector.shape_cast %5 : vector<20x256xf32> to vector<1x5120xf32>
    %7 = tpu.concatenate %2, %4, %6 in 0 : vector<1x5120xf32>, vector<1x5120xf32>, vector<1x5120xf32> -> vector<3x5120xf32>
    %c0_1 = arith.constant 0 : index
    %c0_2 = arith.constant 0 : index
    %8 = vector.load %arg2[%c0_1, %c0_2] : memref<32x3xf32, #tpu.memory_space<vmem>>, vector<32x3xf32>
    %cst = arith.constant dense<0.000000e+00> : vector<32x5120xf32>
    %9 = tpu.matmul %8, %7, %cst {dimension_numbers = #tpu.dot_dimension_numbers<[1], [0], [0], [1], [0, 0, 1, 1], [], []>} : vector<32x3xf32>, vector<3x5120xf32>, vector<32x5120xf32> -> vector<32x5120xf32>
    %c0_3 = arith.constant 0 : index
    %c0_4 = arith.constant 0 : index
    %10 = vector.load %arg3[%c0_3, %c0_4] : memref<32x1xf32, #tpu.memory_space<vmem>>, vector<32x1xf32>
    %11 = vector.broadcast %10 : vector<32x1xf32> to vector<32x5120xf32>
    %12 = arith.addf %9, %11 : vector<32x5120xf32>
    %cst_5 = arith.constant 0.000000e+00 : f32
    %13 = vector.broadcast %cst_5 : f32 to vector<32x5120xf32>
    %14 = arith.maximumf %12, %13 : vector<32x5120xf32>
    %15 = vector.extract_strided_slice %14 {offsets = [0, 0], sizes = [32, 256], strides = [1, 1]} : vector<32x5120xf32> to vector<32x256xf32>
    %16 = vector.extract_strided_slice %14 {offsets = [0, 256], sizes = [32, 256], strides = [1, 1]} : vector<32x5120xf32> to vector<32x256xf32>
    %17 = arith.maximumf %15, %16 : vector<32x256xf32>
    %18 = vector.extract_strided_slice %14 {offsets = [0, 512], sizes = [32, 256], strides = [1, 1]} : vector<32x5120xf32> to vector<32x256xf32>
    %19 = vector.extract_strided_slice %14 {offsets = [0, 768], sizes = [32, 256], strides = [1, 1]} : vector<32x5120xf32> to vector<32x256xf32>
    %20 = arith.maximumf %18, %19 : vector<32x256xf32>
    %21 = vector.extract_strided_slice %14 {offsets = [0, 1024], sizes = [32, 256], strides = [1, 1]} : vector<32x5120xf32> to vector<32x256xf32>
    %22 = vector.extract_strided_slice %14 {offsets = [0, 1280], sizes = [32, 256], strides = [1, 1]} : vector<32x5120xf32> to vector<32x256xf32>
    %23 = arith.maximumf %21, %22 : vector<32x256xf32>
    %24 = vector.extract_strided_slice %14 {offsets = [0, 1536], sizes = [32, 256], strides = [1, 1]} : vector<32x5120xf32> to vector<32x256xf32>
    %25 = vector.extract_strided_slice %14 {offsets = [0, 1792], sizes = [32, 256], strides = [1, 1]} : vector<32x5120xf32> to vector<32x256xf32>
    %26 = arith.maximumf %24, %25 : vector<32x256xf32>
    %27 = vector.extract_strided_slice %14 {offsets = [0, 2048], sizes = [32, 256], strides = [1, 1]} : vector<32x5120xf32> to vector<32x256xf32>
    %28 = vector.extract_strided_slice %14 {offsets = [0, 2304], sizes = [32, 256], strides = [1, 1]} : vector<32x5120xf32> to vector<32x256xf32>
    %29 = arith.maximumf %27, %28 : vector<32x256xf32>
    %30 = vector.extract_strided_slice %14 {offsets = [0, 2560], sizes = [32, 256], strides = [1, 1]} : vector<32x5120xf32> to vector<32x256xf32>
    %31 = vector.extract_strided_slice %14 {offsets = [0, 2816], sizes = [32, 256], strides = [1, 1]} : vector<32x5120xf32> to vector<32x256xf32>
    %32 = arith.maximumf %30, %31 : vector<32x256xf32>
    %33 = vector.extract_strided_slice %14 {offsets = [0, 3072], sizes = [32, 256], strides = [1, 1]} : vector<32x5120xf32> to vector<32x256xf32>
    %34 = vector.extract_strided_slice %14 {offsets = [0, 3328], sizes = [32, 256], strides = [1, 1]} : vector<32x5120xf32> to vector<32x256xf32>
    %35 = arith.maximumf %33, %34 : vector<32x256xf32>
    %36 = vector.extract_strided_slice %14 {offsets = [0, 3584], sizes = [32, 256], strides = [1, 1]} : vector<32x5120xf32> to vector<32x256xf32>
    %37 = vector.extract_strided_slice %14 {offsets = [0, 3840], sizes = [32, 256], strides = [1, 1]} : vector<32x5120xf32> to vector<32x256xf32>
    %38 = arith.maximumf %36, %37 : vector<32x256xf32>
    %39 = vector.extract_strided_slice %14 {offsets = [0, 4096], sizes = [32, 256], strides = [1, 1]} : vector<32x5120xf32> to vector<32x256xf32>
    %40 = vector.extract_strided_slice %14 {offsets = [0, 4352], sizes = [32, 256], strides = [1, 1]} : vector<32x5120xf32> to vector<32x256xf32>
    %41 = arith.maximumf %39, %40 : vector<32x256xf32>
    %42 = vector.extract_strided_slice %14 {offsets = [0, 4608], sizes = [32, 256], strides = [1, 1]} : vector<32x5120xf32> to vector<32x256xf32>
    %43 = vector.extract_strided_slice %14 {offsets = [0, 4864], sizes = [32, 256], strides = [1, 1]} : vector<32x5120xf32> to vector<32x256xf32>
    %44 = arith.maximumf %42, %43 : vector<32x256xf32>
    %45 = tpu.concatenate %17, %20, %23, %26, %29, %32, %35, %38, %41, %44 in 1 : vector<32x256xf32>, vector<32x256xf32>, vector<32x256xf32>, vector<32x256xf32>, vector<32x256xf32>, vector<32x256xf32>, vector<32x256xf32>, vector<32x256xf32>, vector<32x256xf32>, vector<32x256xf32> -> vector<32x2560xf32>
    %46 = vector.extract_strided_slice %45 {offsets = [0, 0], sizes = [32, 2048], strides = [1, 1]} : vector<32x2560xf32> to vector<32x2048xf32>
    %47 = vector.extract_strided_slice %45 {offsets = [0, 256], sizes = [32, 2048], strides = [1, 1]} : vector<32x2560xf32> to vector<32x2048xf32>
    %48 = vector.extract_strided_slice %45 {offsets = [0, 512], sizes = [32, 2048], strides = [1, 1]} : vector<32x2560xf32> to vector<32x2048xf32>
    %49 = tpu.concatenate %46, %47, %48 in 0 : vector<32x2048xf32>, vector<32x2048xf32>, vector<32x2048xf32> -> vector<96x2048xf32>
    %c0_6 = arith.constant 0 : index
    %c0_7 = arith.constant 0 : index
    %50 = vector.load %arg4[%c0_6, %c0_7] : memref<64x96xf32, #tpu.memory_space<vmem>>, vector<64x96xf32>
    %cst_8 = arith.constant dense<0.000000e+00> : vector<64x2048xf32>
    %51 = tpu.matmul %50, %49, %cst_8 {dimension_numbers = #tpu.dot_dimension_numbers<[1], [0], [0], [1], [0, 0, 1, 1], [], []>} : vector<64x96xf32>, vector<96x2048xf32>, vector<64x2048xf32> -> vector<64x2048xf32>
    %c0_9 = arith.constant 0 : index
    %c0_10 = arith.constant 0 : index
    %52 = vector.load %arg5[%c0_9, %c0_10] : memref<64x1xf32, #tpu.memory_space<vmem>>, vector<64x1xf32>
    %53 = vector.broadcast %52 : vector<64x1xf32> to vector<64x2048xf32>
    %54 = arith.addf %51, %53 : vector<64x2048xf32>
    %cst_11 = arith.constant 0.000000e+00 : f32
    %55 = vector.broadcast %cst_11 : f32 to vector<64x2048xf32>
    %56 = arith.maximumf %54, %55 : vector<64x2048xf32>
    %57 = vector.extract_strided_slice %56 {offsets = [0, 0], sizes = [64, 256], strides = [1, 1]} : vector<64x2048xf32> to vector<64x256xf32>
    %58 = vector.extract_strided_slice %56 {offsets = [0, 256], sizes = [64, 256], strides = [1, 1]} : vector<64x2048xf32> to vector<64x256xf32>
    %59 = arith.maximumf %57, %58 : vector<64x256xf32>
    %60 = vector.extract_strided_slice %56 {offsets = [0, 512], sizes = [64, 256], strides = [1, 1]} : vector<64x2048xf32> to vector<64x256xf32>
    %61 = vector.extract_strided_slice %56 {offsets = [0, 768], sizes = [64, 256], strides = [1, 1]} : vector<64x2048xf32> to vector<64x256xf32>
    %62 = arith.maximumf %60, %61 : vector<64x256xf32>
    %63 = vector.extract_strided_slice %56 {offsets = [0, 1024], sizes = [64, 256], strides = [1, 1]} : vector<64x2048xf32> to vector<64x256xf32>
    %64 = vector.extract_strided_slice %56 {offsets = [0, 1280], sizes = [64, 256], strides = [1, 1]} : vector<64x2048xf32> to vector<64x256xf32>
    %65 = arith.maximumf %63, %64 : vector<64x256xf32>
    %66 = vector.extract_strided_slice %56 {offsets = [0, 1536], sizes = [64, 256], strides = [1, 1]} : vector<64x2048xf32> to vector<64x256xf32>
    %67 = vector.extract_strided_slice %56 {offsets = [0, 1792], sizes = [64, 256], strides = [1, 1]} : vector<64x2048xf32> to vector<64x256xf32>
    %68 = arith.maximumf %66, %67 : vector<64x256xf32>
    %69 = tpu.concatenate %59, %62, %65, %68 in 1 : vector<64x256xf32>, vector<64x256xf32>, vector<64x256xf32>, vector<64x256xf32> -> vector<64x1024xf32>
    %70 = vector.extract_strided_slice %69 {offsets = [0, 0], sizes = [64, 512], strides = [1, 1]} : vector<64x1024xf32> to vector<64x512xf32>
    %71 = vector.extract_strided_slice %69 {offsets = [0, 256], sizes = [64, 512], strides = [1, 1]} : vector<64x1024xf32> to vector<64x512xf32>
    %72 = vector.extract_strided_slice %69 {offsets = [0, 512], sizes = [64, 512], strides = [1, 1]} : vector<64x1024xf32> to vector<64x512xf32>
    %73 = tpu.concatenate %70, %71, %72 in 0 : vector<64x512xf32>, vector<64x512xf32>, vector<64x512xf32> -> vector<192x512xf32>
    %c0_12 = arith.constant 0 : index
    %c0_13 = arith.constant 0 : index
    %74 = vector.load %arg6[%c0_12, %c0_13] : memref<128x192xf32, #tpu.memory_space<vmem>>, vector<128x192xf32>
    %cst_14 = arith.constant dense<0.000000e+00> : vector<128x512xf32>
    %75 = tpu.matmul %74, %73, %cst_14 {dimension_numbers = #tpu.dot_dimension_numbers<[1], [0], [0], [1], [0, 0, 1, 1], [], []>} : vector<128x192xf32>, vector<192x512xf32>, vector<128x512xf32> -> vector<128x512xf32>
    %c0_15 = arith.constant 0 : index
    %c0_16 = arith.constant 0 : index
    %76 = vector.load %arg7[%c0_15, %c0_16] : memref<128x1xf32, #tpu.memory_space<vmem>>, vector<128x1xf32>
    %77 = vector.broadcast %76 : vector<128x1xf32> to vector<128x512xf32>
    %78 = arith.addf %75, %77 : vector<128x512xf32>
    %cst_17 = arith.constant 0.000000e+00 : f32
    %79 = vector.broadcast %cst_17 : f32 to vector<128x512xf32>
    %80 = arith.maximumf %78, %79 : vector<128x512xf32>
    %81 = vector.extract_strided_slice %80 {offsets = [0, 0], sizes = [128, 256], strides = [1, 1]} : vector<128x512xf32> to vector<128x256xf32>
    %82 = vector.extract_strided_slice %80 {offsets = [0, 256], sizes = [128, 256], strides = [1, 1]} : vector<128x512xf32> to vector<128x256xf32>
    %83 = arith.maximumf %81, %82 : vector<128x256xf32>
    %c0_18 = arith.constant 0 : index
    %c0_19 = arith.constant 0 : index
    %84 = vector.load %arg8[%c0_18, %c0_19] : memref<64x128xf32, #tpu.memory_space<vmem>>, vector<64x128xf32>
    %cst_20 = arith.constant dense<0.000000e+00> : vector<64x256xf32>
    %85 = tpu.matmul %84, %83, %cst_20 {dimension_numbers = #tpu.dot_dimension_numbers<[1], [0], [0], [1], [0, 0, 1, 1], [], []>} : vector<64x128xf32>, vector<128x256xf32>, vector<64x256xf32> -> vector<64x256xf32>
    %c0_21 = arith.constant 0 : index
    %c0_22 = arith.constant 0 : index
    %86 = vector.load %arg9[%c0_21, %c0_22] : memref<64x1xf32, #tpu.memory_space<vmem>>, vector<64x1xf32>
    %87 = vector.broadcast %86 : vector<64x1xf32> to vector<64x256xf32>
    %88 = arith.addf %85, %87 : vector<64x256xf32>
    %cst_23 = arith.constant 0.000000e+00 : f32
    %89 = vector.broadcast %cst_23 : f32 to vector<64x256xf32>
    %90 = arith.maximumf %88, %89 : vector<64x256xf32>
    %c0_24 = arith.constant 0 : index
    %c0_25 = arith.constant 0 : index
    %91 = vector.load %arg10[%c0_24, %c0_25] : memref<5x64xf32, #tpu.memory_space<vmem>>, vector<5x64xf32>
    %cst_26 = arith.constant dense<0.000000e+00> : vector<5x256xf32>
    %92 = tpu.matmul %91, %90, %cst_26 {dimension_numbers = #tpu.dot_dimension_numbers<[1], [0], [0], [1], [0, 0, 1, 1], [], []>} : vector<5x64xf32>, vector<64x256xf32>, vector<5x256xf32> -> vector<5x256xf32>
    %c0_27 = arith.constant 0 : index
    %c0_28 = arith.constant 0 : index
    %93 = vector.load %arg11[%c0_27, %c0_28] : memref<5x1xf32, #tpu.memory_space<vmem>>, vector<5x1xf32>
    %94 = vector.broadcast %93 : vector<5x1xf32> to vector<5x256xf32>
    %95 = arith.addf %92, %94 : vector<5x256xf32>
    %c0_29 = arith.constant 0 : index
    %c0_30 = arith.constant 0 : index
    %96 = vector.load %arg12[%c0_29, %c0_30] : memref<5x256xf32, #tpu.memory_space<vmem>>, vector<5x256xf32>
    tpu.vector_store %arg12[%c0_29, %c0_30], %95 {strides = array<i32>} : memref<5x256xf32, #tpu.memory_space<vmem>>, vector<5x256xf32>,
    return
  }
  func.func @transform_0(%arg0: i32) -> (i32, i32) {
    %c0_i32 = arith.constant 0 : i32
    %c0_i32_0 = arith.constant 0 : i32
    return %c0_i32, %arg0 : i32, i32
  }
  func.func @transform_1(%arg0: i32) -> (i32, i32) {
    %c0_i32 = arith.constant 0 : i32
    %c0_i32_0 = arith.constant 0 : i32
    %c0_i32_1 = arith.constant 0 : i32
    return %c0_i32, %c0_i32_0 : i32, i32
  }
  func.func @transform_2(%arg0: i32) -> (i32, i32) {
    %c0_i32 = arith.constant 0 : i32
    %c0_i32_0 = arith.constant 0 : i32
    %c0_i32_1 = arith.constant 0 : i32
    return %c0_i32, %c0_i32_0 : i32, i32
  }
  func.func @transform_3(%arg0: i32) -> (i32, i32) {
    %c0_i32 = arith.constant 0 : i32
    %c0_i32_0 = arith.constant 0 : i32
    %c0_i32_1 = arith.constant 0 : i32
    return %c0_i32, %c0_i32_0 : i32, i32
  }
  func.func @transform_4(%arg0: i32) -> (i32, i32) {
    %c0_i32 = arith.constant 0 : i32
    %c0_i32_0 = arith.constant 0 : i32
    %c0_i32_1 = arith.constant 0 : i32
    return %c0_i32, %c0_i32_0 : i32, i32
  }
  func.func @transform_5(%arg0: i32) -> (i32, i32) {
    %c0_i32 = arith.constant 0 : i32
    %c0_i32_0 = arith.constant 0 : i32
    %c0_i32_1 = arith.constant 0 : i32
    return %c0_i32, %c0_i32_0 : i32, i32
  }
  func.func @transform_6(%arg0: i32) -> (i32, i32) {
    %c0_i32 = arith.constant 0 : i32
    %c0_i32_0 = arith.constant 0 : i32
    %c0_i32_1 = arith.constant 0 : i32
    return %c0_i32, %c0_i32_0 : i32, i32
  }
  func.func @transform_7(%arg0: i32) -> (i32, i32) {
    %c0_i32 = arith.constant 0 : i32
    %c0_i32_0 = arith.constant 0 : i32
    %c0_i32_1 = arith.constant 0 : i32
    return %c0_i32, %c0_i32_0 : i32, i32
  }
  func.func @transform_8(%arg0: i32) -> (i32, i32) {
    %c0_i32 = arith.constant 0 : i32
    %c0_i32_0 = arith.constant 0 : i32
    %c0_i32_1 = arith.constant 0 : i32
    return %c0_i32, %c0_i32_0 : i32, i32
  }
  func.func @transform_9(%arg0: i32) -> (i32, i32) {
    %c0_i32 = arith.constant 0 : i32
    %c0_i32_0 = arith.constant 0 : i32
    %c0_i32_1 = arith.constant 0 : i32
    return %c0_i32, %c0_i32_0 : i32, i32
  }
  func.func @transform_10(%arg0: i32) -> (i32, i32) {
    %c0_i32 = arith.constant 0 : i32
    %c0_i32_0 = arith.constant 0 : i32
    %c0_i32_1 = arith.constant 0 : i32
    return %c0_i32, %c0_i32_0 : i32, i32
  }
  func.func @transform_11(%arg0: i32) -> (i32, i32) {
    %c0_i32 = arith.constant 0 : i32
    %c0_i32_0 = arith.constant 0 : i32
    return %c0_i32, %arg0 : i32, i32
  }
}

</mosaic_0001>

<bundles_post_ra>
// kernel: tpu_custom_call.1
= control target key start
LH: loop header
LB: loop body
LE: loop exit
PB: predicated region body
PF: predicated region fallthrough
CT: control target
= control target key end

     0   :  { %v64_v1 = vlaneseq  ;;  %v5744_v3 = vmov 1935823168   ;;  %vm97_vm0 = vcmask 1042432   ;;  %vm98_vm1 = vcmask 1046532   ;;  %s7928_s0 = inlined_call_operand.vmem [shape: f32[22,256], index: 0, kind: input, shape index: {}]   ;;  %s7929_s1 = inlined_call_operand.vmem [shape: f32[32,3], index: 1, kind: input, shape index: {}]   ;;  %s7930_s2 = inlined_call_operand.vmem [shape: f32[32,1], index: 2, kind: input, shape index: {}]   ;;  %s7931_s3 = inlined_call_operand.vmem [shape: f32[64,96], index: 3, kind: input, shape index: {}]   ;;  %s7932_s4 = inlined_call_operand.vmem [shape: f32[64,1], index: 4, kind: input, shape index: {}]   ;;  %s7933_s5 = inlined_call_operand.vmem [shape: f32[128,192], index: 5, kind: input, shape index: {}]   ;;  %s7934_s6 = inlined_call_operand.vmem [shape: f32[128,1], index: 6, kind: input, shape index: {}]   ;;  %s7935_s7 = inlined_call_operand.vmem [shape: f32[64,128], index: 7, kind: input, shape index: {}]   ;;  %s7936_s8 = inlined_call_operand.vmem [shape: f32[64,1], index: 8, kind: input, shape index: {}]   ;;  %s7937_s9 = inlined_call_operand.vmem [shape: f32[5,64], index: 9, kind: input, shape index: {}]   ;;  %s7938_s10 = inlined_call_operand.vmem [shape: f32[5,1], index: 10, kind: input, shape index: {}]   ;;  %s7939_s11 = inlined_call_operand.hbm [shape: f32[5,256], index: 11, kind: output, shape index: {}]  }
   0x1   :  { %v5707_v0 = vld [vmem:[%s7928_s0] ss:$8 sps:$4 sm:$0xff]   ;;  %v5709_v2 = vld [vmem:[%s7928_s0 + $0x4] ss:$8 sps:$4 sm:$0xff]   ;;  %v62_v4 = vunpack.c.l.s4 %v5744_v3  ;;  %vm156_vm2 = vcmask 1041408   ;;  %vm5817_vm3 = vmor %vm97_vm0, %vm98_vm1  ;;  %vm157_vm4 = vcmask 1045508  }
   0x2   :  { %v5814_v5 = vshrl.u32 %v64_v1, 7  ;;  %v5146_v7 = vrot.slane %v5707_v0, 9  ;;  %v5147_v8 = vrot.slane %v5707_v0, 10  ;;  %v102_v10 = vrot.slane %v5709_v2, 5  ;;  %vm5822_vm5 = vmor %vm156_vm2, %vm157_vm4  ;;  %v5847_v20 = vld [vmem:[%s7928_s0 + $0x10] ss:$8 sps:$4 sm:$0xff]  }
   0x3   :  { %v63_v9 = vunpack.c.0.s8 %v62_v4  ;;  %v161_v12 = vrot.slane %v5709_v2, 6  ;;  %vm830_vm6 = vcmask 1040384   ;;  %v5745_v19 = vmov 0.0   ;;  %v5903_v48 = vld [vmem:[%s7929_s1] sm:$0xff]  ;;  %v5940_v60 = vld [vmem:[%s7929_s1 + $0x8] sm:$0xff] }
   0x4   :  { %v5827_v13 = vsub.s32 1, %v5814_v5  ;;  %v5830_v14 = vsub.s32 5, %v5814_v5  ;;  %v103_v16 = vsel %vm5817_vm3, %v5146_v7, %v102_v10  ;;  %v5840_v18 = vsub.s32 0, %v5814_v5  ;;  %1136 = vmatprep.mubr.f32.mxu1 %v5745_v19  ;;  %1314 = vmatprep.mubr.f32.mxu0 %v5745_v19 }
   0x5   :  { %v5833_v15 = vsub.s32 %v63_v9, %v5814_v5  ;;  %v162_v17 = vsel %vm5822_vm5, %v5147_v8, %v161_v12  ;;  %v104_v21 = vrot.slane %v102_v10, 4  ;;  %v163_v22 = vrot.slane %v161_v12, 4 }
   0x6   :  { %v5850_v23 = vsub.s32 4, %v5814_v5  ;;  %vm939_vm7 = vcmask 23552   ;;  %v5862_v27 = vsub.s32 3, %v5814_v5  ;;  %v105_v29 = vrot.slane %v5847_v20, 5 }
   0x7   :  { %v5853_v24 = vrot.slane %v5707_v0, %v5833_v15  ;;  %v5856_v25 = vrot.slane %v103_v16, %v5833_v15  ;;  %v5859_v26 = vrot.slane %v162_v17, %v5833_v15  ;;  %v5865_v28 = vrot.slane %v5709_v2, %v5833_v15 }
   0x8   :  { %v164_v30 = vrot.slane %v5847_v20, 6  ;;  %v5870_v31 = vsub.s32 2, %v5814_v5  ;;  %v106_v56 = vsel %vm5817_vm3, %v104_v21, %v105_v29  ;;  %v5932_v59 = vsub.s32 7, %v5814_v5 }
   0x9   :  { %v227_v32 = vrot.slane %v5853_v24, %v5827_v13  ;;  %v432_v33 = vrot.slane %v5856_v25, %v5827_v13  ;;  %v637_v34 = vrot.slane %v5859_v26, %v5827_v13  ;;  %v243_v35 = vrot.slane %v5853_v24, %v5830_v14 }
   0xa   :  { %v448_v36 = vrot.slane %v5856_v25, %v5830_v14  ;;  %v653_v37 = vrot.slane %v5859_v26, %v5830_v14  ;;  %v223_v38 = vrot.slane %v5853_v24, %v5840_v18  ;;  %v428_v39 = vrot.slane %v5856_v25, %v5840_v18 }
   0xb   :  { %v832_v40 = vsel %vm830_vm6, %v227_v32, %v432_v33  ;;  %v633_v41 = vrot.slane %v5859_v26, %v5840_v18  ;;  %v239_v42 = vrot.slane %v5853_v24, %v5850_v23  ;;  %v444_v43 = vrot.slane %v5856_v25, %v5850_v23 }
   0xc   :  { %v872_v44 = vsel %vm156_vm2, %v832_v40, %v637_v34  ;;  %v836_v45 = vsel %vm830_vm6, %v243_v35, %v448_v36  ;;  %v831_v46 = vsel %vm830_vm6, %v223_v38, %v428_v39  ;;  %v649_v47 = vrot.slane %v5859_v26, %v5850_v23 }
   0xd   :  { %5148 = vmatprep.subr.msk.mxu1 %vm97_vm0, %v872_v44  ;;  %v876_v49 = vsel %vm156_vm2, %v836_v45, %v653_v37  ;;  %v871_v50 = vsel %vm156_vm2, %v831_v46, %v633_v41  ;;  %v835_v51 = vsel %vm830_vm6, %v239_v42, %v444_v43  ;;  %v235_v52 = vrot.slane %v5853_v24, %v5862_v27 }
   0xe   :  { %5160 = vmatprep.subr.msk.mxu0 %vm97_vm0, %v876_v49  ;;  %5149 = vmatpush1.msk.msra.mxu1 %vm97_vm0, %v871_v50  ;;  %v875_v53 = vsel %vm156_vm2, %v835_v51, %v649_v47  ;;  %v440_v54 = vrot.slane %v5856_v25, %v5862_v27  ;;  %v645_v55 = vrot.slane %v5859_v26, %v5862_v27  ;;  %v5950_v0 = vsub.s32 6, %v5814_v5 }
   0xf   :  { %5161 = vmatpush1.msk.msra.mxu0 %vm97_vm0, %v875_v53  ;;  %5150 = vmatmul.mubr.msk.f32.vlgmr.msra.gmra.mrb[0].mxu1 %vm939_vm7, %v5903_v48  ;;  %v165_v57 = vsel %vm5822_vm5, %v163_v22, %v164_v30  ;;  %v259_v58 = vrot.slane %v5865_v28, %v5827_v13  ;;  %v5944_v62 = vrot.slane %v106_v56, %v5833_v15 }
  0x10   :  { %5162 = vmatmul.mubr.msk.f32.vlgmr.msra.gmra.mrb[0].mxu0 %vm939_vm7, %v5903_v48  ;;  %1142 = vmatprep.mubr.f32.mxu1 %v5745_v19  ;;  %v834_v61 = vsel %vm830_vm6, %v235_v52, %v440_v54  ;;  %v5947_v63 = vrot.slane %v165_v57, %v5833_v15  ;;  %v231_v2 = vrot.slane %v5853_v24, %v5870_v31 }
  0x11   :  { %1320 = vmatprep.mubr.f32.mxu0 %v5745_v19  ;;  %v874_v1 = vsel %vm156_vm2, %v834_v61, %v645_v55  ;;  %v436_v3 = vrot.slane %v5856_v25, %v5870_v31  ;;  %v641_v4 = vrot.slane %v5859_v26, %v5870_v31  ;;  %v464_v7 = vrot.slane %v5944_v62, %v5827_v13 }
  0x12   :  { %5154 = vmatprep.subr.msk.mxu1 %vm97_vm0, %v874_v1  ;;  %v669_v5 = vrot.slane %v5947_v63, %v5827_v13  ;;  %v255_v8 = vrot.slane %v5865_v28, %v5840_v18  ;;  %v460_v9 = vrot.slane %v5944_v62, %v5840_v18 }
  0x13   :  { %16 = vsyncpa [#allocation3], 0  ;;  %5151 = vmatmul.mubr.msk.f32.gmra.mrb[2].mxu1 %vm939_vm7, %v5940_v60  ;;  %v833_v10 = vsel %vm830_vm6, %v231_v2, %v436_v3  ;;  %v665_v12 = vrot.slane %v5947_v63, %v5840_v18  ;;  %v251_v16 = vrot.slane %v5853_v24, %v5932_v59  ;;  %v456_v17 = vrot.slane %v5856_v25, %v5932_v59  ;;  %v5981_v21 = vld [vmem:[%s7928_s0 + $0x14] ss:$8 sps:$4 sm:$0xff]  }
  0x14   :  { %5163 = vmatmul.mubr.msk.f32.gmra.mrb[2].mxu0 %vm939_vm7, %v5940_v60  ;;  %1148 = vmatprep.mubr.f32.mxu1 %v5745_v19  ;;  %v5989_v22 = vld [vmem:[%s7929_s1 + $0x10] sm:$0xff]  ;;  %v840_v32 = vsel %vm830_vm6, %v259_v58, %v464_v7  ;;  %v873_v33 = vsel %vm156_vm2, %v833_v10, %v641_v4  ;;  %v839_v34 = vsel %vm830_vm6, %v255_v8, %v460_v9  ;;  %v107_v38 = vrot.slane %v105_v29, 4  ;;  %v6025_v46 = vld [vmem:[%s7929_s1 + $0x18] sm:$0xff] }
  0x15   :  { %1326 = vmatprep.mubr.f32.mxu0 %v5745_v19  ;;  %v880_v35 = vsel %vm156_vm2, %v840_v32, %v669_v5  ;;  %5155 = vmatpush1.msk.msra.mxu1 %vm97_vm0, %v873_v33  ;;  %v879_v36 = vsel %vm156_vm2, %v839_v34, %v665_v12  ;;  %v661_v37 = vrot.slane %v5859_v26, %v5932_v59  ;;  %v108_v45 = vrot.slane %v5981_v21, 5  ;;  %v6098_v34 = vld [vmem:[%s7928_s0 + $0x20] ss:$8 sps:$4 sm:$0xff]  }
  0x16   :  { %5172 = vmatprep.subr.msk.mxu0 %vm97_vm0, %v880_v35  ;;  %v838_v39 = vsel %vm830_vm6, %v251_v16, %v456_v17  ;;  %v275_v40 = vrot.slane %v5865_v28, %v5830_v14  ;;  %v480_v41 = vrot.slane %v5944_v62, %v5830_v14  ;;  %v685_v42 = vrot.slane %v5947_v63, %v5830_v14 }
  0x17   :  { %5152 = vmatmul.mubr.msk.f32.gmra.mrb[4].mxu1 %vm939_vm7, %v5989_v22  ;;  %5173 = vmatpush1.msk.msra.mxu0 %vm97_vm0, %v879_v36  ;;  %v878_v29 = vsel %vm156_vm2, %v838_v39, %v661_v37  ;;  %v247_v43 = vrot.slane %v5853_v24, %v5950_v0  ;;  %v452_v44 = vrot.slane %v5856_v25, %v5950_v0  ;;  %v166_v25 = vrot.slane %v164_v30, 4 }
  0x18   :  { %5164 = vmatmul.mubr.msk.f32.gmra.mrb[4].mxu0 %vm939_vm7, %v5989_v22  ;;  %1154 = vmatprep.mubr.f32.mxu1 %v5745_v19  ;;  %v844_v47 = vsel %vm830_vm6, %v275_v40, %v480_v41  ;;  %v271_v24 = vrot.slane %v5865_v28, %v5850_v23  ;;  %v657_v50 = vrot.slane %v5859_v26, %v5950_v0  ;;  %v167_v52 = vrot.slane %v5981_v21, 6  ;;  %v915_v41 = vld [vmem:[%s7930_s2] sm:$0xff] }
  0x19   :  { %1332 = vmatprep.mubr.f32.mxu0 %v5745_v19  ;;  %5166 = vmatprep.subr.msk.mxu1 %vm97_vm0, %v878_v29  ;;  %v884_v49 = vsel %vm156_vm2, %v844_v47, %v685_v42  ;;  %v476_v51 = vrot.slane %v5944_v62, %v5850_v23  ;;  %v837_v53 = vsel %vm830_vm6, %v247_v43, %v452_v44  ;;  %v5746_v9 = vmov 0   ;;  %v917_v47 = vld [vmem:[%s7930_s2 + $0x10] sm:$0xff] }
  0x1a   :  { %5184 = vmatprep.subr.msk.mxu0 %vm97_vm0, %v884_v49  ;;  %v267_v30 = vrot.slane %v5865_v28, %v5862_v27  ;;  %v472_v54 = vrot.slane %v5944_v62, %v5862_v27  ;;  %v681_v26 = vrot.slane %v5947_v63, %v5850_v23  ;;  %v677_v55 = vrot.slane %v5947_v63, %v5862_v27 }
  0x1b   :  { %5153 = vmatmul.mubr.msk.f32.gmra.mrb[6].mxu1 %vm939_vm7, %v6025_v46  ;;  %v6054_v56 = vrot.slane %v5847_v20, %v5833_v15  ;;  %v109_v57 = vsel %vm5817_vm3, %v107_v38, %v108_v45  ;;  %v843_v58 = vsel %vm830_vm6, %v271_v24, %v476_v51  ;;  %v877_v20 = vsel %vm156_vm2, %v837_v53, %v657_v50 }
  0x1c   :  { %5165 = vmatmul.mubr.msk.f32.gmra.mrb[6].mxu0 %vm939_vm7, %v6025_v46  ;;  %1225 = vmatprep.mubr.f32.mxu1 %v5745_v19  ;;  %v842_v61 = vsel %vm830_vm6, %v267_v30, %v472_v54  ;;  %v6064_v1 = vrot.slane %v109_v57, %v5833_v15  ;;  %v168_v2 = vsel %vm5822_vm5, %v166_v25, %v167_v52  ;;  %v110_v42 = vrot.slane %v108_v45, 4  ;;  %v918_v57 = vld [vmem:[%s7930_s2 + $0x18] sm:$0xff] }
  0x1d   :  { %1492 = vmatprep.mubr.f32.mxu0 %v5745_v19  ;;  %v291_v3 = vrot.slane %v6054_v56, %v5827_v13  ;;  %v6073_v4 = vrot.slane %v168_v2, %v5833_v15  ;;  %v263_v5 = vrot.slane %v5865_v28, %v5870_v31  ;;  %v468_v8 = vrot.slane %v5944_v62, %v5870_v31 }
  0x1e   :  { %v496_v7 = vrot.slane %v6064_v1, %v5827_v13  ;;  %5705 = vset.pattern.permute.xlu0 %v5746_v9  ;;  %v883_v10 = vsel %vm156_vm2, %v843_v58, %v681_v26  ;;  %v882_v12 = vsel %vm156_vm2, %v842_v61, %v677_v55  ;;  %v287_v16 = vrot.slane %v6054_v56, %v5840_v18 }
  0x1f   :  { %5156 = vmatmul.mubr.msk.f32.vlgmr.msra.gmra.mrb[8].mxu1 %vm939_vm7, %v5903_v48  ;;  %v701_v17 = vrot.slane %v6073_v4, %v5827_v13  ;;  %v492_v33 = vrot.slane %v6064_v1, %v5840_v18  ;;  %v673_v35 = vrot.slane %v5947_v63, %v5870_v31  ;;  %v841_v37 = vsel %vm830_vm6, %v263_v5, %v468_v8 }
  0x20   :  { %5174 = vmatmul.mubr.msk.f32.vlgmr.msra.gmra.mrb[8].mxu0 %vm939_vm7, %v5903_v48  ;;  %1231 = vmatprep.mubr.f32.mxu1 %v5745_v19  ;;  %v848_v32 = vsel %vm830_vm6, %v291_v3, %v496_v7  ;;  %v697_v38 = vrot.slane %v6073_v4, %v5840_v18  ;;  %v283_v39 = vrot.slane %v5865_v28, %v5932_v59  ;;  %v111_v24 = vrot.slane %v6098_v34, 5 }
  0x21   :  { %1498 = vmatprep.mubr.f32.mxu0 %v5745_v19  ;;  %5167 = vmatpush1.msk.msra.mxu1 %vm97_vm0, %v877_v20  ;;  %v888_v36 = vsel %vm156_vm2, %v848_v32, %v701_v17  ;;  %v488_v40 = vrot.slane %v5944_v62, %v5932_v59  ;;  %v847_v29 = vsel %vm830_vm6, %v287_v16, %v492_v33  ;;  %v169_v50 = vrot.slane %v167_v52, 4  ;;  %v916_v52 = vld [vmem:[%s7930_s2 + $0x8] sm:$0xff] }
  0x22   :  { %5185 = vmatpush1.msk.msra.mxu0 %vm97_vm0, %v883_v10  ;;  %5178 = vmatprep.subr.msk.mxu1 %vm97_vm0, %v882_v12  ;;  %v307_v43 = vrot.slane %v6054_v56, %v5830_v14  ;;  %v512_v44 = vrot.slane %v6064_v1, %v5830_v14  ;;  %v6134_v45 = vsel %vm156_vm2, %v841_v37, %v673_v35  ;;  %v170_v54 = vrot.slane %v6098_v34, 6  ;;  %v3101_v35 = vld [vmem:[%s7932_s4 + $0x8] sm:$0xff] }
  0x23   :  { %5157 = vmatmul.mubr.msk.f32.gmra.mrb[10].mxu1 %vm939_vm7, %v5940_v60  ;;  %5196 = vmatprep.subr.msk.mxu0 %vm97_vm0, %v888_v36  ;;  %v693_v25 = vrot.slane %v5947_v63, %v5932_v59  ;;  %v279_v49 = vrot.slane %v5865_v28, %v5950_v0  ;;  %v484_v51 = vrot.slane %v5944_v62, %v5950_v0  ;;  %vm3148_vm8 = vcmask 785408  }
  0x24   :  { %5175 = vmatmul.mubr.msk.f32.gmra.mrb[10].mxu0 %vm939_vm7, %v5940_v60  ;;  %1237 = vmatprep.mubr.f32.mxu1 %v5745_v19  ;;  %v303_v53 = vrot.slane %v6054_v56, %v5850_v23  ;;  %v508_v30 = vrot.slane %v6064_v1, %v5850_v23  ;;  %v887_v26 = vsel %vm156_vm2, %v847_v29, %v697_v38  ;;  %vm4397_vm9 = vcmask 523264  }
  0x25   :  { %1504 = vmatprep.mubr.f32.mxu0 %v5745_v19  ;;  %921 = vperm.xlu0 %5705, %v915_v41   ;;  %v846_v28 = vsel %vm830_vm6, %v283_v39, %v488_v40  ;;  %v717_v62 = vrot.slane %v6073_v4, %v5830_v14  ;;  %v852_v55 = vsel %vm830_vm6, %v307_v43, %v512_v44  ;;  %v5715_v40 = vld [vmem:[%s7928_s0 + $0x24] ss:$8 sps:$4 sm:$0x33]  }
  0x26   :  { %5706 = vset.pattern.permute.xlu1 %v5746_v9  ;;  %v299_v58 = vrot.slane %v6054_v56, %v5862_v27  ;;  %v504_v61 = vrot.slane %v6064_v1, %v5862_v27  ;;  %v689_v20 = vrot.slane %v5947_v63, %v5950_v0  ;;  %v713_v2 = vrot.slane %v6073_v4, %v5850_v23 }
  0x27   :  { %5158 = vmatmul.mubr.msk.f32.gmra.mrb[12].mxu1 %vm939_vm7, %v5989_v22  ;;  %931 = vperm.xlu1 %5706, %v917_v47   ;;  %v6174_v3 = vrot.slane %v5981_v21, %v5833_v15  ;;  %v112_v7 = vsel %vm5817_vm3, %v110_v42, %v111_v24  ;;  %v845_v5 = vsel %vm830_vm6, %v279_v49, %v484_v51  ;;  %v3100_v21 = vld [vmem:[%s7932_s4] sm:$0xff] }
  0x28   :  { %5176 = vmatmul.mubr.msk.f32.gmra.mrb[12].mxu0 %vm939_vm7, %v5989_v22  ;;  %1243 = vmatprep.mubr.f32.mxu1 %v5745_v19  ;;  %v851_v8 = vsel %vm830_vm6, %v303_v53, %v508_v30  ;;  %v6183_v9 = vrot.slane %v112_v7, %v5833_v15  ;;  %v171_v63 = vsel %vm5822_vm5, %v169_v50, %v170_v54  ;;  %v113_v53 = vrot.slane %v111_v24, 4  ;;  %v3102_v24 = vld [vmem:[%s7932_s4 + $0x10] sm:$0xff] }
  0x29   :  { %1510 = vmatprep.mubr.f32.mxu0 %v5745_v19  ;;  %926 = vperm.xlu0 %5705, %v916_v52   ;;  %v709_v10 = vrot.slane %v6073_v4, %v5862_v27  ;;  %v6197_v12 = vrot.slane %v171_v63, %v5833_v15  ;;  %v323_v16 = vrot.slane %v6174_v3, %v5827_v13  ;;  %v114_v52 = vrot.slane %v5715_v40, 5 }
  0x2a   :  { %v850_v17 = vsel %vm830_vm6, %v299_v58, %v504_v61  ;;  %v528_v32 = vrot.slane %v6183_v9, %v5827_v13  ;;  %v319_v33 = vrot.slane %v6174_v3, %v5840_v18  ;;  %v886_v36 = vsel %vm156_vm2, %v846_v28, %v693_v25 }
  0x2b   :  { %5159 = vmatmul.mubr.msk.f32.gmra.mrb[14].mxu1 %vm939_vm7, %v6025_v46  ;;  %936 = vperm.xlu1 %5706, %v918_v57   ;;  %v733_v37 = vrot.slane %v6197_v12, %v5827_v13  ;;  %v524_v38 = vrot.slane %v6183_v9, %v5840_v18  ;;  %v729_v39 = vrot.slane %v6197_v12, %v5840_v18  ;;  %v172_v58 = vrot.slane %v170_v54, 4 }
  0x2c   :  { %5177 = vmatmul.mubr.msk.f32.gmra.mrb[14].mxu0 %vm939_vm7, %v6025_v46  ;;  %1403 = vmatprep.mubr.f32.mxu1 %v5745_v19  ;;  %v892_v41 = vsel %vm156_vm2, %v852_v55, %v717_v62  ;;  %v6225_v42 = vsel %vm156_vm2, %v845_v5, %v689_v20  ;;  %v6228_v29 = vsel %vm156_vm2, %v851_v8, %v713_v2  ;;  %v173_v7 = vrot.slane %v5715_v40, 6 }
  0x2d   :  { %1670 = vmatprep.mubr.f32.mxu0 %v5745_v19  ;;  %3110 = vperm.xlu0 %5705, %v3100_v21   ;;  %v856_v43 = vsel %vm830_vm6, %v323_v16, %v528_v32  ;;  %v6234_v44 = vsel %vm156_vm2, %v850_v17, %v709_v10  ;;  %v295_v47 = vrot.slane %v6054_v56, %v5870_v31  ;;  %v3104_v16 = vld [vmem:[%s7932_s4 + $0x20] sm:$0xff] }
  0x2e   :  { %v855_v25 = vsel %vm830_vm6, %v319_v33, %v524_v38  ;;  %v500_v49 = vrot.slane %v6064_v1, %v5870_v31  ;;  %v339_v51 = vrot.slane %v6174_v3, %v5830_v14  ;;  %v6255_v30 = vsel %vm156_vm2, %v856_v43, %v733_v37 }
  0x2f   :  { %5168 = vmatmul.mubr.msk.f32.vlgmr.msra.gmra.mrb[16].mxu1 %vm939_vm7, %v5903_v48  ;;  %3115 = vperm.xlu1 %5706, %v3101_v35   ;;  %v6245_v50 = vsel %vm156_vm2, %v855_v25, %v729_v39  ;;  %v544_v28 = vrot.slane %v6183_v9, %v5830_v14  ;;  %v749_v62 = vrot.slane %v6197_v12, %v5830_v14 }
  0x30   :  { %5186 = vmatmul.mubr.msk.f32.vlgmr.msra.gmra.mrb[16].mxu0 %vm939_vm7, %v5903_v48  ;;  %1409 = vmatprep.mubr.f32.mxu1 %v5745_v19  ;;  %v516_v55 = vrot.slane %v6064_v1, %v5950_v0  ;;  %v721_v57 = vrot.slane %v6073_v4, %v5950_v0  ;;  %v335_v20 = vrot.slane %v6174_v3, %v5850_v23 }
  0x31   :  { %1676 = vmatprep.mubr.f32.mxu0 %v5745_v19  ;;  %5179 = vmatpush1.msk.msra.mxu1 %vm97_vm0, %v6134_v45  ;;  %v311_v45 = vrot.slane %v6054_v56, %v5950_v0  ;;  %v860_v61 = vsel %vm830_vm6, %v339_v51, %v544_v28  ;;  %v540_v2 = vrot.slane %v6183_v9, %v5850_v23  ;;  %v3106_v51 = vld [vmem:[%s7932_s4 + $0x30] sm:$0xff] }
  0x32   :  { %5197 = vmatpush1.msk.msra.mxu0 %vm97_vm0, %v887_v26  ;;  %5190 = vmatprep.subr.msk.mxu1 %vm97_vm0, %v886_v36  ;;  %v3103_v26 = vld [vmem:[%s7932_s4 + $0x18] sm:$0xff]  ;;  %v6289_v54 = vsel %vm156_vm2, %v860_v61, %v749_v62  ;;  %v745_v8 = vrot.slane %v6197_v12, %v5850_v23  ;;  %v331_v10 = vrot.slane %v6174_v3, %v5862_v27  ;;  %v3105_v36 = vld [vmem:[%s7932_s4 + $0x28] sm:$0xff] }
  0x33   :  { %5169 = vmatmul.mubr.msk.f32.gmra.mrb[18].mxu1 %vm939_vm7, %v5940_v60  ;;  %5208 = vmatprep.subr.msk.mxu0 %vm97_vm0, %v892_v41  ;;  %v853_v5 = vsel %vm830_vm6, %v311_v45, %v516_v55  ;;  %v859_v21 = vsel %vm830_vm6, %v335_v20, %v540_v2  ;;  %v536_v32 = vrot.slane %v6183_v9, %v5862_v27 }
  0x34   :  { %5187 = vmatmul.mubr.msk.f32.gmra.mrb[18].mxu0 %vm939_vm7, %v5940_v60  ;;  %1415 = vmatprep.mubr.f32.mxu1 %v5745_v19  ;;  %v6296_v63 = vsel %vm156_vm2, %v853_v5, %v721_v57  ;;  %v6305_v17 = vsel %vm156_vm2, %v859_v21, %v745_v8  ;;  %v741_v33 = vrot.slane %v6197_v12, %v5862_v27 }
  0x35   :  { %1682 = vmatprep.mubr.f32.mxu0 %v5745_v19  ;;  %3120 = vperm.xlu0 %5705, %v3102_v24   ;;  %v6313_v35 = vrot.slane %v6098_v34, %v5833_v15  ;;  %v115_v37 = vsel %vm5817_vm3, %v113_v53, %v114_v52  ;;  %v174_v38 = vsel %vm5822_vm5, %v172_v58, %v173_v7  ;;  %v3107_v52 = vld [vmem:[%s7932_s4 + $0x38] sm:$0xff]  ;;  %s5747_s4 = smov [#allocation2]  }
  0x36   :  { %3125 = vperm.xlu1 %5706, %v3103_v26   ;;  %v327_v39 = vrot.slane %v6174_v3, %v5870_v31  ;;  %v532_v34 = vrot.slane %v6183_v9, %v5870_v31  ;;  %v858_v40 = vsel %vm830_vm6, %v331_v10, %v536_v32  ;;  %v6333_v41 = vrot.slane %v115_v37, %v5833_v15  ;;  %v4301_v37 = vld [vmem:[%s7934_s6] sm:$0xff] }
  0x37   :  { %5170 = vmatmul.mubr.msk.f32.gmra.mrb[20].mxu1 %vm939_vm7, %v5989_v22  ;;  %v6336_v6 = vrot.slane %v174_v38, %v5833_v15  ;;  %v6340_v11 = vsel %vm156_vm2, %v858_v40, %v741_v33  ;;  %v355_v43 = vrot.slane %v6313_v35, %v5827_v13  ;;  %v737_v25 = vrot.slane %v6197_v12, %v5870_v31 }
  0x38   :  { %5188 = vmatmul.mubr.msk.f32.gmra.mrb[20].mxu0 %vm939_vm7, %v5989_v22  ;;  %1421 = vmatprep.mubr.f32.mxu1 %v5745_v19  ;;  %v560_v15 = vrot.slane %v6333_v41, %v5827_v13  ;;  %v857_v28 = vsel %vm830_vm6, %v327_v39, %v532_v34  ;;  %v351_v62 = vrot.slane %v6313_v35, %v5840_v18 }
  0x39   :  { %1688 = vmatprep.mubr.f32.mxu0 %v5745_v19  ;;  %3130 = vperm.xlu0 %5705, %v3104_v16   ;;  %v765_v53 = vrot.slane %v6336_v6, %v5827_v13  ;;  %v6362_v24 = vsel %vm156_vm2, %v857_v28, %v737_v25  ;;  %v556_v45 = vrot.slane %v6333_v41, %v5840_v18 }
  0x3a   :  { %3135 = vperm.xlu1 %5706, %v3105_v36   ;;  %v761_v13 = vrot.slane %v6336_v6, %v5840_v18  ;;  %v347_v55 = vrot.slane %v6174_v3, %v5932_v59  ;;  %v864_v57 = vsel %vm830_vm6, %v355_v43, %v560_v15  ;;  %v552_v58 = vrot.slane %v6183_v9, %v5932_v59  ;;  %v4303_v15 = vld [vmem:[%s7934_s6 + $0x10] sm:$0xff] }
  0x3b   :  { %5171 = vmatmul.mubr.msk.f32.gmra.mrb[22].mxu1 %vm939_vm7, %v6025_v46  ;;  %v757_v26 = vrot.slane %v6197_v12, %v5932_v59  ;;  %v6380_v18 = vsel %vm156_vm2, %v864_v57, %v765_v53  ;;  %v863_v61 = vsel %vm830_vm6, %v351_v62, %v556_v45  ;;  %v371_v20 = vrot.slane %v6313_v35, %v5830_v14  ;;  %v4304_v45 = vld [vmem:[%s7934_s6 + $0x18] sm:$0xff] }
  0x3c   :  { %5189 = vmatmul.mubr.msk.f32.gmra.mrb[22].mxu0 %vm939_vm7, %v6025_v46  ;;  %1581 = vmatprep.mubr.f32.mxu1 %v5745_v19  ;;  %v6386_v2 = vsel %vm156_vm2, %v863_v61, %v761_v13  ;;  %v862_v7 = vsel %vm830_vm6, %v347_v55, %v552_v58  ;;  %v576_v5 = vrot.slane %v6333_v41, %v5830_v14 }
  0x3d   :  { %1848 = vmatprep.mubr.f32.mxu0 %v5745_v19  ;;  %3140 = vperm.xlu0 %5705, %v3106_v51   ;;  %v781_v8 = vrot.slane %v6336_v6, %v5830_v14  ;;  %v6396_v21 = vsel %vm156_vm2, %v862_v7, %v757_v26  ;;  %v343_v10 = vrot.slane %v6174_v3, %v5950_v0 }
  0x3e   :  { %3145 = vperm.xlu1 %5706, %v3107_v52   ;;  %v548_v16 = vrot.slane %v6183_v9, %v5950_v0  ;;  %v753_v32 = vrot.slane %v6197_v12, %v5950_v0  ;;  %v868_v14 = vsel %vm830_vm6, %v371_v20, %v576_v5  ;;  %v367_v33 = vrot.slane %v6313_v35, %v5850_v23 }
  0x3f   :  { %5180 = vmatmul.mubr.msk.f32.vlgmr.msra.gmra.mrb[24].mxu1 %vm939_vm7, %v5903_v48  ;;  %v572_v36 = vrot.slane %v6333_v41, %v5850_v23  ;;  %v6416_v3 = vsel %vm156_vm2, %v868_v14, %v781_v8  ;;  %v777_v12 = vrot.slane %v6336_v6, %v5850_v23  ;;  %v363_v39 = vrot.slane %v6313_v35, %v5862_v27  ;;  %v4302_v23 = vld [vmem:[%s7934_s6 + $0x8] sm:$0xff]  ;;  %v4876_v14 = vld [vmem:[%s7936_s8 + $0x20] sm:$0xff] }
  0x40   :  { %5198 = vmatmul.mubr.msk.f32.vlgmr.msra.gmra.mrb[24].mxu0 %vm939_vm7, %v5903_v48  ;;  %1587 = vmatprep.mubr.f32.mxu1 %v5745_v19  ;;  %v861_v9 = vsel %vm830_vm6, %v343_v10, %v548_v16  ;;  %v773_v34 = vrot.slane %v6336_v6, %v5862_v27  ;;  %v564_v40 = vrot.slane %v6333_v41, %v5870_v31  ;;  %v4306_v8 = vld [vmem:[%s7934_s6 + $0x28] sm:$0xff] }
  0x41   :  { %1854 = vmatprep.mubr.f32.mxu0 %v5745_v19  ;;  %5191 = vmatpush1.msk.msra.mxu1 %vm97_vm0, %v6225_v42  ;;  %v6429_v42 = vsel %vm156_vm2, %v861_v9, %v753_v32  ;;  %v867_v38 = vsel %vm830_vm6, %v367_v33, %v572_v36  ;;  %v769_v43 = vrot.slane %v6336_v6, %v5870_v31  ;;  %v4873_v16 = vld [vmem:[%s7936_s8 + $0x8] sm:$0xff]  ;;  %v4874_v32 = vld [vmem:[%s7936_s8 + $0x10] sm:$0xff]  ;;  %v4875_v33 = vld [vmem:[%s7936_s8 + $0x18] sm:$0xff] }
  0x42   :  { %5209 = vmatpush1.msk.msra.mxu0 %vm97_vm0, %v6228_v29  ;;  %5202 = vmatprep.subr.msk.mxu1 %vm97_vm0, %v6234_v44  ;;  %v6442_v29 = vsel %vm156_vm2, %v867_v38, %v777_v12  ;;  %v568_v44 = vrot.slane %v6333_v41, %v5862_v27  ;;  %v379_v27 = vrot.slane %v6313_v35, %v5932_v59  ;;  %v4879_v36 = vld [vmem:[%s7936_s8 + $0x38] sm:$0xff] }
  0x43   :  { %5181 = vmatmul.mubr.msk.f32.gmra.mrb[26].mxu1 %vm939_vm7, %v5940_v60  ;;  %5220 = vmatprep.subr.msk.mxu0 %vm97_vm0, %v6255_v30  ;;  %v359_v30 = vrot.slane %v6313_v35, %v5870_v31  ;;  %v584_v51 = vrot.slane %v6333_v41, %v5932_v59  ;;  %v789_v62 = vrot.slane %v6336_v6, %v5932_v59 }
  0x44   :  { %5199 = vmatmul.mubr.msk.f32.gmra.mrb[26].mxu0 %vm939_vm7, %v5940_v60  ;;  %1593 = vmatprep.mubr.f32.mxu1 %v5745_v19  ;;  %v866_v25 = vsel %vm830_vm6, %v363_v39, %v568_v44  ;;  %v375_v52 = vrot.slane %v6313_v35, %v5950_v0  ;;  %v580_v57 = vrot.slane %v6333_v41, %v5950_v0 }
  0x45   :  { %1860 = vmatprep.mubr.f32.mxu0 %v5745_v19  ;;  %4319 = vperm.xlu0 %5705, %v4301_v37   ;;  %v6467_v53 = vsel %vm156_vm2, %v866_v25, %v773_v34  ;;  %v865_v28 = vsel %vm830_vm6, %v359_v30, %v564_v40  ;;  %v870_v55 = vsel %vm830_vm6, %v379_v27, %v584_v51 }
  0x46   :  { %4324 = vperm.xlu1 %5706, %v4302_v23   ;;  %v6480_v13 = vsel %vm156_vm2, %v865_v28, %v769_v43  ;;  %v785_v58 = vrot.slane %v6336_v6, %v5950_v0  ;;  %v315_v35 = vrot.slane %v6054_v56, %v5932_v59  ;;  %v520_v26 = vrot.slane %v6064_v1, %v5932_v59  ;;  %v4305_v6 = vld [vmem:[%s7934_s6 + $0x20] sm:$0xff]  ;;  %v4307_v56 = vld [vmem:[%s7934_s6 + $0x30] sm:$0xff]  ;;  %v4308_v1 = vld [vmem:[%s7934_s6 + $0x38] sm:$0xff] }
  0x47   :  { %5182 = vmatmul.mubr.msk.f32.gmra.mrb[28].mxu1 %vm939_vm7, %v5989_v22  ;;  %v6495_v61 = vsel %vm156_vm2, %v870_v55, %v789_v62  ;;  %v869_v41 = vsel %vm830_vm6, %v375_v52, %v580_v57  ;;  %v705_v0 = vrot.slane %v6073_v4, %v5870_v31  ;;  %v849_v7 = vsel %vm830_vm6, %v295_v47, %v500_v49  ;;  %v4310_v47 = vld [vmem:[%s7934_s6 + $0x48] sm:$0xff]  ;;  %v4311_v49 = vld [vmem:[%s7934_s6 + $0x50] sm:$0xff] }
  0x48   :  { %5200 = vmatmul.mubr.msk.f32.gmra.mrb[28].mxu0 %vm939_vm7, %v5989_v22  ;;  %1599 = vmatprep.mubr.f32.mxu1 %v5745_v19  ;;  %v6505_v20 = vsel %vm156_vm2, %v869_v41, %v785_v58  ;;  %v725_v5 = vrot.slane %v6073_v4, %v5932_v59  ;;  %v854_v10 = vsel %vm830_vm6, %v315_v35, %v520_v26  ;;  %v4309_v4 = vld [vmem:[%s7934_s6 + $0x40] sm:$0xff] }
  0x49   :  { %1866 = vmatprep.mubr.f32.mxu0 %v5745_v19  ;;  %4329 = vperm.xlu0 %5705, %v4303_v15   ;;  %v889_v31 = vsel %vm156_vm2, %v849_v7, %v705_v0 }
  0x4a   :  { %4334 = vperm.xlu1 %5706, %v4304_v45   ;;  %v894_v59 = vsel %vm156_vm2, %v854_v10, %v725_v5 }
  0x4b   :  { %5183 = vmatmul.mubr.msk.f32.gmra.mrb[30].mxu1 %vm939_vm7, %v6025_v46 }
  0x4c   :  { %5201 = vmatmul.mubr.msk.f32.gmra.mrb[30].mxu0 %vm939_vm7, %v6025_v46  ;;  %1759 = vmatprep.mubr.f32.mxu1 %v5745_v19 }
  0x4d   :  { %2026 = vmatprep.mubr.f32.mxu0 %v5745_v19  ;;  %4339 = vperm.xlu0 %5705, %v4305_v6  }
  0x4e   :  { %4344 = vperm.xlu1 %5706, %v4306_v8  }
  0x4f   :  { %5192 = vmatmul.mubr.msk.f32.vlgmr.msra.gmra.mrb[32].mxu1 %vm939_vm7, %v5903_v48 }
  0x50   :  { %5210 = vmatmul.mubr.msk.f32.vlgmr.msra.gmra.mrb[32].mxu0 %vm939_vm7, %v5903_v48  ;;  %1765 = vmatprep.mubr.f32.mxu1 %v5745_v19 }
  0x51   :  { %2032 = vmatprep.mubr.f32.mxu0 %v5745_v19  ;;  %5203 = vmatpush1.msk.msra.mxu1 %vm97_vm0, %v889_v31 }
  0x52   :  { %5221 = vmatpush1.msk.msra.mxu0 %vm97_vm0, %v6245_v50  ;;  %5214 = vmatprep.subr.msk.mxu1 %vm97_vm0, %v894_v59  ;;  %v4312_v50 = vld [vmem:[%s7934_s6 + $0x58] sm:$0xff] }
  0x53   :  { %5193 = vmatmul.mubr.msk.f32.gmra.mrb[34].mxu1 %vm939_vm7, %v5940_v60  ;;  %5232 = vmatprep.subr.msk.mxu0 %vm97_vm0, %v6289_v54  ;;  %v4313_v54 = vld [vmem:[%s7934_s6 + $0x60] sm:$0xff] }
  0x54   :  { %5211 = vmatmul.mubr.msk.f32.gmra.mrb[34].mxu0 %vm939_vm7, %v5940_v60  ;;  %1771 = vmatprep.mubr.f32.mxu1 %v5745_v19 }
  0x55   :  { %2038 = vmatprep.mubr.f32.mxu0 %v5745_v19  ;;  %4349 = vperm.xlu0 %5705, %v4307_v56  }
  0x56   :  { %4354 = vperm.xlu1 %5706, %v4308_v1  }
  0x57   :  { %5194 = vmatmul.mubr.msk.f32.gmra.mrb[36].mxu1 %vm939_vm7, %v5989_v22 }
  0x58   :  { %5212 = vmatmul.mubr.msk.f32.gmra.mrb[36].mxu0 %vm939_vm7, %v5989_v22  ;;  %1777 = vmatprep.mubr.f32.mxu1 %v5745_v19 }
  0x59   :  { %2044 = vmatprep.mubr.f32.mxu0 %v5745_v19  ;;  %4359 = vperm.xlu0 %5705, %v4309_v4  }
  0x5a   :  { %4364 = vperm.xlu1 %5706, %v4310_v47  }
  0x5b   :  { %5195 = vmatmul.mubr.msk.f32.gmra.mrb[38].mxu1 %vm939_vm7, %v6025_v46 }
  0x5c   :  { %5213 = vmatmul.mubr.msk.f32.gmra.mrb[38].mxu0 %vm939_vm7, %v6025_v46  ;;  %1937 = vmatprep.mubr.f32.mxu1 %v5745_v19 }
  0x5d   :  { %2204 = vmatprep.mubr.f32.mxu0 %v5745_v19  ;;  %4369 = vperm.xlu0 %5705, %v4311_v49  }
  0x5e   :  { %4374 = vperm.xlu1 %5706, %v4312_v50  }
  0x5f   :  { %5204 = vmatmul.mubr.msk.f32.vlgmr.msra.gmra.mrb[40].mxu1 %vm939_vm7, %v5903_v48 }
  0x60   :  { %5222 = vmatmul.mubr.msk.f32.vlgmr.msra.gmra.mrb[40].mxu0 %vm939_vm7, %v5903_v48  ;;  %1943 = vmatprep.mubr.f32.mxu1 %v5745_v19 }
  0x61   :  { %2210 = vmatprep.mubr.f32.mxu0 %v5745_v19  ;;  %5215 = vmatpush1.msk.msra.mxu1 %vm97_vm0, %v6296_v63  ;;  %v4314_v63 = vld [vmem:[%s7934_s6 + $0x68] sm:$0xff] }
  0x62   :  { %5233 = vmatpush1.msk.msra.mxu0 %vm97_vm0, %v6305_v17  ;;  %5226 = vmatprep.subr.msk.mxu1 %vm97_vm0, %v6340_v11  ;;  %v4315_v17 = vld [vmem:[%s7934_s6 + $0x70] sm:$0xff]  ;;  %v4316_v11 = vld [vmem:[%s7934_s6 + $0x78] sm:$0xff] }
  0x63   :  { %5205 = vmatmul.mubr.msk.f32.gmra.mrb[42].mxu1 %vm939_vm7, %v5940_v60  ;;  %5244 = vmatprep.subr.msk.mxu0 %vm97_vm0, %v6380_v18  ;;  %v4872_v18 = vld [vmem:[%s7936_s8] sm:$0xff] }
  0x64   :  { %5223 = vmatmul.mubr.msk.f32.gmra.mrb[42].mxu0 %vm939_vm7, %v5940_v60  ;;  %1949 = vmatprep.mubr.f32.mxu1 %v5745_v19 }
  0x65   :  { %2216 = vmatprep.mubr.f32.mxu0 %v5745_v19  ;;  %4379 = vperm.xlu0 %5705, %v4313_v54  }
  0x66   :  { %4384 = vperm.xlu1 %5706, %v4314_v63  }
  0x67   :  { %5206 = vmatmul.mubr.msk.f32.gmra.mrb[44].mxu1 %vm939_vm7, %v5989_v22 }
  0x68   :  { %5224 = vmatmul.mubr.msk.f32.gmra.mrb[44].mxu0 %vm939_vm7, %v5989_v22  ;;  %1955 = vmatprep.mubr.f32.mxu1 %v5745_v19 }
  0x69   :  { %2222 = vmatprep.mubr.f32.mxu0 %v5745_v19  ;;  %4389 = vperm.xlu0 %5705, %v4315_v17  }
  0x6a   :  { %4394 = vperm.xlu1 %5706, %v4316_v11  }
  0x6b   :  { %5207 = vmatmul.mubr.msk.f32.gmra.mrb[46].mxu1 %vm939_vm7, %v6025_v46 }
  0x6c   :  { %5225 = vmatmul.mubr.msk.f32.gmra.mrb[46].mxu0 %vm939_vm7, %v6025_v46  ;;  %2115 = vmatprep.mubr.f32.mxu1 %v5745_v19 }
  0x6d   :  { %2382 = vmatprep.mubr.f32.mxu0 %v5745_v19  ;;  %4882 = vperm.xlu0 %5705, %v4872_v18  }
  0x6e   :  { %4887 = vperm.xlu1 %5706, %v4873_v16  }
  0x6f   :  { %5216 = vmatmul.mubr.msk.f32.vlgmr.msra.gmra.mrb[48].mxu1 %vm939_vm7, %v5903_v48 }
  0x70   :  { %5234 = vmatmul.mubr.msk.f32.vlgmr.msra.gmra.mrb[48].mxu0 %vm939_vm7, %v5903_v48  ;;  %2121 = vmatprep.mubr.f32.mxu1 %v5745_v19 }
  0x71   :  { %2388 = vmatprep.mubr.f32.mxu0 %v5745_v19  ;;  %5227 = vmatpush1.msk.msra.mxu1 %vm97_vm0, %v6362_v24  ;;  %v4878_v24 = vld [vmem:[%s7936_s8 + $0x30] sm:$0xff] }
  0x72   :  { %5245 = vmatpush1.msk.msra.mxu0 %vm97_vm0, %v6386_v2  ;;  %4892 = vperm.xlu0 %5705, %v4874_v32   ;;  %v4877_v2 = vld [vmem:[%s7936_s8 + $0x28] sm:$0xff] }
  0x73   :  { %5217 = vmatmul.mubr.msk.f32.gmra.mrb[50].mxu1 %vm939_vm7, %v5940_v60  ;;  %5238 = vmatprep.subr.msk.mxu1 %vm97_vm0, %v6396_v21  ;;  %v5050_v21 = vld [vmem:[%s7938_s10] sm:$0x1f] }
  0x74   :  { %5235 = vmatmul.mubr.msk.f32.gmra.mrb[50].mxu0 %vm939_vm7, %v5940_v60  ;;  %2127 = vmatprep.mubr.f32.mxu1 %v5745_v19 }
  0x75   :  { %2394 = vmatprep.mubr.f32.mxu0 %v5745_v19  ;;  %5256 = vmatprep.subr.msk.mxu0 %vm97_vm0, %v6416_v3 }
  0x76   :  { %4902 = vperm.xlu0 %5705, %v4876_v14   ;;  %4897 = vperm.xlu1 %5706, %v4875_v33  }
  0x77   :  { %5218 = vmatmul.mubr.msk.f32.gmra.mrb[52].mxu1 %vm939_vm7, %v5989_v22 }
  0x78   :  { %5236 = vmatmul.mubr.msk.f32.gmra.mrb[52].mxu0 %vm939_vm7, %v5989_v22  ;;  %2133 = vmatprep.mubr.f32.mxu1 %v5745_v19 }
  0x79   :  { %2400 = vmatprep.mubr.f32.mxu0 %v5745_v19 }
  0x7a   :  { %4912 = vperm.xlu0 %5705, %v4878_v24   ;;  %4907 = vperm.xlu1 %5706, %v4877_v2  }
  0x7b   :  { %5219 = vmatmul.mubr.msk.f32.gmra.mrb[54].mxu1 %vm939_vm7, %v6025_v46 }
  0x7c   :  { %5237 = vmatmul.mubr.msk.f32.gmra.mrb[54].mxu0 %vm939_vm7, %v6025_v46  ;;  %2293 = vmatprep.mubr.f32.mxu1 %v5745_v19 }
  0x7d   :  { %2560 = vmatprep.mubr.f32.mxu0 %v5745_v19 }
  0x7e   :  { %5053 = vperm.xlu0 %5705, %v5050_v21   ;;  %4917 = vperm.xlu1 %5706, %v4879_v36  }
  0x7f   :  { %5228 = vmatmul.mubr.msk.f32.vlgmr.msra.gmra.mrb[56].mxu1 %vm939_vm7, %v5903_v48 }
  0x80   :  { %5246 = vmatmul.mubr.msk.f32.vlgmr.msra.gmra.mrb[56].mxu0 %vm939_vm7, %v5903_v48  ;;  %2299 = vmatprep.mubr.f32.mxu1 %v5745_v19 }
  0x81   :  { %2566 = vmatprep.mubr.f32.mxu0 %v5745_v19  ;;  %5239 = vmatpush1.msk.msra.mxu1 %vm97_vm0, %v6429_v42 }
  0x82   :  { %5257 = vmatpush1.msk.msra.mxu0 %vm97_vm0, %v6442_v29  ;;  %5250 = vmatprep.subr.msk.mxu1 %vm97_vm0, %v6467_v53 }
  0x83   :  { %5229 = vmatmul.mubr.msk.f32.gmra.mrb[58].mxu1 %vm939_vm7, %v5940_v60 }
  0x84   :  { %5247 = vmatmul.mubr.msk.f32.gmra.mrb[58].mxu0 %vm939_vm7, %v5940_v60  ;;  %2305 = vmatprep.mubr.f32.mxu1 %v5745_v19 }
  0x85   :  { %2572 = vmatprep.mubr.f32.mxu0 %v5745_v19 }
  0x87   :  { %5230 = vmatmul.mubr.msk.f32.gmra.mrb[60].mxu1 %vm939_vm7, %v5989_v22 }
  0x88   :  { %5248 = vmatmul.mubr.msk.f32.gmra.mrb[60].mxu0 %vm939_vm7, %v5989_v22  ;;  %2311 = vmatprep.mubr.f32.mxu1 %v5745_v19 }
  0x89   :  { %2578 = vmatprep.mubr.f32.mxu0 %v5745_v19 }
  0x8b   :  { %5231 = vmatmul.mubr.msk.f32.gmra.mrb[62].mxu1 %vm939_vm7, %v6025_v46 }
  0x8c   :  { %5249 = vmatmul.mubr.msk.f32.gmra.mrb[62].mxu0 %vm939_vm7, %v6025_v46  ;;  %2471 = vmatprep.mubr.f32.mxu1 %v5745_v19 }
  0x8d   :  { %2738 = vmatprep.mubr.f32.mxu0 %v5745_v19 }
  0x8f   :  { %5240 = vmatmul.mubr.msk.f32.vlgmr.msra.gmra.mrb[64].mxu1 %vm939_vm7, %v5903_v48 }
  0x90   :  { %5258 = vmatmul.mubr.msk.f32.vlgmr.msra.gmra.mrb[64].mxu0 %vm939_vm7, %v5903_v48  ;;  %2477 = vmatprep.mubr.f32.mxu1 %v5745_v19 }
  0x91   :  { %2744 = vmatprep.mubr.f32.mxu0 %v5745_v19  ;;  %5251 = vmatpush1.msk.msra.mxu1 %vm97_vm0, %v6480_v13 }
  0x92   :  { %5262 = vmatprep.subr.msk.mxu1 %vm97_vm0, %v6495_v61 }
  0x93   :  { %5241 = vmatmul.mubr.msk.f32.gmra.mrb[66].mxu1 %vm939_vm7, %v5940_v60 }
  0x94   :  { %5259 = vmatmul.mubr.msk.f32.gmra.mrb[66].mxu0 %vm939_vm7, %v5940_v60  ;;  %2483 = vmatprep.mubr.f32.mxu1 %v5745_v19 }
  0x95   :  { %2750 = vmatprep.mubr.f32.mxu0 %v5745_v19 }
  0x97   :  { %5242 = vmatmul.mubr.msk.f32.gmra.mrb[68].mxu1 %vm939_vm7, %v5989_v22 }
  0x98   :  { %5260 = vmatmul.mubr.msk.f32.gmra.mrb[68].mxu0 %vm939_vm7, %v5989_v22  ;;  %2489 = vmatprep.mubr.f32.mxu1 %v5745_v19 }
  0x99   :  { %2756 = vmatprep.mubr.f32.mxu0 %v5745_v19 }
  0x9b   :  { %5243 = vmatmul.mubr.msk.f32.gmra.mrb[70].mxu1 %vm939_vm7, %v6025_v46 }
  0x9c   :  { %5261 = vmatmul.mubr.msk.f32.gmra.mrb[70].mxu0 %vm939_vm7, %v6025_v46  ;;  %2649 = vmatprep.mubr.f32.mxu1 %v5745_v19 }
  0x9d   :  { %3237 = vmatprep.mubr.f32.mxu0 %v5745_v19 }
  0x9f   :  { %5252 = vmatmul.mubr.msk.f32.vlgmr.msra.gmra.mrb[72].mxu1 %vm939_vm7, %v5903_v48 }
  0xa0   :  { %2655 = vmatprep.mubr.f32.mxu1 %v5745_v19  ;;  %5263 = vmatpush1.msk.msra.mxu1 %vm97_vm0, %v6505_v20 }
  0xa3   :  { %5253 = vmatmul.mubr.msk.f32.gmra.mrb[74].mxu1 %vm939_vm7, %v5940_v60 }
  0xa4   :  { %2661 = vmatprep.mubr.f32.mxu1 %v5745_v19 }
  0xa6   :  { %v6792_v57 = vpop.permute.xlu1 %931 }
  0xa7   :  { %5254 = vmatmul.mubr.msk.f32.gmra.mrb[76].mxu1 %vm939_vm7, %v5989_v22 }
  0xa8   :  { %2667 = vmatprep.mubr.f32.mxu1 %v5745_v19 }
  0xaa   :  { %v6806_v17 = vpop.permute.xlu1 %936 }
  0xab   :  { %5255 = vmatmul.mubr.msk.f32.gmra.mrb[78].mxu1 %vm939_vm7, %v6025_v46 }
  0xac   :  { %2827 = vmatprep.mubr.f32.mxu1 %v5745_v19 }
  0xaf   :  { %5264 = vmatmul.mubr.msk.f32.vlgmr.msra.gmra.mrb[80].mxu1 %vm939_vm7, %v5903_v48 }
  0xb0   :  { %2833 = vmatprep.mubr.f32.mxu1 %v5745_v19 }
  0xb3   :  { %5265 = vmatmul.mubr.msk.f32.gmra.mrb[82].mxu1 %vm939_vm7, %v5940_v60 }
  0xb4   :  { %2839 = vmatprep.mubr.f32.mxu1 %v5745_v19 }
  0xb7   :  { %5266 = vmatmul.mubr.msk.f32.gmra.mrb[84].mxu1 %vm939_vm7, %v5989_v22 }
  0xb8   :  { %2845 = vmatprep.mubr.f32.mxu1 %v5745_v19 }
  0xbb   :  { %5267 = vmatmul.mubr.msk.f32.gmra.mrb[86].mxu1 %vm939_vm7, %v6025_v46  ;;  %v6775_v46 = vpop.permute.xlu0 %921 }
  0xbc   :  { %3350 = vmatprep.mubr.f32.mxu1 %v5745_v19 }
  0xbf   :  { %v6786_v28 = vpop.permute.xlu0 %926 }
  0xe2   :  { %v1138_v3 = vpop.f32.mrb[0].mxu1 }
  0xe3   :  { %v1140_v9 = vpop.f32.mrb[1].mxu1  ;;  %v6763_v48 = vpop.f32.mrb[0].mxu0  ;;  %v1139_v43 = vadd.f32 %v1138_v3, %v6775_v46 }
  0xe4   :  { %v6765_v12 = vpop.f32.mrb[1].mxu0  ;;  %v1141_v25 = vadd.f32 %v1140_v9, %v6775_v46 }
  0xe5   :  { %v2852_v45 = vmax.f32 %v1139_v43, 0.0 }
  0xe6   :  { %v1144_v37 = vpop.f32.mrb[2].mxu1  ;;  %v2853_v58 = vmax.f32 %v1141_v25, 0.0 }
  0xe7   :  { %v1146_v60 = vpop.f32.mrb[3].mxu1  ;;  %v6767_v42 = vpop.f32.mrb[2].mxu0  ;;  %v1145_v13 = vadd.f32 %v1144_v37, %v6786_v28 }
  0xe8   :  { %v6769_v38 = vpop.f32.mrb[3].mxu0  ;;  %v1147_v35 = vadd.f32 %v1146_v60, %v6786_v28  ;;  %v1317_v60 = vadd.f32 %v6763_v48, %v6775_v46 }
  0xe9   :  { %v2892_v10 = vmax.f32 %v1145_v13, 0.0 }
  0xea   :  { %v1150_v22 = vpop.f32.mrb[4].mxu1  ;;  %v2893_v56 = vmax.f32 %v1147_v35, 0.0  ;;  %v2856_v13 = vmax.f32 %v1317_v60, 0.0 }
  0xeb   :  { %v1152_v39 = vpop.f32.mrb[5].mxu1  ;;  %v6771_v23 = vpop.f32.mrb[4].mxu0  ;;  %v1151_v31 = vadd.f32 %v1150_v22, %v6792_v57 }
  0xec   :  { %v6773_v29 = vpop.f32.mrb[5].mxu0  ;;  %v1153_v1 = vadd.f32 %v1152_v39, %v6792_v57 }
  0xed   :  { %v2932_v32 = vmax.f32 %v1151_v31, 0.0 }
  0xee   :  { %v1156_v44 = vpop.f32.mrb[6].mxu1  ;;  %v2933_v2 = vmax.f32 %v1153_v1, 0.0  ;;  %v1329_v1 = vadd.f32 %v6771_v23, %v6792_v57 }
  0xef   :  { %v1158_v34 = vpop.f32.mrb[7].mxu1  ;;  %v6777_v30 = vpop.f32.mrb[6].mxu0  ;;  %v1157_v14 = vadd.f32 %v1156_v44, %v6806_v17  ;;  %v1319_v44 = vadd.f32 %v6765_v12, %v6775_v46 }
  0xf0   :  { %v6779_v40 = vpop.f32.mrb[7].mxu0  ;;  %v1159_v21 = vadd.f32 %v1158_v34, %v6806_v17 }
  0xf2   :  { %v1227_v27 = vpop.f32.mrb[8].mxu1 }
  0xf3   :  { %v1228_v51 = vadd.f32 %v1227_v27, %v6775_v46  ;;  %v1229_v15 = vpop.f32.mrb[9].mxu1  ;;  %v6784_v53 = vpop.f32.mrb[8].mxu0 }
  0xf4   :  { %v1230_v62 = vadd.f32 %v1229_v15, %v6775_v46  ;;  %v6789_v52 = vpop.f32.mrb[9].mxu0 }
  0xf5   :  { %v2854_v55 = vmax.f32 %v1228_v51, 0.0  ;;  %v2972_v51 = vmax.f32 %v1157_v14, 0.0 }
  0xf6   :  { %v2855_v26 = vmax.f32 %v1230_v62, 0.0  ;;  %v1233_v61 = vpop.f32.mrb[10].mxu1  ;;  %v2973_v62 = vmax.f32 %v1159_v21, 0.0 }
  0xf7   :  { %v3012_v41 = vmax.f32 %v2852_v45, %v2854_v55  ;;  %v1234_v0 = vadd.f32 %v1233_v61, %v6786_v28  ;;  %v1235_v6 = vpop.f32.mrb[11].mxu1  ;;  %v6796_v20 = vpop.f32.mrb[10].mxu0  ;;  %v2857_v61 = vmax.f32 %v1319_v44, 0.0 }
  0xf8   :  { %v3013_v7 = vmax.f32 %v2853_v58, %v2855_v26  ;;  %v1236_v5 = vadd.f32 %v1235_v6, %v6786_v28  ;;  %v6799_v8 = vpop.f32.mrb[11].mxu0  ;;  %v1323_v58 = vadd.f32 %v6767_v42, %v6786_v28 }
  0xf9   :  { %v2894_v59 = vmax.f32 %v1234_v0, 0.0  ;;  %v1325_v0 = vadd.f32 %v6769_v38, %v6786_v28 }
  0xfa   :  { %v2895_v4 = vmax.f32 %v1236_v5, 0.0  ;;  %v1239_v47 = vpop.f32.mrb[12].mxu1  ;;  %v2896_v42 = vmax.f32 %v1323_v58, 0.0  ;;  %v1497_v58 = vadd.f32 %v6789_v52, %v6775_v46 }
  0xfb   :  { %v3014_v49 = vmax.f32 %v2892_v10, %v2894_v59  ;;  %v1240_v50 = vadd.f32 %v1239_v47, %v6792_v57  ;;  %v1241_v54 = vpop.f32.mrb[13].mxu1  ;;  %v6804_v63 = vpop.f32.mrb[12].mxu0  ;;  %v2897_v38 = vmax.f32 %v1325_v0, 0.0 }
  0xfc   :  { %v3015_v11 = vmax.f32 %v2893_v56, %v2895_v4  ;;  %v1242_v18 = vadd.f32 %v1241_v54, %v6792_v57  ;;  %v6809_v16 = vpop.f32.mrb[13].mxu0  ;;  %v1331_v54 = vadd.f32 %v6773_v29, %v6792_v57 }
  0xfd   :  { %v5367_v33 = vpack.c.bf16 %v3014_v49, %v3012_v41  ;;  %v2934_v24 = vmax.f32 %v1240_v50, 0.0 }
  0xfe   :  { %v2935_v36 = vmax.f32 %v1242_v18, 0.0  ;;  %v1245_v3 = vpop.f32.mrb[14].mxu1  ;;  %v5365_v9 = vpack.c.bf16 %v3015_v11, %v3013_v7  ;;  %v2937_v29 = vmax.f32 %v1331_v54, 0.0 }
  0xff   :  { %v3016_v37 = vmax.f32 %v2932_v32, %v2934_v24  ;;  %v1246_v22 = vadd.f32 %v1245_v3, %v6806_v17  ;;  %v1247_v39 = vpop.f32.mrb[15].mxu1  ;;  %v6816_v43 = vpop.f32.mrb[14].mxu0  ;;  %v2936_v24 = vmax.f32 %v1329_v1, 0.0 }
 0x100   :  { %v3017_v25 = vmax.f32 %v2933_v2, %v2935_v36  ;;  %v1248_v27 = vadd.f32 %v1247_v39, %v6806_v17  ;;  %5366 = vmatprep.subr.bf16.mxu0 %v5365_v9  ;;  %v6821_v34 = vpop.f32.mrb[15].mxu0  ;;  %v1335_v2 = vadd.f32 %v6777_v30, %v6806_v17 }
 0x101   :  { %v2974_v15 = vmax.f32 %v1246_v22, 0.0  ;;  %5368 = vmatpush1.bf16.msra.mxu0 %v5367_v33 }
 0x102   :  { %v2975_v45 = vmax.f32 %v1248_v27, 0.0  ;;  %v1405_v48 = vpop.f32.mrb[16].mxu1 }
 0x103   :  { %v3018_v55 = vmax.f32 %v2972_v51, %v2974_v15  ;;  %v1406_v35 = vadd.f32 %v1405_v48, %v6775_v46  ;;  %v1407_v26 = vpop.f32.mrb[17].mxu1  ;;  %v6826_v12 = vpop.f32.mrb[16].mxu0  ;;  %v2976_v15 = vmax.f32 %v1335_v2, 0.0 }
 0x104   :  { %v3019_v41 = vmax.f32 %v2973_v62, %v2975_v45  ;;  %v1408_v6 = vadd.f32 %v1407_v26, %v6775_v46  ;;  %v6831_v7 = vpop.f32.mrb[17].mxu0  ;;  %v1495_v62 = vadd.f32 %v6784_v53, %v6775_v46 }
 0x105   :  { %v5371_v5 = vpack.c.bf16 %v3018_v55, %v3016_v37  ;;  %v2858_v10 = vmax.f32 %v1406_v35, 0.0  ;;  %v1337_v37 = vadd.f32 %v6779_v40, %v6806_v17 }
 0x106   :  { %v2859_v31 = vmax.f32 %v1408_v6, 0.0  ;;  %v1411_v59 = vpop.f32.mrb[18].mxu1  ;;  %v5369_v56 = vpack.c.bf16 %v3019_v41, %v3017_v25  ;;  %v2860_v6 = vmax.f32 %v1495_v62, 0.0 }
 0x107   :  { %v3020_v4 = vmax.f32 %v2856_v13, %v2858_v10  ;;  %v1412_v47 = vadd.f32 %v1411_v59, %v6786_v28  ;;  %v1413_v49 = vpop.f32.mrb[19].mxu1  ;;  %v6836_v50 = vpop.f32.mrb[18].mxu0  ;;  %v2977_v40 = vmax.f32 %v1337_v37, 0.0 }
 0x108   :  { %v3021_v11 = vmax.f32 %v2857_v61, %v2859_v31  ;;  %v1414_v18 = vadd.f32 %v1413_v49, %v6786_v28  ;;  %5370 = vmatprep.subr.bf16.mxu0 %v5369_v56  ;;  %v6841_v32 = vpop.f32.mrb[19].mxu0  ;;  %v2861_v56 = vmax.f32 %v1497_v58, 0.0 }
 0x109   :  { %v2898_v14 = vmax.f32 %v1412_v47, 0.0  ;;  %5372 = vmatpush1.bf16.msra.mxu0 %v5371_v5  ;;  %v1501_v5 = vadd.f32 %v6796_v20, %v6786_v28 }
 0x10a   :  { %v2899_v33 = vmax.f32 %v1414_v18, 0.0  ;;  %v1417_v23 = vpop.f32.mrb[20].mxu1 }
 0x10b   :  { %v3022_v21 = vmax.f32 %v2896_v42, %v2898_v14  ;;  %v1418_v36 = vadd.f32 %v1417_v23, %v6792_v57  ;;  %v1419_v3 = vpop.f32.mrb[21].mxu1  ;;  %v6846_v9 = vpop.f32.mrb[20].mxu0  ;;  %v1503_v42 = vadd.f32 %v6799_v8, %v6786_v28  ;;  %v2900_v18 = vmax.f32 %v1501_v5, 0.0 }
 0x10c   :  { %v3023_v60 = vmax.f32 %v2897_v38, %v2899_v33  ;;  %v1420_v22 = vadd.f32 %v1419_v3, %v6792_v57  ;;  %v6851_v39 = vpop.f32.mrb[21].mxu0  ;;  %v1507_v14 = vadd.f32 %v6804_v63, %v6792_v57 }
 0x10d   :  { %v5375_v25 = vpack.c.bf16 %v3022_v21, %v3020_v4  ;;  %v2938_v44 = vmax.f32 %v1418_v36, 0.0  ;;  %v2901_v2 = vmax.f32 %v1503_v42, 0.0  ;;  %v1509_v21 = vadd.f32 %v6809_v16, %v6792_v57 }
 0x10e   :  { %v2939_v27 = vmax.f32 %v1420_v22, 0.0  ;;  %v1423_v51 = vpop.f32.mrb[22].mxu1  ;;  %v5373_v30 = vpack.c.bf16 %v3023_v60, %v3021_v11  ;;  %v2940_v22 = vmax.f32 %v1507_v14, 0.0  ;;  %v1675_v42 = vadd.f32 %v6831_v7, %v6775_v46 }
 0x10f   :  { %v3024_v45 = vmax.f32 %v2936_v24, %v2938_v44  ;;  %v1424_v48 = vadd.f32 %v1423_v51, %v6806_v17  ;;  %v1425_v13 = vpop.f32.mrb[23].mxu1  ;;  %v6856_v55 = vpop.f32.mrb[22].mxu0  ;;  %v2941_v16 = vmax.f32 %v1509_v21, 0.0 }
 0x110   :  { %v3025_v35 = vmax.f32 %v2937_v29, %v2939_v27  ;;  %v1426_v26 = vadd.f32 %v1425_v13, %v6806_v17  ;;  %5374 = vmatprep.subr.bf16.mxu0 %v5373_v30  ;;  %5390 = vmatprep.subr.bf16.mxu1 %v5373_v30  ;;  %v6861_v61 = vpop.f32.mrb[23].mxu0  ;;  %v2865_v7 = vmax.f32 %v1675_v42, 0.0 }
 0x111   :  { %v2978_v41 = vmax.f32 %v1424_v48, 0.0  ;;  %5376 = vmatpush1.bf16.msra.mxu0 %v5375_v25  ;;  %5392 = vmatpush1.bf16.msra.mxu1 %v5375_v25 }
 0x112   :  { %v2979_v53 = vmax.f32 %v1426_v26, 0.0  ;;  %v1583_v0 = vpop.f32.mrb[24].mxu1 }
 0x113   :  { %v3026_v10 = vmax.f32 %v2976_v15, %v2978_v41  ;;  %v1584_v31 = vadd.f32 %v1583_v0, %v6775_v46  ;;  %v1585_v52 = vpop.f32.mrb[25].mxu1  ;;  %v6866_v59 = vpop.f32.mrb[24].mxu0 }
 0x114   :  { %v3027_v1 = vmax.f32 %v2977_v40, %v2979_v53  ;;  %v1586_v4 = vadd.f32 %v1585_v52, %v6775_v46  ;;  %v6871_v47 = vpop.f32.mrb[25].mxu0  ;;  %v1515_v40 = vadd.f32 %v6821_v34, %v6806_v17  ;;  %v1673_v34 = vadd.f32 %v6826_v12, %v6775_v46 }
 0x115   :  { %v5379_v49 = vpack.c.bf16 %v3026_v10, %v3024_v45  ;;  %v2862_v38 = vmax.f32 %v1584_v31, 0.0  ;;  %v1513_v45 = vadd.f32 %v6816_v43, %v6806_v17 }
 0x116   :  { %v2863_v54 = vmax.f32 %v1586_v4, 0.0  ;;  %v1589_v11 = vpop.f32.mrb[26].mxu1  ;;  %v5377_v20 = vpack.c.bf16 %v3027_v1, %v3025_v35  ;;  %v2864_v14 = vmax.f32 %v1673_v34, 0.0  ;;  %v6949_v34 = vld [vmem:[%s7931_s3 + $0x8] sm:$0xff] }
 0x117   :  { %v3028_v33 = vmax.f32 %v2860_v6, %v2862_v38  ;;  %v1590_v23 = vadd.f32 %v1589_v11, %v6786_v28  ;;  %v6876_v24 = vpop.f32.mrb[26].mxu0  ;;  %v1591_v8 = vpop.f32.mrb[27].mxu1  ;;  %v2980_v43 = vmax.f32 %v1513_v45, 0.0  ;;  %v1687_v45 = vadd.f32 %v6851_v39, %v6792_v57 }
 0x118   :  { %v3029_v36 = vmax.f32 %v2861_v56, %v2863_v54  ;;  %v1592_v3 = vadd.f32 %v1591_v8, %v6786_v28  ;;  %v6881_v29 = vpop.f32.mrb[27].mxu0  ;;  %5378 = vmatprep.subr.bf16.mxu0 %v5377_v20  ;;  %5394 = vmatprep.subr.bf16.mxu1 %v5377_v20  ;;  %v2981_v56 = vmax.f32 %v1515_v40, 0.0  ;;  %v1691_v39 = vadd.f32 %v6856_v55, %v6806_v17 }
 0x119   :  { %v2902_v37 = vmax.f32 %v1590_v23, 0.0  ;;  %5380 = vmatpush1.bf16.msra.mxu0 %v5379_v49  ;;  %5396 = vmatpush1.bf16.msra.mxu1 %v5379_v49 }
 0x11a   :  { %v2903_v63 = vmax.f32 %v1592_v3, 0.0  ;;  %v1595_v60 = vpop.f32.mrb[28].mxu1 }
 0x11b   :  { %v3030_v25 = vmax.f32 %v2900_v18, %v2902_v37  ;;  %v1596_v44 = vadd.f32 %v1595_v60, %v6792_v57  ;;  %v6884_v27 = vpop.f32.mrb[28].mxu0  ;;  %v1597_v51 = vpop.f32.mrb[29].mxu1 }
 0x11c   :  { %v3031_v30 = vmax.f32 %v2901_v2, %v2903_v63  ;;  %v1598_v15 = vadd.f32 %v1597_v51, %v6792_v57  ;;  %v6887_v62 = vpop.f32.mrb[29].mxu0  ;;  %v1681_v2 = vadd.f32 %v6841_v32, %v6786_v28  ;;  %v1685_v32 = vadd.f32 %v6846_v9, %v6792_v57 }
 0x11d   :  { %v6891_v48 = vpack.c.bf16 %v3030_v25, %v3028_v33  ;;  %v2942_v13 = vmax.f32 %v1596_v44, 0.0  ;;  %v1679_v33 = vadd.f32 %v6836_v50, %v6786_v28 }
 0x11e   :  { %v2943_v58 = vmax.f32 %v1598_v15, 0.0  ;;  %v1601_v35 = vpop.f32.mrb[30].mxu1  ;;  %v5381_v26 = vpack.c.bf16 %v3031_v30, %v3029_v36  ;;  %v6928_v30 = vld [vmem:[%s7931_s3] sm:$0xff]  ;;  %v2905_v15 = vmax.f32 %v1681_v2, 0.0  ;;  %v1853_v2 = vadd.f32 %v6871_v47, %v6775_v46 }
 0x11f   :  { %v3032_v41 = vmax.f32 %v2940_v22, %v2942_v13  ;;  %v1602_v53 = vadd.f32 %v1601_v35, %v6806_v17  ;;  %v6896_v0 = vpop.f32.mrb[30].mxu0  ;;  %v1603_v6 = vpop.f32.mrb[31].mxu1  ;;  %v2904_v50 = vmax.f32 %v1679_v33, 0.0 }
 0x120   :  { %v3033_v5 = vmax.f32 %v2941_v16, %v2943_v58  ;;  %v1604_v10 = vadd.f32 %v1603_v6, %v6806_v17  ;;  %v6899_v31 = vpop.f32.mrb[31].mxu0  ;;  %5382 = vmatprep.subr.bf16.mxu0 %v5381_v26  ;;  %5398 = vmatprep.subr.bf16.mxu1 %v5381_v26 }
 0x121   :  { %v2982_v52 = vmax.f32 %v1602_v53, 0.0  ;;  %5384 = vmatpush1.bf16.msra.mxu0 %v6891_v48  ;;  %5400 = vmatpush1.bf16.msra.mxu1 %v6891_v48 }
 0x122   :  { %v2983_v1 = vmax.f32 %v1604_v10, 0.0  ;;  %v1761_v4 = vpop.f32.mrb[32].mxu1  ;;  %v2944_v10 = vmax.f32 %v1685_v32, 0.0 }
 0x123   :  { %v3034_v49 = vmax.f32 %v2980_v43, %v2982_v52  ;;  %v1762_v38 = vadd.f32 %v1761_v4, %v6775_v46  ;;  %v6908_v54 = vpop.f32.mrb[32].mxu0  ;;  %v1763_v11 = vpop.f32.mrb[33].mxu1  ;;  %v2945_v52 = vmax.f32 %v1687_v45, 0.0  ;;  %v1859_v45 = vadd.f32 %v6881_v29, %v6786_v28 }
 0x124   :  { %v3035_v20 = vmax.f32 %v2981_v56, %v2983_v1  ;;  %v1764_v12 = vadd.f32 %v1763_v11, %v6775_v46  ;;  %v6911_v18 = vpop.f32.mrb[33].mxu0  ;;  %v1693_v56 = vadd.f32 %v6861_v61, %v6806_v17  ;;  %v2984_v61 = vmax.f32 %v1691_v39, 0.0 }
 0x125   :  { %v5387_v23 = vpack.c.bf16 %v3034_v49, %v3032_v41  ;;  %v2866_v8 = vmax.f32 %v1762_v38, 0.0  ;;  %v1863_v29 = vadd.f32 %v6884_v27, %v6792_v57 }
 0x126   :  { %v2867_v21 = vmax.f32 %v1764_v12, 0.0  ;;  %v1767_v36 = vpop.f32.mrb[34].mxu1  ;;  %v5385_v3 = vpack.c.bf16 %v3035_v20, %v3033_v5 }
 0x127   :  { %v3036_v37 = vmax.f32 %v2864_v14, %v2866_v8  ;;  %v1768_v63 = vadd.f32 %v1767_v36, %v6786_v28  ;;  %v6918_v60 = vpop.f32.mrb[34].mxu0  ;;  %v1769_v22 = vpop.f32.mrb[35].mxu1  ;;  %v1851_v14 = vadd.f32 %v6866_v59, %v6775_v46  ;;  %v6967_v8 = vld [vmem:[%s7931_s3 + $0x10] sm:$0xff] }
 0x128   :  { %v3037_v25 = vmax.f32 %v2865_v7, %v2867_v21  ;;  %v1770_v44 = vadd.f32 %v1769_v22, %v6786_v28  ;;  %v6921_v51 = vpop.f32.mrb[35].mxu0  ;;  %5386 = vmatprep.subr.bf16.mxu0 %v5385_v3  ;;  %5402 = vmatprep.subr.bf16.mxu1 %v5385_v3  ;;  %v2985_v7 = vmax.f32 %v1693_v56, 0.0  ;;  %v7007_v56 = vld [vmem:[%s7931_s3 + $0x20] sm:$0xff] }
 0x129   :  { %v2906_v16 = vmax.f32 %v1768_v63, 0.0  ;;  %5388 = vmatpush1.bf16.msra.mxu0 %v5387_v23  ;;  %5404 = vmatpush1.bf16.msra.mxu1 %v5387_v23  ;;  %v2868_v47 = vmax.f32 %v1851_v14, 0.0 }
 0x12a   :  { %v2907_v13 = vmax.f32 %v1770_v44, 0.0  ;;  %v1773_v40 = vpop.f32.mrb[36].mxu1  ;;  %5414 = vmatprep.subr.bf16.mxu0 %v5381_v26  ;;  %v1857_v44 = vadd.f32 %v6876_v24, %v6786_v28 }
 0x12b   :  { %v3038_v58 = vmax.f32 %v2904_v50, %v2906_v16  ;;  %v1774_v35 = vadd.f32 %v1773_v40, %v6792_v57  ;;  %v6933_v9 = vpop.f32.mrb[36].mxu0  ;;  %v1775_v41 = vpop.f32.mrb[37].mxu1  ;;  %v6989_v16 = vld [vmem:[%s7931_s3 + $0x18] sm:$0xff] }
 0x12c   :  { %v3039_v53 = vmax.f32 %v2905_v15, %v2907_v13  ;;  %v1776_v6 = vadd.f32 %v1775_v41, %v6792_v57  ;;  %v6936_v5 = vpop.f32.mrb[37].mxu0  ;;  %5268 = vmatmul.mubr.msk.f32.vlgmr.msra.gmra.mrb[72].mxu0 %vm3148_vm8, %v6928_v30  ;;  %v2869_v15 = vmax.f32 %v1853_v2, 0.0 }
 0x12d   :  { %v6942_v43 = vpack.c.bf16 %v3038_v58, %v3036_v37  ;;  %v2946_v26 = vmax.f32 %v1774_v35, 0.0  ;;  %5416 = vmatpush1.bf16.msra.mxu0 %v6891_v48  ;;  %3243 = vmatprep.mubr.f32.mxu0 %v5745_v19 }
 0x12e   :  { %v2947_v42 = vmax.f32 %v1776_v6, 0.0  ;;  %v1779_v1 = vpop.f32.mrb[38].mxu1  ;;  %5418 = vmatprep.subr.bf16.mxu0 %v5385_v3  ;;  %v5405_v55 = vpack.c.bf16 %v3039_v53, %v3037_v25 }
 0x12f   :  { %v3040_v4 = vmax.f32 %v2944_v10, %v2946_v26  ;;  %v1780_v49 = vadd.f32 %v1779_v1, %v6806_v17  ;;  %v6954_v38 = vpop.f32.mrb[38].mxu0  ;;  %v1781_v48 = vpop.f32.mrb[39].mxu1  ;;  %v2908_v26 = vmax.f32 %v1857_v44, 0.0  ;;  %v1865_v1 = vadd.f32 %v6887_v62, %v6792_v57 }
 0x130   :  { %v3041_v11 = vmax.f32 %v2945_v52, %v2947_v42  ;;  %v1782_v20 = vadd.f32 %v1781_v48, %v6806_v17  ;;  %v6957_v12 = vpop.f32.mrb[39].mxu0  ;;  %5269 = vmatmul.mubr.msk.f32.gmra.mrb[74].mxu0 %vm3148_vm8, %v6949_v34  ;;  %5406 = vmatprep.subr.bf16.mxu1 %v5405_v55  ;;  %v2909_v42 = vmax.f32 %v1859_v45, 0.0  ;;  %v2948_v62 = vmax.f32 %v1863_v29, 0.0 }
 0x131   :  { %v2986_v33 = vmax.f32 %v1780_v49, 0.0  ;;  %5408 = vmatpush1.bf16.msra.mxu1 %v6942_v43  ;;  %5420 = vmatpush1.bf16.msra.mxu0 %v5387_v23  ;;  %v2029_v45 = vadd.f32 %v6908_v54, %v6775_v46 }
 0x132   :  { %v2987_v21 = vmax.f32 %v1782_v20, 0.0  ;;  %v1939_v36 = vpop.f32.mrb[40].mxu1  ;;  %5422 = vmatprep.subr.bf16.mxu0 %v5405_v55  ;;  %3249 = vmatprep.mubr.f32.mxu0 %v5745_v19 }
 0x133   :  { %v3042_v3 = vmax.f32 %v2984_v61, %v2986_v33  ;;  %v1940_v59 = vadd.f32 %v1939_v36, %v6775_v46  ;;  %v6973_v37 = vpop.f32.mrb[40].mxu0  ;;  %v1941_v23 = vpop.f32.mrb[41].mxu1  ;;  %v2949_v36 = vmax.f32 %v1865_v1, 0.0 }
 0x134   :  { %v3043_v63 = vmax.f32 %v2985_v7, %v2987_v21  ;;  %v1942_v22 = vadd.f32 %v1941_v23, %v6775_v46  ;;  %v6976_v25 = vpop.f32.mrb[41].mxu0  ;;  %5270 = vmatmul.mubr.msk.f32.gmra.mrb[76].mxu0 %vm3148_vm8, %v6967_v8  ;;  %v7032_v21 = vld [vmem:[%s7931_s3 + $0x28] sm:$0xff] }
 0x135   :  { %v6982_v50 = vpack.c.bf16 %v3042_v3, %v3040_v4  ;;  %v2870_v32 = vmax.f32 %v1940_v59, 0.0  ;;  %5424 = vmatpush1.bf16.msra.mxu0 %v6942_v43  ;;  %3255 = vmatprep.mubr.f32.mxu0 %v5745_v19  ;;  %v1871_v3 = vadd.f32 %v6899_v31, %v6806_v17 }
 0x136   :  { %v2871_v13 = vmax.f32 %v1942_v22, 0.0  ;;  %v1945_v40 = vpop.f32.mrb[42].mxu1  ;;  %v5409_v58 = vpack.c.bf16 %v3043_v63, %v3041_v11 }
 0x137   :  { %v3044_v24 = vmax.f32 %v2868_v47, %v2870_v32  ;;  %v1946_v35 = vadd.f32 %v1945_v40, %v6786_v28  ;;  %v6994_v41 = vpop.f32.mrb[42].mxu0  ;;  %v1947_v53 = vpop.f32.mrb[43].mxu1  ;;  %v7056_v40 = vld [vmem:[%s7931_s3 + $0x30] sm:$0xff] }
 0x138   :  { %v3045_v6 = vmax.f32 %v2869_v15, %v2871_v13  ;;  %v1948_v10 = vadd.f32 %v1947_v53, %v6786_v28  ;;  %v6997_v39 = vpop.f32.mrb[43].mxu0  ;;  %5271 = vmatmul.mubr.msk.f32.gmra.mrb[78].mxu0 %vm3148_vm8, %v6989_v16  ;;  %5410 = vmatprep.subr.bf16.mxu1 %v5409_v58 }
 0x139   :  { %v2910_v52 = vmax.f32 %v1946_v35, 0.0  ;;  %5426 = vmatprep.subr.bf16.mxu0 %v5409_v58  ;;  %5412 = vmatpush1.bf16.msra.mxu1 %v6982_v50 }
 0x13a   :  { %v2911_v4 = vmax.f32 %v1948_v10, 0.0  ;;  %5428 = vmatpush1.bf16.msra.mxu0 %v6982_v50  ;;  %v1951_v49 = vpop.f32.mrb[44].mxu1  ;;  %5438 = vmatprep.subr.bf16.mxu1 %v5405_v55  ;;  %v1869_v55 = vadd.f32 %v6896_v0, %v6806_v17 }
 0x13b   :  { %v3046_v48 = vmax.f32 %v2908_v26, %v2910_v52  ;;  %v1952_v27 = vadd.f32 %v1951_v49, %v6792_v57  ;;  %v7013_v11 = vpop.f32.mrb[44].mxu0  ;;  %v1953_v20 = vpop.f32.mrb[45].mxu1  ;;  %3261 = vmatprep.mubr.f32.mxu0 %v5745_v19  ;;  %v2872_v52 = vmax.f32 %v2029_v45, 0.0  ;;  %v7083_v49 = vld [vmem:[%s7931_s3 + $0x38] sm:$0xff] }
 0x13c   :  { %v3047_v61 = vmax.f32 %v2909_v42, %v2911_v4  ;;  %v1954_v14 = vadd.f32 %v1953_v20, %v6792_v57  ;;  %v7017_v33 = vpop.f32.mrb[45].mxu0  ;;  %5272 = vmatmul.mubr.msk.f32.gmra.mrb[80].mxu0 %vm3148_vm8, %v7007_v56  ;;  %5276 = vmatmul.mubr.msk.f32.vlgmr.msra.gmra.mrb[88].mxu1 %vm3148_vm8, %v6928_v30  ;;  %v2988_v31 = vmax.f32 %v1869_v55, 0.0  ;;  %v2035_v42 = vadd.f32 %v6918_v60, %v6786_v28 }
 0x13d   :  { %v7025_v7 = vpack.c.bf16 %v3046_v48, %v3044_v24  ;;  %v2950_v2 = vmax.f32 %v1952_v27, 0.0  ;;  %5440 = vmatpush1.bf16.msra.mxu1 %v6942_v43  ;;  %3267 = vmatprep.mubr.f32.mxu0 %v5745_v19  ;;  %v2031_v24 = vadd.f32 %v6911_v18, %v6775_v46  ;;  %v2037_v27 = vadd.f32 %v6921_v51, %v6786_v28 }
 0x13e   :  { %v2951_v59 = vmax.f32 %v1954_v14, 0.0  ;;  %v1957_v23 = vpop.f32.mrb[46].mxu1  ;;  %5442 = vmatprep.subr.bf16.mxu1 %v5409_v58  ;;  %3356 = vmatprep.mubr.f32.mxu1 %v5745_v19  ;;  %v7037_v0 = vpack.c.bf16 %v3047_v61, %v3045_v6  ;;  %v2989_v58 = vmax.f32 %v1871_v3, 0.0  ;;  %v2912_v51 = vmax.f32 %v2035_v42, 0.0 }
 0x13f   :  { %v3048_v63 = vmax.f32 %v2948_v62, %v2950_v2  ;;  %v1958_v43 = vadd.f32 %v1957_v23, %v6806_v17  ;;  %v7040_v22 = vpop.f32.mrb[46].mxu0  ;;  %v1959_v47 = vpop.f32.mrb[47].mxu1  ;;  %v2873_v48 = vmax.f32 %v2031_v24, 0.0  ;;  %v2041_v23 = vadd.f32 %v6933_v9, %v6792_v57 }
 0x140   :  { %v3049_v44 = vmax.f32 %v2949_v36, %v2951_v59  ;;  %v1960_v32 = vadd.f32 %v1959_v47, %v6806_v17  ;;  %v7043_v15 = vpop.f32.mrb[47].mxu0  ;;  %5273 = vmatmul.mubr.msk.f32.gmra.mrb[82].mxu0 %vm3148_vm8, %v7032_v21  ;;  %5277 = vmatmul.mubr.msk.f32.gmra.mrb[90].mxu1 %vm3148_vm8, %v6949_v34  ;;  %v2043_v47 = vadd.f32 %v6936_v5, %v6792_v57 }
 0x141   :  { %v2990_v13 = vmax.f32 %v1958_v43, 0.0  ;;  %5430 = vmatprep.subr.bf16.mxu0 %v7037_v0  ;;  %5444 = vmatpush1.bf16.msra.mxu1 %v6982_v50  ;;  %v2913_v43 = vmax.f32 %v2037_v27, 0.0 }
 0x142   :  { %v2991_v35 = vmax.f32 %v1960_v32, 0.0  ;;  %5432 = vmatpush1.bf16.msra.mxu0 %v7025_v7  ;;  %v2117_v53 = vpop.f32.mrb[48].mxu1  ;;  %5446 = vmatprep.subr.bf16.mxu1 %v7037_v0 }
 0x143   :  { %v3050_v54 = vmax.f32 %v2988_v31, %v2990_v13  ;;  %v2118_v6 = vadd.f32 %v2117_v53, %v6775_v46  ;;  %v7063_v10 = vpop.f32.mrb[48].mxu0  ;;  %v2119_v50 = vpop.f32.mrb[49].mxu1  ;;  %3273 = vmatprep.mubr.f32.mxu0 %v5745_v19  ;;  %3362 = vmatprep.mubr.f32.mxu1 %v5745_v19  ;;  %v2047_v53 = vadd.f32 %v6954_v38, %v6806_v17 }
 0x144   :  { %v3051_v26 = vmax.f32 %v2989_v58, %v2991_v35  ;;  %v2120_v29 = vadd.f32 %v2119_v50, %v6775_v46  ;;  %v7068_v18 = vpop.f32.mrb[49].mxu0  ;;  %5274 = vmatmul.mubr.msk.f32.gmra.mrb[84].mxu0 %vm3148_vm8, %v7056_v40  ;;  %5278 = vmatmul.mubr.msk.f32.gmra.mrb[92].mxu1 %vm3148_vm8, %v6967_v8  ;;  %v2952_v35 = vmax.f32 %v2041_v23, 0.0  ;;  %v2049_v50 = vadd.f32 %v6957_v12, %v6806_v17 }
 0x145   :  { %v7076_v1 = vpack.c.bf16 %v3050_v54, %v3048_v63  ;;  %v2874_v4 = vmax.f32 %v2118_v6, 0.0  ;;  %5448 = vmatpush1.bf16.msra.mxu1 %v7025_v7  ;;  %3279 = vmatprep.mubr.f32.mxu0 %v5745_v19  ;;  %v2953_v6 = vmax.f32 %v2043_v47, 0.0  ;;  %v2992_v12 = vmax.f32 %v2047_v53, 0.0 }
 0x146   :  { %v2875_v20 = vmax.f32 %v2120_v29, 0.0  ;;  %v2123_v61 = vpop.f32.mrb[50].mxu1  ;;  %3368 = vmatprep.mubr.f32.mxu1 %v5745_v19  ;;  %v5433_v60 = vpack.c.bf16 %v3051_v26, %v3049_v44  ;;  %v2213_v47 = vadd.f32 %v6994_v41, %v6786_v28 }
 0x147   :  { %v3052_v14 = vmax.f32 %v2872_v52, %v2874_v4  ;;  %v2124_v62 = vadd.f32 %v2123_v61, %v6786_v28  ;;  %v7089_v55 = vpop.f32.mrb[50].mxu0  ;;  %v2125_v2 = vpop.f32.mrb[51].mxu1 }
 0x148   :  { %v3053_v36 = vmax.f32 %v2873_v48, %v2875_v20  ;;  %v2126_v3 = vadd.f32 %v2125_v2, %v6786_v28  ;;  %v7092_v59 = vpop.f32.mrb[51].mxu0  ;;  %5275 = vmatmul.mubr.msk.f32.gmra.mrb[86].mxu0 %vm3148_vm8, %v7083_v49  ;;  %5279 = vmatmul.mubr.msk.f32.gmra.mrb[94].mxu1 %vm3148_vm8, %v6989_v16 }
 0x149   :  { %v2914_v63 = vmax.f32 %v2124_v62, 0.0  ;;  %5434 = vmatprep.subr.bf16.mxu0 %v5433_v60  ;;  %5450 = vmatprep.subr.bf16.mxu1 %v5433_v60  ;;  %v2209_v62 = vadd.f32 %v6976_v25, %v6775_v46 }
 0x14a   :  { %v2915_v44 = vmax.f32 %v2126_v3, 0.0  ;;  %5436 = vmatpush1.bf16.msra.mxu0 %v7076_v1  ;;  %5452 = vmatpush1.bf16.msra.mxu1 %v7076_v1  ;;  %v2129_v32 = vpop.f32.mrb[52].mxu1 }
 0x14b   :  { %v3054_v31 = vmax.f32 %v2912_v51, %v2914_v63  ;;  %v2130_v45 = vadd.f32 %v2129_v32, %v6792_v57  ;;  %v7105_v13 = vpop.f32.mrb[52].mxu0  ;;  %5462 = vmatprep.subr.bf16.mxu0 %v7037_v0  ;;  %v2131_v9 = vpop.f32.mrb[53].mxu1  ;;  %3374 = vmatprep.mubr.f32.mxu1 %v5745_v19 }
 0x14c   :  { %v3055_v58 = vmax.f32 %v2913_v43, %v2915_v44  ;;  %v2132_v24 = vadd.f32 %v2131_v9, %v6792_v57  ;;  %v7110_v5 = vpop.f32.mrb[53].mxu0  ;;  %3463 = vmatprep.mubr.f32.mxu0 %v5745_v19  ;;  %5280 = vmatmul.mubr.msk.f32.gmra.mrb[96].mxu1 %vm3148_vm8, %v7007_v56 }
 0x14d   :  { %v7117_v54 = vpack.c.bf16 %v3054_v31, %v3052_v14  ;;  %v2954_v0 = vmax.f32 %v2130_v45, 0.0  ;;  %5284 = vmatmul.mubr.msk.f32.vlgmr.msra.gmra.mrb[88].mxu0 %vm3148_vm8, %v6928_v30  ;;  %3380 = vmatprep.mubr.f32.mxu1 %v5745_v19  ;;  %v2877_v31 = vmax.f32 %v2209_v62, 0.0  ;;  %v2215_v45 = vadd.f32 %v6997_v39, %v6786_v28 }
 0x14e   :  { %v2955_v26 = vmax.f32 %v2132_v24, 0.0  ;;  %5464 = vmatpush1.bf16.msra.mxu0 %v7025_v7  ;;  %v2135_v29 = vpop.f32.mrb[54].mxu1  ;;  %3469 = vmatprep.mubr.f32.mxu0 %v5745_v19  ;;  %v7126_v52 = vpack.c.bf16 %v3055_v58, %v3053_v36  ;;  %v2207_v7 = vadd.f32 %v6973_v37, %v6775_v46  ;;  %v2916_v39 = vmax.f32 %v2213_v47, 0.0 }
 0x14f   :  { %v3056_v38 = vmax.f32 %v2952_v35, %v2954_v0  ;;  %v2136_v42 = vadd.f32 %v2135_v29, %v6806_v17  ;;  %v7129_v4 = vpop.f32.mrb[54].mxu0  ;;  %5466 = vmatprep.subr.bf16.mxu0 %v5433_v60  ;;  %v2137_v48 = vpop.f32.mrb[55].mxu1  ;;  %v2993_v60 = vmax.f32 %v2049_v50, 0.0  ;;  %v2219_v29 = vadd.f32 %v7013_v11, %v6792_v57 }
 0x150   :  { %v3057_v27 = vmax.f32 %v2953_v6, %v2955_v26  ;;  %v2138_v20 = vadd.f32 %v2137_v48, %v6806_v17  ;;  %v7132_v61 = vpop.f32.mrb[55].mxu0  ;;  %5281 = vmatmul.mubr.msk.f32.gmra.mrb[98].mxu1 %vm3148_vm8, %v7032_v21  ;;  %5454 = vmatprep.subr.bf16.mxu1 %v7126_v52  ;;  %v2221_v48 = vadd.f32 %v7017_v33, %v6792_v57 }
 0x151   :  { %v2994_v14 = vmax.f32 %v2136_v42, 0.0  ;;  %5285 = vmatmul.mubr.msk.f32.gmra.mrb[90].mxu0 %vm3148_vm8, %v6949_v34  ;;  %5456 = vmatpush1.bf16.msra.mxu1 %v7117_v54  ;;  %v2917_v42 = vmax.f32 %v2215_v45, 0.0 }
 0x152   :  { %v2995_v2 = vmax.f32 %v2138_v20, 0.0  ;;  %5468 = vmatpush1.bf16.msra.mxu0 %v7076_v1  ;;  %v2295_v36 = vpop.f32.mrb[56].mxu1  ;;  %3386 = vmatprep.mubr.f32.mxu1 %v5745_v19  ;;  %v2876_v1 = vmax.f32 %v2207_v7, 0.0 }
 0x153   :  { %v3058_v3 = vmax.f32 %v2992_v12, %v2994_v14  ;;  %v2296_v51 = vadd.f32 %v2295_v36, %v6775_v46  ;;  %v7147_v37 = vpop.f32.mrb[56].mxu0  ;;  %5470 = vmatprep.subr.bf16.mxu0 %v7126_v52  ;;  %v2297_v23 = vpop.f32.mrb[57].mxu1  ;;  %3475 = vmatprep.mubr.f32.mxu0 %v5745_v19  ;;  %v2225_v36 = vadd.f32 %v7040_v22, %v6806_v17 }
 0x154   :  { %v3059_v63 = vmax.f32 %v2993_v60, %v2995_v2  ;;  %v2298_v43 = vadd.f32 %v2297_v23, %v6775_v46  ;;  %v7152_v25 = vpop.f32.mrb[57].mxu0  ;;  %5282 = vmatmul.mubr.msk.f32.gmra.mrb[100].mxu1 %vm3148_vm8, %v7056_v40  ;;  %v2956_v2 = vmax.f32 %v2219_v29, 0.0  ;;  %v2227_v23 = vadd.f32 %v7043_v15, %v6806_v17 }
 0x155   :  { %v7158_v44 = vpack.c.bf16 %v3058_v3, %v3056_v38  ;;  %v2878_v32 = vmax.f32 %v2296_v51, 0.0  ;;  %5286 = vmatmul.mubr.msk.f32.gmra.mrb[92].mxu0 %vm3148_vm8, %v6967_v8  ;;  %3392 = vmatprep.mubr.f32.mxu1 %v5745_v19 }
 0x156   :  { %v2879_v9 = vmax.f32 %v2298_v43, 0.0  ;;  %5472 = vmatpush1.bf16.msra.mxu0 %v7117_v54  ;;  %v2301_v58 = vpop.f32.mrb[58].mxu1  ;;  %3481 = vmatprep.mubr.f32.mxu0 %v5745_v19  ;;  %v5457_v24 = vpack.c.bf16 %v3059_v63, %v3057_v27 }
 0x157   :  { %v3060_v41 = vmax.f32 %v2876_v1, %v2878_v32  ;;  %v2302_v35 = vadd.f32 %v2301_v58, %v6786_v28  ;;  %v7168_v53 = vpop.f32.mrb[58].mxu0  ;;  %v2303_v0 = vpop.f32.mrb[59].mxu1  ;;  %v2385_v58 = vadd.f32 %v7063_v10, %v6775_v46 }
 0x158   :  { %v3061_v6 = vmax.f32 %v2877_v31, %v2879_v9  ;;  %v2304_v50 = vadd.f32 %v2303_v0, %v6786_v28  ;;  %v7171_v26 = vpop.f32.mrb[59].mxu0  ;;  %5283 = vmatmul.mubr.msk.f32.gmra.mrb[102].mxu1 %vm3148_vm8, %v7083_v49  ;;  %5458 = vmatprep.subr.bf16.mxu1 %v5457_v24 }
 0x159   :  { %v2918_v38 = vmax.f32 %v2302_v35, 0.0  ;;  %5287 = vmatmul.mubr.msk.f32.gmra.mrb[94].mxu0 %vm3148_vm8, %v6989_v16  ;;  %5474 = vmatprep.subr.bf16.mxu0 %v5457_v24  ;;  %v2387_v35 = vadd.f32 %v7068_v18, %v6775_v46 }
 0x15a   :  { %v2919_v27 = vmax.f32 %v2304_v50, 0.0  ;;  %5460 = vmatpush1.bf16.msra.mxu1 %v7158_v44  ;;  %5476 = vmatpush1.bf16.msra.mxu0 %v7158_v44  ;;  %v2307_v20 = vpop.f32.mrb[60].mxu1 }
 0x15b   :  { %v3062_v12 = vmax.f32 %v2916_v39, %v2918_v38  ;;  %v2308_v7 = vadd.f32 %v2307_v20, %v6792_v57  ;;  %v7184_v14 = vpop.f32.mrb[60].mxu0  ;;  %5486 = vmatprep.subr.bf16.mxu1 %v7126_v52  ;;  %v2309_v11 = vpop.f32.mrb[61].mxu1  ;;  %3487 = vmatprep.mubr.f32.mxu0 %v5745_v19  ;;  %v2957_v52 = vmax.f32 %v2221_v48, 0.0  ;;  %v2880_v48 = vmax.f32 %v2385_v58, 0.0 }
 0x15c   :  { %v3063_v60 = vmax.f32 %v2917_v42, %v2919_v27  ;;  %v2310_v62 = vadd.f32 %v2309_v11, %v6792_v57  ;;  %v7189_v33 = vpop.f32.mrb[61].mxu0  ;;  %3576 = vmatprep.mubr.f32.mxu1 %v5745_v19 }
 0x15d   :  { %v7194_v3 = vpack.c.bf16 %v3062_v12, %v3060_v41  ;;  %v2958_v51 = vmax.f32 %v2308_v7, 0.0  ;;  %5288 = vmatmul.mubr.msk.f32.gmra.mrb[96].mxu0 %vm3148_vm8, %v7007_v56  ;;  %5292 = vmatmul.mubr.msk.f32.vlgmr.msra.gmra.mrb[104].mxu1 %vm3148_vm8, %v6928_v30  ;;  %v2881_v12 = vmax.f32 %v2387_v35, 0.0  ;;  %v2393_v7 = vadd.f32 %v7092_v59, %v6786_v28 }
 0x15e   :  { %v2959_v63 = vmax.f32 %v2310_v62, 0.0  ;;  %5488 = vmatpush1.bf16.msra.mxu1 %v7117_v54  ;;  %v2313_v43 = vpop.f32.mrb[62].mxu1  ;;  %3493 = vmatprep.mubr.f32.mxu0 %v5745_v19  ;;  %v7204_v22 = vpack.c.bf16 %v3063_v60, %v3061_v6  ;;  %v2996_v54 = vmax.f32 %v2225_v36, 0.0 }
 0x15f   :  { %v3064_v1 = vmax.f32 %v2956_v2, %v2958_v51  ;;  %v2314_v47 = vadd.f32 %v2313_v43, %v6806_v17  ;;  %v7207_v32 = vpop.f32.mrb[62].mxu0  ;;  %5490 = vmatprep.subr.bf16.mxu1 %v5457_v24  ;;  %v2315_v31 = vpop.f32.mrb[63].mxu1  ;;  %3582 = vmatprep.mubr.f32.mxu1 %v5745_v19  ;;  %v2997_v24 = vmax.f32 %v2227_v23, 0.0  ;;  %v2397_v43 = vadd.f32 %v7105_v13, %v6792_v57 }
 0x160   :  { %v3065_v45 = vmax.f32 %v2957_v52, %v2959_v63  ;;  %v2316_v15 = vadd.f32 %v2315_v31, %v6806_v17  ;;  %v7211_v9 = vpop.f32.mrb[63].mxu0  ;;  %5478 = vmatprep.subr.bf16.mxu0 %v7204_v22  ;;  %v2399_v31 = vadd.f32 %v7110_v5, %v6792_v57 }
 0x161   :  { %v2998_v41 = vmax.f32 %v2314_v47, 0.0  ;;  %5289 = vmatmul.mubr.msk.f32.gmra.mrb[98].mxu0 %vm3148_vm8, %v7032_v21  ;;  %5293 = vmatmul.mubr.msk.f32.gmra.mrb[106].mxu1 %vm3148_vm8, %v6949_v34  ;;  %v2921_v47 = vmax.f32 %v2393_v7, 0.0 }
 0x162   :  { %v2999_v0 = vmax.f32 %v2316_v15, 0.0  ;;  %5480 = vmatpush1.bf16.msra.mxu0 %v7194_v3  ;;  %5492 = vmatpush1.bf16.msra.mxu1 %v7158_v44  ;;  %v2473_v6 = vpop.f32.mrb[64].mxu1  ;;  %v2391_v44 = vadd.f32 %v7089_v55, %v6786_v28 }
 0x163   :  { %v3066_v50 = vmax.f32 %v2996_v54, %v2998_v41  ;;  %v2474_v10 = vadd.f32 %v2473_v6, %v6775_v46  ;;  %v7225_v39 = vpop.f32.mrb[64].mxu0  ;;  %5494 = vmatprep.subr.bf16.mxu1 %v7204_v22  ;;  %v2475_v29 = vpop.f32.mrb[65].mxu1  ;;  %3499 = vmatprep.mubr.f32.mxu0 %v5745_v19  ;;  %v2403_v6 = vadd.f32 %v7129_v4, %v6806_v17 }
 0x164   :  { %v3067_v38 = vmax.f32 %v2997_v24, %v2999_v0  ;;  %v2476_v42 = vadd.f32 %v2475_v29, %v6775_v46  ;;  %v7230_v18 = vpop.f32.mrb[65].mxu0  ;;  %3588 = vmatprep.mubr.f32.mxu1 %v5745_v19  ;;  %v2920_v59 = vmax.f32 %v2391_v44, 0.0  ;;  %v2960_v0 = vmax.f32 %v2397_v43, 0.0 }
 0x165   :  { %v7235_v27 = vpack.c.bf16 %v3066_v50, %v3064_v1  ;;  %v2882_v20 = vmax.f32 %v2474_v10, 0.0  ;;  %5290 = vmatmul.mubr.msk.f32.gmra.mrb[100].mxu0 %vm3148_vm8, %v7056_v40  ;;  %5294 = vmatmul.mubr.msk.f32.gmra.mrb[108].mxu1 %vm3148_vm8, %v6967_v8  ;;  %v2405_v29 = vadd.f32 %v7132_v61, %v6806_v17 }
 0x166   :  { %v2883_v11 = vmax.f32 %v2476_v42, 0.0  ;;  %5496 = vmatpush1.bf16.msra.mxu1 %v7194_v3  ;;  %v2479_v60 = vpop.f32.mrb[66].mxu1  ;;  %3505 = vmatprep.mubr.f32.mxu0 %v5745_v19  ;;  %v5481_v55 = vpack.c.bf16 %v3067_v38, %v3065_v45 }
 0x167   :  { %v3068_v62 = vmax.f32 %v2880_v48, %v2882_v20  ;;  %v2480_v2 = vadd.f32 %v2479_v60, %v6786_v28  ;;  %v7246_v36 = vpop.f32.mrb[66].mxu0  ;;  %v2481_v51 = vpop.f32.mrb[67].mxu1  ;;  %3594 = vmatprep.mubr.f32.mxu1 %v5745_v19  ;;  %v2563_v60 = vadd.f32 %v7147_v37, %v6775_v46 }
 0x168   :  { %v3069_v52 = vmax.f32 %v2881_v12, %v2883_v11  ;;  %v2482_v23 = vadd.f32 %v2481_v51, %v6786_v28  ;;  %v7250_v63 = vpop.f32.mrb[67].mxu0  ;;  %5482 = vmatprep.subr.bf16.mxu0 %v5481_v55  ;;  %5498 = vmatprep.subr.bf16.mxu1 %v5481_v55 }
 0x169   :  { %v2922_v1 = vmax.f32 %v2480_v2, 0.0  ;;  %5291 = vmatmul.mubr.msk.f32.gmra.mrb[102].mxu0 %vm3148_vm8, %v7083_v49  ;;  %5295 = vmatmul.mubr.msk.f32.gmra.mrb[110].mxu1 %vm3148_vm8, %v6989_v16  ;;  %v2565_v2 = vadd.f32 %v7152_v25, %v6775_v46  ;;  %v2884_v25 = vmax.f32 %v2563_v60, 0.0 }
 0x16a   :  { %v2923_v45 = vmax.f32 %v2482_v23, 0.0  ;;  %5484 = vmatpush1.bf16.msra.mxu0 %v7235_v27  ;;  %5500 = vmatpush1.bf16.msra.mxu1 %v7235_v27  ;;  %v2485_v15 = vpop.f32.mrb[68].mxu1 }
 0x16b   :  { %v3070_v54 = vmax.f32 %v2920_v59, %v2922_v1  ;;  %v2486_v13 = vadd.f32 %v2485_v15, %v6792_v57  ;;  %v7263_v58 = vpop.f32.mrb[68].mxu0  ;;  %5510 = vmatprep.subr.bf16.mxu0 %v7204_v22  ;;  %v2487_v41 = vpop.f32.mrb[69].mxu1  ;;  %3600 = vmatprep.mubr.f32.mxu1 %v5745_v19  ;;  %v2961_v22 = vmax.f32 %v2399_v31, 0.0  ;;  %v2571_v15 = vadd.f32 %v7171_v26, %v6786_v28 }
 0x16c   :  { %v3071_v24 = vmax.f32 %v2921_v47, %v2923_v45  ;;  %v2488_v35 = vadd.f32 %v2487_v41, %v6792_v57  ;;  %v7268_v5 = vpop.f32.mrb[69].mxu0  ;;  %3689 = vmatprep.mubr.f32.mxu0 %v5745_v19  ;;  %v2569_v47 = vadd.f32 %v7168_v53, %v6786_v28  ;;  %v2885_v45 = vmax.f32 %v2565_v2, 0.0 }
 0x16d   :  { %v7273_v50 = vpack.c.bf16 %v3070_v54, %v3068_v62  ;;  %v2962_v10 = vmax.f32 %v2486_v13, 0.0  ;;  %5296 = vmatmul.mubr.msk.f32.gmra.mrb[112].mxu1 %vm3148_vm8, %v7007_v56  ;;  %5300 = vmatmul.mubr.msk.f32.vlgmr.msra.gmra.mrb[104].mxu0 %vm3148_vm8, %v6928_v30  ;;  %v2575_v26 = vadd.f32 %v7184_v14, %v6792_v57 }
 0x16e   :  { %v2963_v38 = vmax.f32 %v2488_v35, 0.0  ;;  %5512 = vmatpush1.bf16.msra.mxu0 %v7194_v3  ;;  %v2491_v42 = vpop.f32.mrb[70].mxu1  ;;  %3606 = vmatprep.mubr.f32.mxu1 %v5745_v19  ;;  %v7283_v4 = vpack.c.bf16 %v3071_v24, %v3069_v52  ;;  %v3000_v3 = vmax.f32 %v2403_v6, 0.0 }
 0x16f   :  { %v3072_v48 = vmax.f32 %v2960_v0, %v2962_v10  ;;  %v2492_v44 = vadd.f32 %v2491_v42, %v6806_v17  ;;  %v7286_v20 = vpop.f32.mrb[70].mxu0  ;;  %5514 = vmatprep.subr.bf16.mxu0 %v5481_v55  ;;  %v2493_v12 = vpop.f32.mrb[71].mxu1  ;;  %3695 = vmatprep.mubr.f32.mxu0 %v5745_v19  ;;  %v3001_v55 = vmax.f32 %v2405_v29, 0.0  ;;  %v2924_v10 = vmax.f32 %v2569_v47, 0.0 }
 0x170   :  { %v3073_v7 = vmax.f32 %v2961_v22, %v2963_v38  ;;  %v2494_v61 = vadd.f32 %v2493_v12, %v6806_v17  ;;  %v7290_v11 = vpop.f32.mrb[71].mxu0  ;;  %5502 = vmatprep.subr.bf16.mxu1 %v7283_v4  ;;  %v2925_v29 = vmax.f32 %v2571_v15, 0.0  ;;  %v2577_v38 = vadd.f32 %v7189_v33, %v6792_v57 }
 0x171   :  { %v3002_v62 = vmax.f32 %v2492_v44, 0.0  ;;  %5297 = vmatmul.mubr.msk.f32.gmra.mrb[114].mxu1 %vm3148_vm8, %v7032_v21  ;;  %5301 = vmatmul.mubr.msk.f32.gmra.mrb[106].mxu0 %vm3148_vm8, %v6949_v34  ;;  %v2964_v33 = vmax.f32 %v2575_v26, 0.0 }
 0x172   :  { %v3003_v51 = vmax.f32 %v2494_v61, 0.0  ;;  %5504 = vmatpush1.bf16.msra.mxu1 %v7273_v50  ;;  %5516 = vmatpush1.bf16.msra.mxu0 %v7235_v27  ;;  %v2651_v52 = vpop.f32.mrb[72].mxu1 }
 0x173   :  { %v3074_v23 = vmax.f32 %v3000_v3, %v3002_v62  ;;  %v2652_v37 = vadd.f32 %v2651_v52, %v6775_v46  ;;  %5518 = vmatprep.subr.bf16.mxu0 %v7283_v4  ;;  %v2653_v59 = vpop.f32.mrb[73].mxu1  ;;  %3612 = vmatprep.mubr.f32.mxu1 %v5745_v19  ;;  %v2581_v3 = vadd.f32 %v7207_v32, %v6806_v17 }
 0x174   :  { %v3075_v43 = vmax.f32 %v3001_v55, %v3003_v51  ;;  %v2654_v1 = vadd.f32 %v2653_v59, %v6775_v46  ;;  %3701 = vmatprep.mubr.f32.mxu0 %v5745_v19  ;;  %v2583_v55 = vadd.f32 %v7211_v9, %v6806_v17  ;;  %v2741_v9 = vadd.f32 %v7225_v39, %v6775_v46 }
 0x175   :  { %v7310_v31 = vpack.c.bf16 %v3074_v23, %v3072_v48  ;;  %v2886_v27 = vmax.f32 %v2652_v37, 0.0  ;;  %5298 = vmatmul.mubr.msk.f32.gmra.mrb[116].mxu1 %vm3148_vm8, %v7056_v40  ;;  %5302 = vmatmul.mubr.msk.f32.gmra.mrb[108].mxu0 %vm3148_vm8, %v6967_v8 }
 0x176   :  { %v2887_v54 = vmax.f32 %v2654_v1, 0.0  ;;  %5520 = vmatpush1.bf16.msra.mxu0 %v7273_v50  ;;  %v2657_v13 = vpop.f32.mrb[74].mxu1  ;;  %3618 = vmatprep.mubr.f32.mxu1 %v5745_v19  ;;  %v5505_v53 = vpack.c.bf16 %v3075_v43, %v3073_v7  ;;  %v3004_v43 = vmax.f32 %v2581_v3, 0.0  ;;  %v3005_v1 = vmax.f32 %v2583_v55, 0.0 }
 0x177   :  { %v3076_v41 = vmax.f32 %v2884_v25, %v2886_v27  ;;  %v2658_v24 = vadd.f32 %v2657_v13, %v6786_v28  ;;  %v2659_v35 = vpop.f32.mrb[75].mxu1  ;;  %3707 = vmatprep.mubr.f32.mxu0 %v5745_v19  ;;  %v2743_v25 = vadd.f32 %v7230_v18, %v6775_v46  ;;  %v2747_v18 = vadd.f32 %v7246_v36, %v6786_v28 }
 0x178   :  { %v3077_v0 = vmax.f32 %v2885_v45, %v2887_v54  ;;  %v2660_v6 = vadd.f32 %v2659_v35, %v6786_v28  ;;  %5506 = vmatprep.subr.bf16.mxu1 %v5505_v53  ;;  %5522 = vmatprep.subr.bf16.mxu0 %v5505_v53 }
 0x179   :  { %v2926_v22 = vmax.f32 %v2658_v24, 0.0  ;;  %5299 = vmatmul.mubr.msk.f32.gmra.mrb[118].mxu1 %vm3148_vm8, %v7083_v49  ;;  %5303 = vmatmul.mubr.msk.f32.gmra.mrb[110].mxu0 %vm3148_vm8, %v6989_v16  ;;  %v2749_v24 = vadd.f32 %v7250_v63, %v6786_v28  ;;  %v2753_v63 = vadd.f32 %v7263_v58, %v6792_v57 }
 0x17a   :  { %v2927_v42 = vmax.f32 %v2660_v6, 0.0  ;;  %5508 = vmatpush1.bf16.msra.mxu1 %v7310_v31  ;;  %5524 = vmatpush1.bf16.msra.mxu0 %v7310_v31  ;;  %v2663_v48 = vpop.f32.mrb[76].mxu1 }
 0x17b   :  { %v3078_v44 = vmax.f32 %v2924_v10, %v2926_v22  ;;  %v2664_v14 = vadd.f32 %v2663_v48, %v6792_v57  ;;  %5534 = vmatprep.subr.bf16.mxu1 %v7283_v4  ;;  %v2665_v12 = vpop.f32.mrb[77].mxu1  ;;  %3713 = vmatprep.mubr.f32.mxu0 %v5745_v19  ;;  %v2965_v4 = vmax.f32 %v2577_v38, 0.0  ;;  %v2929_v38 = vmax.f32 %v2749_v24, 0.0 }
 0x17c   :  { %v3079_v7 = vmax.f32 %v2925_v29, %v2927_v42  ;;  %v2666_v61 = vadd.f32 %v2665_v12, %v6792_v57  ;;  %3802 = vmatprep.mubr.f32.mxu1 %v5745_v19  ;;  %v2755_v42 = vadd.f32 %v7268_v5, %v6792_v57 }
 0x17d   :  { %v5527_v60 = vpack.c.bf16 %v3078_v44, %v3076_v41  ;;  %v2966_v62 = vmax.f32 %v2664_v14, 0.0  ;;  %5304 = vmatmul.mubr.msk.f32.gmra.mrb[112].mxu0 %vm3148_vm8, %v7007_v56  ;;  %5308 = vmatmul.mubr.msk.f32.vlgmr.msra.gmra.mrb[120].mxu1 %vm3148_vm8, %v6928_v30 }
 0x17e   :  { %v2967_v2 = vmax.f32 %v2666_v61, 0.0  ;;  %5536 = vmatpush1.bf16.msra.mxu1 %v7273_v50  ;;  %v2669_v51 = vpop.f32.mrb[78].mxu1  ;;  %3719 = vmatprep.mubr.f32.mxu0 %v5745_v19  ;;  %v5525_v52 = vpack.c.bf16 %v3079_v7, %v3077_v0  ;;  %v2968_v61 = vmax.f32 %v2753_v63, 0.0 }
 0x17f   :  { %v3080_v32 = vmax.f32 %v2964_v33, %v2966_v62  ;;  %v2670_v23 = vadd.f32 %v2669_v51, %v6806_v17  ;;  %5538 = vmatprep.subr.bf16.mxu1 %v5505_v53  ;;  %v2671_v37 = vpop.f32.mrb[79].mxu1  ;;  %3808 = vmatprep.mubr.f32.mxu1 %v5745_v19  ;;  %v2759_v33 = vadd.f32 %v7286_v20, %v6806_v17  ;;  %v2969_v62 = vmax.f32 %v2755_v42, 0.0 }
 0x180   :  { %v3081_v59 = vmax.f32 %v2965_v4, %v2967_v2  ;;  %v2672_v30 = vadd.f32 %v2671_v37, %v6806_v17  ;;  %5526 = vmatprep.subr.bf16.mxu0 %v5525_v52  ;;  %v2761_v4 = vadd.f32 %v7290_v11, %v6806_v17  ;;  %v5717_v11 = vld [vmem:[%s7931_s3 + $0x8] sm:$0xff] }
 0x181   :  { %v3006_v50 = vmax.f32 %v2670_v23, 0.0  ;;  %5305 = vmatmul.mubr.msk.f32.gmra.mrb[114].mxu0 %vm3148_vm8, %v7032_v21  ;;  %5309 = vmatmul.mubr.msk.f32.gmra.mrb[122].mxu1 %vm3148_vm8, %v6949_v34  ;;  %v2888_v34 = vmax.f32 %v2741_v9, 0.0  ;;  %v3008_v37 = vmax.f32 %v2759_v33, 0.0 }
 0x182   :  { %v3007_v47 = vmax.f32 %v2672_v30, 0.0  ;;  %5528 = vmatpush1.bf16.msra.mxu0 %v5527_v60  ;;  %5540 = vmatpush1.bf16.msra.mxu1 %v7310_v31  ;;  %v2829_v27 = vpop.f32.mrb[80].mxu1  ;;  %v2889_v31 = vmax.f32 %v2743_v25, 0.0  ;;  %v3009_v30 = vmax.f32 %v2761_v4, 0.0 }
 0x183   :  { %v3082_v45 = vmax.f32 %v3004_v43, %v3006_v50  ;;  %v2830_v15 = vadd.f32 %v2829_v27, %v6775_v46  ;;  %5542 = vmatprep.subr.bf16.mxu1 %v5525_v52  ;;  %v2831_v39 = vpop.f32.mrb[81].mxu1  ;;  %3725 = vmatprep.mubr.f32.mxu0 %v5745_v19 }
 0x184   :  { %v3083_v54 = vmax.f32 %v3005_v1, %v3007_v47  ;;  %v2832_v13 = vadd.f32 %v2831_v39, %v6775_v46  ;;  %3814 = vmatprep.mubr.f32.mxu1 %v5745_v19  ;;  %v5718_v1 = vld [vmem:[%s7931_s3 + $0x10] sm:$0xff]  ;;  %v4270_v47 = vld [vmem:[%s7933_s5 + $0x8] sm:$0xff] }
 0x185   :  { %v5531_v53 = vpack.c.bf16 %v3082_v45, %v3080_v32  ;;  %v2890_v41 = vmax.f32 %v2830_v15, 0.0  ;;  %5306 = vmatmul.mubr.msk.f32.gmra.mrb[116].mxu0 %vm3148_vm8, %v7056_v40  ;;  %5310 = vmatmul.mubr.msk.f32.gmra.mrb[124].mxu1 %vm3148_vm8, %v6967_v8  ;;  %v2928_v8 = vmax.f32 %v2747_v18, 0.0 }
 0x186   :  { %v2891_v35 = vmax.f32 %v2832_v13, 0.0  ;;  %5544 = vmatpush1.bf16.msra.mxu1 %v5527_v60  ;;  %v2835_v46 = vpop.f32.mrb[82].mxu1  ;;  %3731 = vmatprep.mubr.f32.mxu0 %v5745_v19  ;;  %v5529_v0 = vpack.c.bf16 %v3083_v54, %v3081_v59  ;;  %v5716_v60 = vld [vmem:[%s7931_s3] sm:$0xff]  ;;  %v7462_v13 = vpop.permute.xlu0 %3110 }
 0x187   :  { %v3084_v6 = vmax.f32 %v2888_v34, %v2890_v41  ;;  %v2836_v36 = vadd.f32 %v2835_v46, %v6786_v28  ;;  %v2837_v10 = vpop.f32.mrb[83].mxu1  ;;  %3820 = vmatprep.mubr.f32.mxu1 %v5745_v19 }
 0x188   :  { %v3085_v26 = vmax.f32 %v2889_v31, %v2891_v35  ;;  %v2838_v22 = vadd.f32 %v2837_v10, %v6786_v28  ;;  %5530 = vmatprep.subr.bf16.mxu0 %v5529_v0  ;;  %5546 = vmatprep.subr.bf16.mxu1 %v5529_v0  ;;  %v7467_v35 = vpop.permute.xlu1 %3115 }
 0x189   :  { %v2930_v29 = vmax.f32 %v2836_v36, 0.0  ;;  %5307 = vmatmul.mubr.msk.f32.gmra.mrb[118].mxu0 %vm3148_vm8, %v7083_v49  ;;  %5311 = vmatmul.mubr.msk.f32.gmra.mrb[126].mxu1 %vm3148_vm8, %v6989_v16 }
 0x18a   :  { %v2931_v48 = vmax.f32 %v2838_v22, 0.0  ;;  %5532 = vmatpush1.bf16.msra.mxu0 %v5531_v53  ;;  %5548 = vmatpush1.bf16.msra.mxu1 %v5531_v53  ;;  %v2841_v28 = vpop.f32.mrb[84].mxu1 }
 0x18b   :  { %v3086_v44 = vmax.f32 %v2928_v8, %v2930_v29  ;;  %v2842_v14 = vadd.f32 %v2841_v28, %v6792_v57  ;;  %v2843_v12 = vpop.f32.mrb[85].mxu1  ;;  %3826 = vmatprep.mubr.f32.mxu1 %v5745_v19  ;;  %3915 = vmatprep.mubr.f32.mxu0 %v5745_v19  ;;  %v7473_v28 = vpop.permute.xlu0 %3120 }
 0x18c   :  { %v3087_v58 = vmax.f32 %v2929_v38, %v2931_v48  ;;  %v2844_v7 = vadd.f32 %v2843_v12, %v6792_v57 }
 0x18d   :  { %v5551_v5 = vpack.c.bf16 %v3086_v44, %v3084_v6  ;;  %v2970_v3 = vmax.f32 %v2842_v14, 0.0  ;;  %5312 = vmatmul.mubr.msk.f32.gmra.mrb[128].mxu1 %vm3148_vm8, %v7007_v56  ;;  %5316 = vmatmul.mubr.msk.f32.vlgmr.msra.gmra.mrb[120].mxu0 %vm3148_vm8, %v5716_v60 }
 0x18e   :  { %v2971_v57 = vmax.f32 %v2844_v7, 0.0  ;;  %v2847_v55 = vpop.f32.mrb[86].mxu1  ;;  %3832 = vmatprep.mubr.f32.mxu1 %v5745_v19  ;;  %3921 = vmatprep.mubr.f32.mxu0 %v5745_v19  ;;  %v5549_v20 = vpack.c.bf16 %v3087_v58, %v3085_v26 }
 0x18f   :  { %v3088_v2 = vmax.f32 %v2968_v61, %v2970_v3  ;;  %v2848_v51 = vadd.f32 %v2847_v55, %v6806_v17  ;;  %v2849_v52 = vpop.f32.mrb[87].mxu1 }
 0x190   :  { %v3089_v32 = vmax.f32 %v2969_v62, %v2971_v57  ;;  %v2850_v23 = vadd.f32 %v2849_v52, %v6806_v17  ;;  %5550 = vmatprep.subr.bf16.mxu1 %v5549_v20  ;;  %v7479_v20 = vpop.permute.xlu1 %3125 }
 0x191   :  { %v3010_v59 = vmax.f32 %v2848_v51, 0.0  ;;  %5313 = vmatmul.mubr.msk.f32.gmra.mrb[130].mxu1 %vm3148_vm8, %v7032_v21  ;;  %5317 = vmatmul.mubr.msk.f32.gmra.mrb[122].mxu0 %vm3148_vm8, %v5717_v11 }
 0x192   :  { %v3011_v43 = vmax.f32 %v2850_v23, 0.0  ;;  %5552 = vmatpush1.bf16.msra.mxu1 %v5551_v5  ;;  %3838 = vmatprep.mubr.f32.mxu1 %v5745_v19 }
 0x193   :  { %v3090_v9 = vmax.f32 %v3008_v37, %v3010_v59  ;;  %3927 = vmatprep.mubr.f32.mxu0 %v5745_v19 }
 0x194   :  { %v3091_v17 = vmax.f32 %v3009_v30, %v3011_v43 }
 0x195   :  { %v5555_v50 = vpack.c.bf16 %v3090_v9, %v3088_v2  ;;  %5314 = vmatmul.mubr.msk.f32.gmra.mrb[132].mxu1 %vm3148_vm8, %v7056_v40  ;;  %5318 = vmatmul.mubr.msk.f32.gmra.mrb[124].mxu0 %vm3148_vm8, %v5718_v1 }
 0x196   :  { %3844 = vmatprep.mubr.f32.mxu1 %v5745_v19  ;;  %3933 = vmatprep.mubr.f32.mxu0 %v5745_v19  ;;  %v5553_v25 = vpack.c.bf16 %v3091_v17, %v3089_v32 }
 0x198   :  { %5554 = vmatprep.subr.bf16.mxu1 %v5553_v25 }
 0x199   :  { %5315 = vmatmul.mubr.msk.f32.gmra.mrb[134].mxu1 %vm3148_vm8, %v7083_v49  ;;  %5319 = vmatmul.mubr.msk.f32.gmra.mrb[126].mxu0 %vm3148_vm8, %v6989_v16  ;;  %v5719_v16 = vld [vmem:[%s7931_s3 + $0x18] sm:$0xff]  ;;  %s5138_s3 = sshll.u32 %s5747_s4, 4  ;;  %s5139_s3 = int_to_ptr.vmem [resolvable:$true] %s5138_s3 }
 0x19a   :  { %5556 = vmatpush1.bf16.msra.mxu1 %v5555_v50  ;;  %3939 = vmatprep.mubr.f32.mxu0 %v5745_v19  ;;  %s5720_s19 = scalar_lea.vmem %s5139_s3, 256  ;;  %p5725_p1 = scmp.lt.s32.totalorder %s5139_s3, %s5139_s3 }
 0x19b   :  { %4028 = vmatprep.mubr.f32.mxu1 %v5745_v19  ;;  %p5721_p0 = scmp.ne.s32.totalorder %s5139_s3, %s5720_s19  ;;  %p5726_p2 = scmp.lt.s32.totalorder %s5720_s19, %s5720_s19 }
 0x19d   :  { %5320 = vmatmul.mubr.msk.f32.gmra.mrb[128].mxu0 %vm3148_vm8, %v7007_v56  ;;  %5324 = vmatmul.mubr.msk.f32.vlgmr.msra.gmra.mrb[136].mxu1 %vm3148_vm8, %v5716_v60  ;;  %p5727_p3 = por %p5726_p2, %p5725_p1 }
 0x19e   :  { %3945 = vmatprep.mubr.f32.mxu0 %v5745_v19  ;;  %4034 = vmatprep.mubr.f32.mxu1 %v5745_v19 }
 0x19f   :  { %p5728_p4 = pnand %p5727_p3, %p5721_p0 }
 0x1a1   :  { %5321 = vmatmul.mubr.msk.f32.gmra.mrb[130].mxu0 %vm3148_vm8, %v7032_v21  ;;  %5325 = vmatmul.mubr.msk.f32.gmra.mrb[138].mxu1 %vm3148_vm8, %v5717_v11 }
 0x1a2   :  { %3951 = vmatprep.mubr.f32.mxu0 %v5745_v19  ;;  %4040 = vmatprep.mubr.f32.mxu1 %v5745_v19 }
 0x1a5   :  { %5322 = vmatmul.mubr.msk.f32.gmra.mrb[132].mxu0 %vm3148_vm8, %v7056_v40  ;;  %5326 = vmatmul.mubr.msk.f32.gmra.mrb[140].mxu1 %vm3148_vm8, %v5718_v1 }
 0x1a6   :  { %3957 = vmatprep.mubr.f32.mxu0 %v5745_v19  ;;  %4046 = vmatprep.mubr.f32.mxu1 %v5745_v19 }
 0x1a9   :  { %5323 = vmatmul.mubr.msk.f32.gmra.mrb[134].mxu0 %vm3148_vm8, %v7083_v49  ;;  %5327 = vmatmul.mubr.msk.f32.gmra.mrb[142].mxu1 %vm3148_vm8, %v5719_v16 }
 0x1aa   :  { %4052 = vmatprep.mubr.f32.mxu1 %v5745_v19  ;;  %5332 = vmatprep.mubr.msk.f32.mxu0 %vm4397_vm9, %v4270_v47 }
 0x1ad   :  { %5328 = vmatmul.mubr.msk.f32.gmra.mrb[144].mxu1 %vm3148_vm8, %v7007_v56 }
 0x1ae   :  { %4058 = vmatprep.mubr.f32.mxu1 %v5745_v19 }
 0x1b1   :  { %5329 = vmatmul.mubr.msk.f32.gmra.mrb[146].mxu1 %vm3148_vm8, %v7032_v21 }
 0x1b2   :  { %4064 = vmatprep.mubr.f32.mxu1 %v5745_v19 }
 0x1b5   :  { %5330 = vmatmul.mubr.msk.f32.gmra.mrb[148].mxu1 %vm3148_vm8, %v7056_v40 }
 0x1b6   :  { %4070 = vmatprep.mubr.f32.mxu1 %v5745_v19 }
 0x1b9   :  { %5331 = vmatmul.mubr.msk.f32.gmra.mrb[150].mxu1 %vm3148_vm8, %v7083_v49 }
 0x1ba   :  { %5348 = vmatprep.mubr.msk.f32.mxu1 %vm4397_vm9, %v4270_v47  ;;  %v7485_v47 = vpop.permute.xlu0 %3130 }
 0x1ff   :  { %v3239_v56 = vpop.f32.mrb[72].mxu0 }
 0x200   :  { %v3241_v21 = vpop.f32.mrb[73].mxu0  ;;  %v3240_v49 = vadd.f32 %v3239_v56, %v7462_v13 }
 0x201   :  { %v3242_v34 = vadd.f32 %v3241_v21, %v7462_v13 }
 0x202   :  { %v4077_v0 = vmax.f32 %v3240_v49, 0.0 }
 0x203   :  { %v3245_v27 = vpop.f32.mrb[74].mxu0  ;;  %v4078_v10 = vmax.f32 %v3242_v34, 0.0 }
 0x204   :  { %v3247_v45 = vpop.f32.mrb[75].mxu0  ;;  %v3246_v6 = vadd.f32 %v3245_v27, %v7467_v35 }
 0x205   :  { %v3248_v26 = vadd.f32 %v3247_v45, %v7467_v35 }
 0x206   :  { %v4093_v12 = vmax.f32 %v3246_v6, 0.0 }
 0x207   :  { %v3251_v15 = vpop.f32.mrb[76].mxu0  ;;  %v4094_v61 = vmax.f32 %v3248_v26, 0.0 }
 0x208   :  { %v3253_v40 = vpop.f32.mrb[77].mxu0  ;;  %v3252_v58 = vadd.f32 %v3251_v15, %v7473_v28 }
 0x209   :  { %v3254_v33 = vadd.f32 %v3253_v40, %v7473_v28 }
 0x20a   :  { %v4109_v52 = vmax.f32 %v3252_v58, 0.0 }
 0x20b   :  { %v3257_v39 = vpop.f32.mrb[78].mxu0  ;;  %v4110_v59 = vmax.f32 %v3254_v33, 0.0 }
 0x20c   :  { %v3259_v54 = vpop.f32.mrb[79].mxu0  ;;  %v3258_v32 = vadd.f32 %v3257_v39, %v7479_v20 }
 0x20d   :  { %v3260_v11 = vadd.f32 %v3259_v54, %v7479_v20 }
 0x20e   :  { %v4125_v27 = vmax.f32 %v3258_v32, 0.0 }
 0x20f   :  { %v3263_v18 = vpop.f32.mrb[80].mxu0  ;;  %v3352_v53 = vpop.f32.mrb[88].mxu1  ;;  %v4126_v40 = vmax.f32 %v3260_v11, 0.0 }
 0x210   :  { %v3353_v41 = vadd.f32 %v3352_v53, %v7462_v13  ;;  %v3265_v31 = vpop.f32.mrb[81].mxu0  ;;  %v3354_v24 = vpop.f32.mrb[89].mxu1  ;;  %v3264_v45 = vadd.f32 %v3263_v18, %v7485_v47 }
 0x211   :  { %v3355_v46 = vadd.f32 %v3354_v24, %v7462_v13  ;;  %v3266_v39 = vadd.f32 %v3265_v31, %v7485_v47 }
 0x212   :  { %v4079_v36 = vmax.f32 %v3353_v41, 0.0 }
 0x213   :  { %v4080_v22 = vmax.f32 %v3355_v46, 0.0  ;;  %v3269_v8 = vpop.f32.mrb[82].mxu0  ;;  %v3358_v63 = vpop.f32.mrb[90].mxu1 }
 0x214   :  { %v4205_v29 = vmax.f32 %v4077_v0, %v4079_v36  ;;  %v3359_v38 = vadd.f32 %v3358_v63, %v7467_v35  ;;  %v3271_v42 = vpop.f32.mrb[83].mxu0  ;;  %v3360_v48 = vpop.f32.mrb[91].mxu1  ;;  %v4142_v63 = vmax.f32 %v3266_v39, 0.0 }
 0x215   :  { %v4206_v44 = vmax.f32 %v4078_v10, %v4080_v22  ;;  %v3361_v14 = vadd.f32 %v3360_v48, %v7467_v35  ;;  %v7491_v46 = vpop.permute.xlu1 %3135  ;;  %v4141_v10 = vmax.f32 %v3264_v45, 0.0 }
 0x216   :  { %v4095_v7 = vmax.f32 %v3359_v38, 0.0  ;;  %v3270_v18 = vadd.f32 %v3269_v8, %v7491_v46  ;;  %v3272_v31 = vadd.f32 %v3271_v42, %v7491_v46 }
 0x217   :  { %v4096_v5 = vmax.f32 %v3361_v14, 0.0  ;;  %v3275_v3 = vpop.f32.mrb[84].mxu0  ;;  %v3364_v60 = vpop.f32.mrb[92].mxu1 }
 0x218   :  { %v4207_v62 = vmax.f32 %v4093_v12, %v4095_v7  ;;  %v3365_v4 = vadd.f32 %v3364_v60, %v7473_v28  ;;  %v3277_v57 = vpop.f32.mrb[85].mxu0  ;;  %v3366_v55 = vpop.f32.mrb[93].mxu1  ;;  %v4157_v8 = vmax.f32 %v3270_v18, 0.0  ;;  %v4158_v42 = vmax.f32 %v3272_v31, 0.0 }
 0x219   :  { %v4208_v2 = vmax.f32 %v4094_v61, %v4096_v5  ;;  %v3367_v51 = vadd.f32 %v3366_v55, %v7473_v28  ;;  %v7497_v7 = vpop.permute.xlu0 %3140 }
 0x21a   :  { %v5559_v23 = vpack.c.bf16 %v4207_v62, %v4205_v29  ;;  %v4111_v37 = vmax.f32 %v3365_v4, 0.0  ;;  %v3276_v60 = vadd.f32 %v3275_v3, %v7497_v7  ;;  %v3278_v4 = vadd.f32 %v3277_v57, %v7497_v7 }
 0x21b   :  { %v4112_v30 = vmax.f32 %v3367_v51, 0.0  ;;  %v3281_v43 = vpop.f32.mrb[86].mxu0  ;;  %v3370_v9 = vpop.f32.mrb[94].mxu1  ;;  %v5557_v17 = vpack.c.bf16 %v4208_v2, %v4206_v44 }
 0x21c   :  { %v4209_v50 = vmax.f32 %v4109_v52, %v4111_v37  ;;  %v3371_v1 = vadd.f32 %v3370_v9, %v7479_v20  ;;  %v3283_v25 = vpop.f32.mrb[87].mxu0  ;;  %v3372_v16 = vpop.f32.mrb[95].mxu1  ;;  %v4173_v9 = vmax.f32 %v3276_v60, 0.0 }
 0x21d   :  { %v4210_v56 = vmax.f32 %v4110_v59, %v4112_v30  ;;  %v3373_v21 = vadd.f32 %v3372_v16, %v7479_v20  ;;  %5558 = vmatprep.subr.bf16.mxu0 %v5557_v17  ;;  %v7503_v37 = vpop.permute.xlu1 %3145 }
 0x21e   :  { %v4127_v15 = vmax.f32 %v3371_v1, 0.0  ;;  %5560 = vmatpush1.bf16.msra.mxu0 %v5559_v23  ;;  %v3282_v3 = vadd.f32 %v3281_v43, %v7503_v37  ;;  %v4174_v1 = vmax.f32 %v3278_v4, 0.0  ;;  %v3284_v57 = vadd.f32 %v3283_v25, %v7503_v37 }
 0x21f   :  { %v4128_v54 = vmax.f32 %v3373_v21, 0.0  ;;  %v3376_v49 = vpop.f32.mrb[96].mxu1 }
 0x220   :  { %v4211_v34 = vmax.f32 %v4125_v27, %v4127_v15  ;;  %v3377_v53 = vadd.f32 %v3376_v49, %v7485_v47  ;;  %v3465_v41 = vpop.f32.mrb[88].mxu0  ;;  %v3378_v24 = vpop.f32.mrb[97].mxu1 }
 0x221   :  { %v4212_v0 = vmax.f32 %v4126_v40, %v4128_v54  ;;  %v3379_v6 = vadd.f32 %v3378_v24, %v7485_v47  ;;  %v3467_v36 = vpop.f32.mrb[89].mxu0  ;;  %v3466_v24 = vadd.f32 %v3465_v41, %v7462_v13 }
 0x222   :  { %v5563_v26 = vpack.c.bf16 %v4211_v34, %v4209_v50  ;;  %v4143_v22 = vmax.f32 %v3377_v53, 0.0  ;;  %v4189_v34 = vmax.f32 %v3282_v3, 0.0  ;;  %v4190_v53 = vmax.f32 %v3284_v57, 0.0 }
 0x223   :  { %v4144_v29 = vmax.f32 %v3379_v6, 0.0  ;;  %v3382_v38 = vpop.f32.mrb[98].mxu1  ;;  %v5561_v48 = vpack.c.bf16 %v4212_v0, %v4210_v56  ;;  %v3468_v0 = vadd.f32 %v3467_v36, %v7462_v13 }
 0x224   :  { %v4213_v44 = vmax.f32 %v4141_v10, %v4143_v22  ;;  %v3383_v14 = vadd.f32 %v3382_v38, %v7491_v46  ;;  %v3471_v12 = vpop.f32.mrb[90].mxu0  ;;  %v3384_v58 = vpop.f32.mrb[99].mxu1 }
 0x225   :  { %v4214_v61 = vmax.f32 %v4142_v63, %v4144_v29  ;;  %v3385_v33 = vadd.f32 %v3384_v58, %v7491_v46  ;;  %v3473_v5 = vpop.f32.mrb[91].mxu0  ;;  %5562 = vmatprep.subr.bf16.mxu0 %v5561_v48  ;;  %v4081_v48 = vmax.f32 %v3466_v24, 0.0  ;;  %v4082_v41 = vmax.f32 %v3468_v0, 0.0 }
 0x226   :  { %v4159_v62 = vmax.f32 %v3383_v14, 0.0  ;;  %5564 = vmatpush1.bf16.msra.mxu0 %v5563_v26 }
 0x227   :  { %v4160_v55 = vmax.f32 %v3385_v33, 0.0  ;;  %v3388_v2 = vpop.f32.mrb[100].mxu1 }
 0x228   :  { %v4215_v51 = vmax.f32 %v4157_v8, %v4159_v62  ;;  %v3389_v52 = vadd.f32 %v3388_v2, %v7497_v7  ;;  %v3477_v32 = vpop.f32.mrb[92].mxu0  ;;  %v3390_v23 = vpop.f32.mrb[101].mxu1 }
 0x229   :  { %v4216_v59 = vmax.f32 %v4158_v42, %v4160_v55  ;;  %v3391_v11 = vadd.f32 %v3390_v23, %v7497_v7  ;;  %v3479_v30 = vpop.f32.mrb[93].mxu0 }
 0x22a   :  { %v5567_v17 = vpack.c.bf16 %v4215_v51, %v4213_v44  ;;  %v4175_v50 = vmax.f32 %v3389_v52, 0.0  ;;  %v3472_v44 = vadd.f32 %v3471_v12, %v7467_v35  ;;  %v3478_v12 = vadd.f32 %v3477_v32, %v7473_v28 }
 0x22b   :  { %v4176_v16 = vmax.f32 %v3391_v11, 0.0  ;;  %v3394_v56 = vpop.f32.mrb[102].mxu1  ;;  %v5565_v21 = vpack.c.bf16 %v4216_v59, %v4214_v61  ;;  %v3474_v61 = vadd.f32 %v3473_v5, %v7467_v35  ;;  %v3480_v5 = vadd.f32 %v3479_v30, %v7473_v28 }
 0x22c   :  { %v4217_v27 = vmax.f32 %v4173_v9, %v4175_v50  ;;  %v3395_v45 = vadd.f32 %v3394_v56, %v7503_v37  ;;  %v3483_v15 = vpop.f32.mrb[94].mxu0  ;;  %v3396_v40 = vpop.f32.mrb[103].mxu1  ;;  %v4097_v51 = vmax.f32 %v3472_v44, 0.0  ;;  %v4113_v56 = vmax.f32 %v3478_v12, 0.0 }
 0x22d   :  { %v4218_v39 = vmax.f32 %v4174_v1, %v4176_v16  ;;  %v3397_v54 = vadd.f32 %v3396_v40, %v7503_v37  ;;  %v3485_v49 = vpop.f32.mrb[95].mxu0  ;;  %5566 = vmatprep.subr.bf16.mxu0 %v5565_v21  ;;  %v4098_v23 = vmax.f32 %v3474_v61, 0.0  ;;  %v3484_v21 = vadd.f32 %v3483_v15, %v7479_v20 }
 0x22e   :  { %v4191_v43 = vmax.f32 %v3395_v45, 0.0  ;;  %5568 = vmatpush1.bf16.msra.mxu0 %v5567_v17  ;;  %v4114_v45 = vmax.f32 %v3480_v5, 0.0  ;;  %v3486_v40 = vadd.f32 %v3485_v49, %v7479_v20 }
 0x22f   :  { %v4192_v25 = vmax.f32 %v3397_v54, 0.0  ;;  %v4129_v15 = vmax.f32 %v3484_v21, 0.0 }
 0x230   :  { %v4219_v6 = vmax.f32 %v4189_v34, %v4191_v43  ;;  %v3489_v10 = vpop.f32.mrb[96].mxu0  ;;  %v3578_v18 = vpop.f32.mrb[104].mxu1  ;;  %v4130_v49 = vmax.f32 %v3486_v40, 0.0 }
 0x231   :  { %v4220_v26 = vmax.f32 %v4190_v53, %v4192_v25  ;;  %v3579_v22 = vadd.f32 %v3578_v18, %v7462_v13  ;;  %v3491_v63 = vpop.f32.mrb[97].mxu0  ;;  %v3580_v31 = vpop.f32.mrb[105].mxu1  ;;  %v3490_v18 = vadd.f32 %v3489_v10, %v7485_v47 }
 0x232   :  { %v5571_v29 = vpack.c.bf16 %v4219_v6, %v4217_v27  ;;  %v3581_v38 = vadd.f32 %v3580_v31, %v7462_v13 }
 0x233   :  { %v4083_v14 = vmax.f32 %v3579_v22, 0.0  ;;  %v5569_v58 = vpack.c.bf16 %v4220_v26, %v4218_v39  ;;  %v3492_v22 = vadd.f32 %v3491_v63, %v7485_v47 }
 0x234   :  { %v4084_v36 = vmax.f32 %v3581_v38, 0.0  ;;  %v3495_v33 = vpop.f32.mrb[98].mxu0  ;;  %v3584_v8 = vpop.f32.mrb[106].mxu1 }
 0x235   :  { %v4221_v60 = vmax.f32 %v4081_v48, %v4083_v14  ;;  %v3585_v62 = vadd.f32 %v3584_v8, %v7467_v35  ;;  %v3497_v42 = vpop.f32.mrb[99].mxu0  ;;  %v3586_v4 = vpop.f32.mrb[107].mxu1  ;;  %5570 = vmatprep.subr.bf16.mxu0 %v5569_v58  ;;  %v3496_v10 = vadd.f32 %v3495_v33, %v7491_v46 }
 0x236   :  { %v4222_v55 = vmax.f32 %v4082_v41, %v4084_v36  ;;  %v3587_v2 = vadd.f32 %v3586_v4, %v7467_v35  ;;  %5572 = vmatpush1.bf16.msra.mxu0 %v5571_v29  ;;  %v4145_v36 = vmax.f32 %v3490_v18, 0.0  ;;  %v3498_v4 = vadd.f32 %v3497_v42, %v7491_v46 }
 0x237   :  { %v4099_v52 = vmax.f32 %v3585_v62, 0.0  ;;  %v4146_v62 = vmax.f32 %v3492_v22, 0.0  ;;  %v4161_v33 = vmax.f32 %v3496_v10, 0.0 }
 0x238   :  { %v4100_v59 = vmax.f32 %v3587_v2, 0.0  ;;  %v3501_v11 = vpop.f32.mrb[100].mxu0  ;;  %v3590_v9 = vpop.f32.mrb[108].mxu1  ;;  %v4162_v42 = vmax.f32 %v3498_v4, 0.0 }
 0x239   :  { %v4223_v3 = vmax.f32 %v4097_v51, %v4099_v52  ;;  %v3591_v17 = vadd.f32 %v3590_v9, %v7473_v28  ;;  %v3503_v50 = vpop.f32.mrb[101].mxu0  ;;  %v3592_v1 = vpop.f32.mrb[109].mxu1 }
 0x23a   :  { %v4224_v57 = vmax.f32 %v4098_v23, %v4100_v59  ;;  %v3593_v16 = vadd.f32 %v3592_v1, %v7473_v28  ;;  %v3504_v1 = vadd.f32 %v3503_v50, %v7497_v7 }
 0x23b   :  { %v5575_v27 = vpack.c.bf16 %v4223_v3, %v4221_v60  ;;  %v4115_v32 = vmax.f32 %v3591_v17, 0.0  ;;  %v3502_v3 = vadd.f32 %v3501_v11, %v7497_v7 }
 0x23c   :  { %v4116_v30 = vmax.f32 %v3593_v16, 0.0  ;;  %v3507_v39 = vpop.f32.mrb[102].mxu0  ;;  %v3596_v54 = vpop.f32.mrb[110].mxu1  ;;  %v5573_v34 = vpack.c.bf16 %v4224_v57, %v4222_v55 }
 0x23d   :  { %v4225_v43 = vmax.f32 %v4113_v56, %v4115_v32  ;;  %v3597_v53 = vadd.f32 %v3596_v54, %v7479_v20  ;;  %v3509_v24 = vpop.f32.mrb[103].mxu0  ;;  %v3598_v25 = vpop.f32.mrb[111].mxu1  ;;  %v4177_v54 = vmax.f32 %v3502_v3, 0.0  ;;  %v3508_v11 = vadd.f32 %v3507_v39, %v7503_v37 }
 0x23e   :  { %v4226_v0 = vmax.f32 %v4114_v45, %v4116_v30  ;;  %v3599_v6 = vadd.f32 %v3598_v25, %v7479_v20  ;;  %5574 = vmatprep.subr.bf16.mxu0 %v5573_v34  ;;  %5606 = vmatprep.subr.bf16.mxu1 %v5573_v34  ;;  %v3510_v25 = vadd.f32 %v3509_v24, %v7503_v37 }
 0x23f   :  { %v4131_v26 = vmax.f32 %v3597_v53, 0.0  ;;  %5576 = vmatpush1.bf16.msra.mxu0 %v5575_v27  ;;  %5608 = vmatpush1.bf16.msra.mxu1 %v5575_v27  ;;  %v4178_v53 = vmax.f32 %v3504_v1, 0.0  ;;  %v4193_v39 = vmax.f32 %v3508_v11, 0.0 }
 0x240   :  { %v4132_v31 = vmax.f32 %v3599_v6, 0.0  ;;  %v3602_v29 = vpop.f32.mrb[112].mxu1  ;;  %v3691_v38 = vpop.f32.mrb[104].mxu0  ;;  %v4194_v24 = vmax.f32 %v3510_v25, 0.0 }
 0x241   :  { %v4227_v48 = vmax.f32 %v4129_v15, %v4131_v26  ;;  %v3603_v44 = vadd.f32 %v3602_v29, %v7485_v47  ;;  %v3604_v14 = vpop.f32.mrb[113].mxu1  ;;  %v3693_v58 = vpop.f32.mrb[105].mxu0 }
 0x242   :  { %v4228_v41 = vmax.f32 %v4130_v49, %v4132_v31  ;;  %v3605_v61 = vadd.f32 %v3604_v14, %v7485_v47  ;;  %v3694_v14 = vadd.f32 %v3693_v58, %v7462_v13 }
 0x243   :  { %v5579_v8 = vpack.c.bf16 %v4227_v48, %v4225_v43  ;;  %v4147_v60 = vmax.f32 %v3603_v44, 0.0  ;;  %v3692_v48 = vadd.f32 %v3691_v38, %v7462_v13 }
 0x244   :  { %v4148_v63 = vmax.f32 %v3605_v61, 0.0  ;;  %v3608_v55 = vpop.f32.mrb[114].mxu1  ;;  %v3697_v2 = vpop.f32.mrb[106].mxu0  ;;  %v5577_v51 = vpack.c.bf16 %v4228_v41, %v4226_v0 }
 0x245   :  { %v4229_v12 = vmax.f32 %v4145_v36, %v4147_v60  ;;  %v3609_v52 = vadd.f32 %v3608_v55, %v7491_v46  ;;  %v3610_v23 = vpop.f32.mrb[115].mxu1  ;;  %v3699_v5 = vpop.f32.mrb[107].mxu0  ;;  %v4085_v55 = vmax.f32 %v3692_v48, 0.0  ;;  %v3698_v38 = vadd.f32 %v3697_v2, %v7467_v35 }
 0x246   :  { %v4230_v59 = vmax.f32 %v4146_v62, %v4148_v63  ;;  %v3611_v9 = vadd.f32 %v3610_v23, %v7491_v46  ;;  %5578 = vmatprep.subr.bf16.mxu0 %v5577_v51  ;;  %5610 = vmatprep.subr.bf16.mxu1 %v5577_v51  ;;  %v3700_v23 = vadd.f32 %v3699_v5, %v7467_v35 }
 0x247   :  { %v4163_v17 = vmax.f32 %v3609_v52, 0.0  ;;  %5580 = vmatpush1.bf16.msra.mxu0 %v5579_v8  ;;  %5612 = vmatpush1.bf16.msra.mxu1 %v5579_v8  ;;  %v4086_v52 = vmax.f32 %v3694_v14, 0.0  ;;  %v4101_v2 = vmax.f32 %v3698_v38, 0.0 }
 0x248   :  { %v4164_v57 = vmax.f32 %v3611_v9, 0.0  ;;  %v3614_v16 = vpop.f32.mrb[116].mxu1  ;;  %v3703_v56 = vpop.f32.mrb[108].mxu0  ;;  %v4102_v5 = vmax.f32 %v3700_v23, 0.0 }
 0x249   :  { %v4231_v21 = vmax.f32 %v4161_v33, %v4163_v17  ;;  %v3615_v27 = vadd.f32 %v3614_v16, %v7497_v7  ;;  %v3616_v32 = vpop.f32.mrb[117].mxu1  ;;  %v3705_v45 = vpop.f32.mrb[109].mxu0 }
 0x24a   :  { %v4232_v40 = vmax.f32 %v4162_v42, %v4164_v57  ;;  %v3617_v30 = vadd.f32 %v3616_v32, %v7497_v7  ;;  %v3706_v32 = vadd.f32 %v3705_v45, %v7473_v28 }
 0x24b   :  { %v5583_v34 = vpack.c.bf16 %v4231_v21, %v4229_v12  ;;  %v4179_v43 = vmax.f32 %v3615_v27, 0.0  ;;  %v3704_v21 = vadd.f32 %v3703_v56, %v7473_v28 }
 0x24c   :  { %v4180_v50 = vmax.f32 %v3617_v30, 0.0  ;;  %v3620_v0 = vpop.f32.mrb[118].mxu1  ;;  %v3709_v6 = vpop.f32.mrb[110].mxu0  ;;  %v5581_v15 = vpack.c.bf16 %v4232_v40, %v4230_v59 }
 0x24d   :  { %v4233_v18 = vmax.f32 %v4177_v54, %v4179_v43  ;;  %v3621_v26 = vadd.f32 %v3620_v0, %v7503_v37  ;;  %v3622_v49 = vpop.f32.mrb[119].mxu1  ;;  %v3711_v22 = vpop.f32.mrb[111].mxu0  ;;  %v4117_v0 = vmax.f32 %v3704_v21, 0.0  ;;  %v3710_v56 = vadd.f32 %v3709_v6, %v7479_v20 }
 0x24e   :  { %v4234_v31 = vmax.f32 %v4178_v53, %v4180_v50  ;;  %v3623_v29 = vadd.f32 %v3622_v49, %v7503_v37  ;;  %5582 = vmatprep.subr.bf16.mxu0 %v5581_v15  ;;  %5614 = vmatprep.subr.bf16.mxu1 %v5581_v15  ;;  %v3712_v49 = vadd.f32 %v3711_v22, %v7479_v20 }
 0x24f   :  { %v4195_v44 = vmax.f32 %v3621_v26, 0.0  ;;  %5584 = vmatpush1.bf16.msra.mxu0 %v5583_v34  ;;  %5616 = vmatpush1.bf16.msra.mxu1 %v5583_v34  ;;  %v4118_v26 = vmax.f32 %v3706_v32, 0.0  ;;  %v4133_v6 = vmax.f32 %v3710_v56, 0.0 }
 0x250   :  { %v4196_v41 = vmax.f32 %v3623_v29, 0.0  ;;  %v3715_v61 = vpop.f32.mrb[112].mxu0  ;;  %v3804_v36 = vpop.f32.mrb[120].mxu1  ;;  %v4134_v22 = vmax.f32 %v3712_v49, 0.0 }
 0x251   :  { %v4235_v10 = vmax.f32 %v4193_v39, %v4195_v44  ;;  %v3805_v8 = vadd.f32 %v3804_v36, %v7462_v13  ;;  %v3717_v60 = vpop.f32.mrb[113].mxu0  ;;  %v3806_v62 = vpop.f32.mrb[121].mxu1 }
 0x252   :  { %v4236_v4 = vmax.f32 %v4194_v24, %v4196_v41  ;;  %v3807_v63 = vadd.f32 %v3806_v62, %v7462_v13  ;;  %v3718_v62 = vadd.f32 %v3717_v60, %v7485_v47 }
 0x253   :  { %v5587_v51 = vpack.c.bf16 %v4235_v10, %v4233_v18  ;;  %v4087_v12 = vmax.f32 %v3805_v8, 0.0  ;;  %v3716_v10 = vadd.f32 %v3715_v61, %v7485_v47 }
 0x254   :  { %v4088_v58 = vmax.f32 %v3807_v63, 0.0  ;;  %v3721_v59 = vpop.f32.mrb[114].mxu0  ;;  %v3810_v9 = vpop.f32.mrb[122].mxu1  ;;  %v5585_v33 = vpack.c.bf16 %v4236_v4, %v4234_v31 }
 0x255   :  { %v4237_v3 = vmax.f32 %v4085_v55, %v4087_v12  ;;  %v3811_v17 = vadd.f32 %v3810_v9, %v7467_v35  ;;  %v3723_v42 = vpop.f32.mrb[115].mxu0  ;;  %v3812_v1 = vpop.f32.mrb[123].mxu1  ;;  %v4149_v9 = vmax.f32 %v3716_v10, 0.0  ;;  %v3722_v61 = vadd.f32 %v3721_v59, %v7491_v46 }
 0x256   :  { %v4238_v57 = vmax.f32 %v4086_v52, %v4088_v58  ;;  %v3813_v16 = vadd.f32 %v3812_v1, %v7467_v35  ;;  %5586 = vmatprep.subr.bf16.mxu0 %v5585_v33  ;;  %5618 = vmatprep.subr.bf16.mxu1 %v5585_v33  ;;  %v3724_v1 = vadd.f32 %v3723_v42, %v7491_v46 }
 0x257   :  { %v4103_v27 = vmax.f32 %v3811_v17, 0.0  ;;  %5588 = vmatpush1.bf16.msra.mxu0 %v5587_v51  ;;  %5620 = vmatpush1.bf16.msra.mxu1 %v5587_v51  ;;  %v4150_v17 = vmax.f32 %v3718_v62, 0.0  ;;  %v4165_v59 = vmax.f32 %v3722_v61, 0.0 }
 0x258   :  { %v4104_v40 = vmax.f32 %v3813_v16, 0.0  ;;  %v3727_v30 = vpop.f32.mrb[116].mxu0  ;;  %v3816_v54 = vpop.f32.mrb[124].mxu1  ;;  %v4166_v42 = vmax.f32 %v3724_v1, 0.0 }
 0x259   :  { %v4239_v11 = vmax.f32 %v4101_v2, %v4103_v27  ;;  %v3817_v34 = vadd.f32 %v3816_v54, %v7473_v28  ;;  %v3729_v43 = vpop.f32.mrb[117].mxu0  ;;  %v3818_v53 = vpop.f32.mrb[125].mxu1 }
 0x25a   :  { %v4240_v25 = vmax.f32 %v4102_v5, %v4104_v40  ;;  %v3819_v50 = vadd.f32 %v3818_v53, %v7473_v28  ;;  %v3730_v53 = vadd.f32 %v3729_v43, %v7497_v7 }
 0x25b   :  { %v5591_v15 = vpack.c.bf16 %v4239_v11, %v4237_v3  ;;  %v4119_v18 = vmax.f32 %v3817_v34, 0.0  ;;  %v3728_v11 = vadd.f32 %v3727_v30, %v7497_v7 }
 0x25c   :  { %v4120_v45 = vmax.f32 %v3819_v50, 0.0  ;;  %v3733_v31 = vpop.f32.mrb[118].mxu0  ;;  %v3822_v29 = vpop.f32.mrb[126].mxu1  ;;  %v5589_v39 = vpack.c.bf16 %v4240_v25, %v4238_v57 }
 0x25d   :  { %v4241_v48 = vmax.f32 %v4117_v0, %v4119_v18  ;;  %v3823_v44 = vadd.f32 %v3822_v29, %v7479_v20  ;;  %v3735_v24 = vpop.f32.mrb[119].mxu0  ;;  %v3824_v14 = vpop.f32.mrb[127].mxu1  ;;  %v4181_v29 = vmax.f32 %v3728_v11, 0.0  ;;  %v3734_v30 = vadd.f32 %v3733_v31, %v7503_v37 }
 0x25e   :  { %v4242_v41 = vmax.f32 %v4118_v26, %v4120_v45  ;;  %v3825_v36 = vadd.f32 %v3824_v14, %v7479_v20  ;;  %5590 = vmatprep.subr.bf16.mxu0 %v5589_v39  ;;  %5622 = vmatprep.subr.bf16.mxu1 %v5589_v39  ;;  %v3736_v14 = vadd.f32 %v3735_v24, %v7503_v37 }
 0x25f   :  { %v4135_v8 = vmax.f32 %v3823_v44, 0.0  ;;  %5592 = vmatpush1.bf16.msra.mxu0 %v5591_v15  ;;  %5624 = vmatpush1.bf16.msra.mxu1 %v5591_v15  ;;  %v4182_v44 = vmax.f32 %v3730_v53, 0.0  ;;  %v4197_v31 = vmax.f32 %v3734_v30, 0.0 }
 0x260   :  { %v4136_v4 = vmax.f32 %v3825_v36, 0.0  ;;  %v3828_v63 = vpop.f32.mrb[128].mxu1  ;;  %v3917_v55 = vpop.f32.mrb[120].mxu0 }
 0x261   :  { %v4243_v38 = vmax.f32 %v4133_v6, %v4135_v8  ;;  %v3829_v51 = vadd.f32 %v3828_v63, %v7485_v47  ;;  %v3830_v12 = vpop.f32.mrb[129].mxu1  ;;  %v3919_v52 = vpop.f32.mrb[121].mxu0 }
 0x262   :  { %v4244_v23 = vmax.f32 %v4134_v22, %v4136_v4  ;;  %v3831_v58 = vadd.f32 %v3830_v12, %v7485_v47  ;;  %v3920_v12 = vadd.f32 %v3919_v52, %v7462_v13 }
 0x263   :  { %v5595_v33 = vpack.c.bf16 %v4243_v38, %v4241_v48  ;;  %v4151_v3 = vmax.f32 %v3829_v51, 0.0  ;;  %v3918_v38 = vadd.f32 %v3917_v55, %v7462_v13  ;;  %v4198_v51 = vmax.f32 %v3736_v14, 0.0 }
 0x264   :  { %v4152_v60 = vmax.f32 %v3831_v58, 0.0  ;;  %v3834_v57 = vpop.f32.mrb[130].mxu1  ;;  %v3923_v16 = vpop.f32.mrb[122].mxu0  ;;  %v5593_v2 = vpack.c.bf16 %v4244_v23, %v4242_v41 }
 0x265   :  { %v4245_v21 = vmax.f32 %v4149_v9, %v4151_v3  ;;  %v3835_v27 = vadd.f32 %v3834_v57, %v7491_v46  ;;  %v3836_v5 = vpop.f32.mrb[131].mxu1  ;;  %v3925_v32 = vpop.f32.mrb[123].mxu0  ;;  %v4089_v55 = vmax.f32 %v3918_v38, 0.0  ;;  %v3924_v57 = vadd.f32 %v3923_v16, %v7467_v35 }
 0x266   :  { %v4246_v40 = vmax.f32 %v4150_v17, %v4152_v60  ;;  %v3837_v54 = vadd.f32 %v3836_v5, %v7491_v46  ;;  %5594 = vmatprep.subr.bf16.mxu0 %v5593_v2  ;;  %5626 = vmatprep.subr.bf16.mxu1 %v5593_v2  ;;  %v3926_v52 = vadd.f32 %v3925_v32, %v7467_v35 }
 0x267   :  { %v4167_v34 = vmax.f32 %v3835_v27, 0.0  ;;  %5596 = vmatpush1.bf16.msra.mxu0 %v5595_v33  ;;  %5628 = vmatpush1.bf16.msra.mxu1 %v5595_v33  ;;  %v4090_v27 = vmax.f32 %v3920_v12, 0.0  ;;  %v4105_v16 = vmax.f32 %v3924_v57, 0.0 }
 0x268   :  { %v4168_v25 = vmax.f32 %v3837_v54, 0.0  ;;  %v3840_v50 = vpop.f32.mrb[132].mxu1  ;;  %v3929_v0 = vpop.f32.mrb[124].mxu0 }
 0x269   :  { %v4247_v56 = vmax.f32 %v4165_v59, %v4167_v34  ;;  %v3841_v15 = vadd.f32 %v3840_v50, %v7497_v7  ;;  %v3842_v18 = vpop.f32.mrb[133].mxu1  ;;  %v3931_v26 = vpop.f32.mrb[125].mxu0  ;;  %v3930_v50 = vadd.f32 %v3929_v0, %v7473_v28 }
 0x26a   :  { %v4248_v49 = vmax.f32 %v4166_v42, %v4168_v25  ;;  %v3843_v45 = vadd.f32 %v3842_v18, %v7497_v7  ;;  %v3932_v18 = vadd.f32 %v3931_v26, %v7473_v28 }
 0x26b   :  { %v5599_v39 = vpack.c.bf16 %v4247_v56, %v4245_v21  ;;  %v4183_v48 = vmax.f32 %v3841_v15, 0.0  ;;  %v7598_v56 = vld [vmem:[%s7933_s5] sm:$0xff]  ;;  %v4106_v15 = vmax.f32 %v3926_v52, 0.0  ;;  %v4121_v26 = vmax.f32 %v3930_v50, 0.0 }
 0x26c   :  { %v4184_v43 = vmax.f32 %v3843_v45, 0.0  ;;  %v3846_v41 = vpop.f32.mrb[134].mxu1  ;;  %v7572_v36 = vpop.f32.mrb[126].mxu0  ;;  %v5597_v6 = vpack.c.bf16 %v4248_v49, %v4246_v40 }
 0x26d   :  { %v4249_v10 = vmax.f32 %v4181_v29, %v4183_v48  ;;  %v3847_v8 = vadd.f32 %v3846_v41, %v7503_v37  ;;  %v3848_v22 = vpop.f32.mrb[135].mxu1  ;;  %v7575_v62 = vpop.f32.mrb[127].mxu0  ;;  %v7606_v29 = vld [vmem:[%s7933_s5 + $0x18] sm:$0xff] }
 0x26e   :  { %v4250_v4 = vmax.f32 %v4182_v44, %v4184_v43  ;;  %v3849_v63 = vadd.f32 %v3848_v22, %v7503_v37  ;;  %5598 = vmatprep.subr.bf16.mxu0 %v5597_v6  ;;  %5630 = vmatprep.subr.bf16.mxu1 %v5597_v6  ;;  %v3936_v43 = vadd.f32 %v7572_v36, %v7479_v20  ;;  %v7629_v36 = vld [vmem:[%s7933_s5 + $0x28] sm:$0xff] }
 0x26f   :  { %v4199_v24 = vmax.f32 %v3847_v8, 0.0  ;;  %5600 = vmatpush1.bf16.msra.mxu0 %v5599_v39  ;;  %5632 = vmatpush1.bf16.msra.mxu1 %v5599_v39  ;;  %v4122_v8 = vmax.f32 %v3932_v18, 0.0 }
 0x270   :  { %v4200_v23 = vmax.f32 %v3849_v63, 0.0  ;;  %v7580_v58 = vpop.f32.mrb[128].mxu0  ;;  %v4030_v9 = vpop.f32.mrb[136].mxu1 }
 0x271   :  { %v4251_v61 = vmax.f32 %v4197_v31, %v4199_v24  ;;  %v4031_v33 = vadd.f32 %v4030_v9, %v7462_v13  ;;  %v7583_v3 = vpop.f32.mrb[129].mxu0  ;;  %v4032_v17 = vpop.f32.mrb[137].mxu1 }
 0x272   :  { %v4252_v1 = vmax.f32 %v4198_v51, %v4200_v23  ;;  %v4033_v60 = vadd.f32 %v4032_v17, %v7462_v13  ;;  %v7643_v17 = vld [vmem:[%s7933_s5 + $0x20] sm:$0xff] }
 0x273   :  { %v5603_v2 = vpack.c.bf16 %v4251_v61, %v4249_v10  ;;  %v4091_v21 = vmax.f32 %v4031_v33, 0.0  ;;  %v7620_v10 = vld [vmem:[%s7933_s5 + $0x10] sm:$0xff]  ;;  %v3942_v61 = vadd.f32 %v7580_v58, %v7485_v47  ;;  %v7650_v58 = vld [vmem:[%s7933_s5 + $0x38] sm:$0xff] }
 0x274   :  { %v4092_v5 = vmax.f32 %v4033_v60, 0.0  ;;  %v7588_v40 = vpop.f32.mrb[130].mxu0  ;;  %v4036_v54 = vpop.f32.mrb[138].mxu1  ;;  %v5601_v59 = vpack.c.bf16 %v4252_v1, %v4250_v4 }
 0x275   :  { %v4253_v11 = vmax.f32 %v4089_v55, %v4091_v21  ;;  %v4037_v34 = vadd.f32 %v4036_v54, %v7467_v35  ;;  %v7591_v42 = vpop.f32.mrb[131].mxu0  ;;  %v4038_v53 = vpop.f32.mrb[139].mxu1 }
 0x276   :  { %v4254_v13 = vmax.f32 %v4090_v27, %v4092_v5  ;;  %v4039_v25 = vadd.f32 %v4038_v53, %v7467_v35  ;;  %5602 = vmatprep.subr.bf16.mxu0 %v5601_v59  ;;  %5634 = vmatprep.subr.bf16.mxu1 %v5601_v59  ;;  %v4153_v5 = vmax.f32 %v3942_v61, 0.0 }
 0x277   :  { %v4107_v32 = vmax.f32 %v4037_v34, 0.0  ;;  %5604 = vmatpush1.bf16.msra.mxu0 %v5603_v2  ;;  %5636 = vmatpush1.bf16.msra.mxu1 %v5603_v2 }
 0x278   :  { %v4108_v49 = vmax.f32 %v4039_v25, 0.0  ;;  %v7601_v45 = vpop.f32.mrb[132].mxu0  ;;  %v4042_v35 = vpop.f32.mrb[140].mxu1 }
 0x279   :  { %v4255_v0 = vmax.f32 %v4105_v16, %v4107_v32  ;;  %v4043_v30 = vadd.f32 %v4042_v35, %v7473_v28  ;;  %v7609_v39 = vpop.f32.mrb[133].mxu0  ;;  %v4044_v48 = vpop.f32.mrb[141].mxu1 }
 0x27a   :  { %v4256_v44 = vmax.f32 %v4106_v15, %v4108_v49  ;;  %v4045_v14 = vadd.f32 %v4044_v48, %v7473_v28  ;;  %4511 = vmatmul.mubr.f32.vlgmr.msra.gmra.mrb[136].mxu0 %v7598_v56  ;;  %v3938_v28 = vadd.f32 %v7575_v62, %v7479_v20  ;;  %v4137_v62 = vmax.f32 %v3936_v43, 0.0 }
 0x27b   :  { %v5639_v41 = vpack.c.bf16 %v4255_v0, %v4253_v11  ;;  %v4123_v6 = vmax.f32 %v4043_v30, 0.0  ;;  %5333 = vmatprep.mubr.msk.f32.mxu0 %vm4397_vm9, %v7606_v29  ;;  %v7662_v11 = vld [vmem:[%s7933_s5 + $0x30] sm:$0xff]  ;;  %v7681_v0 = vld [vmem:[%s7933_s5 + $0x40] sm:$0xff] }
 0x27c   :  { %v4124_v22 = vmax.f32 %v4045_v14, 0.0  ;;  %v7624_v4 = vpop.f32.mrb[134].mxu0  ;;  %v4048_v63 = vpop.f32.mrb[142].mxu1  ;;  %v5637_v31 = vpack.c.bf16 %v4256_v44, %v4254_v13  ;;  %v4138_v1 = vmax.f32 %v3938_v28, 0.0 }
 0x27d   :  { %v4257_v38 = vmax.f32 %v4121_v26, %v4123_v6  ;;  %v4049_v24 = vadd.f32 %v4048_v63, %v7479_v20  ;;  %v7632_v51 = vpop.f32.mrb[135].mxu0  ;;  %v4050_v12 = vpop.f32.mrb[143].mxu1  ;;  %v7700_v63 = vld [vmem:[%s7933_s5 + $0x50] sm:$0xff] }
 0x27e   :  { %v4258_v23 = vmax.f32 %v4122_v8, %v4124_v22  ;;  %v4051_v9 = vadd.f32 %v4050_v12, %v7479_v20  ;;  %4517 = vmatmul.mubr.f32.gmra.mrb[138].mxu0 %v7620_v10  ;;  %5638 = vmatprep.subr.bf16.mxu1 %v5637_v31  ;;  %v3944_v20 = vadd.f32 %v7583_v3, %v7485_v47 }
 0x27f   :  { %v4139_v33 = vmax.f32 %v4049_v24, 0.0  ;;  %5640 = vmatpush1.bf16.msra.mxu1 %v5639_v41  ;;  %5334 = vmatprep.mubr.msk.f32.mxu0 %vm4397_vm9, %v7629_v36  ;;  %v3948_v3 = vadd.f32 %v7588_v40, %v7491_v46  ;;  %v7669_v40 = vld [vmem:[%s7933_s5 + $0x48] sm:$0xff] }
 0x280   :  { %v4140_v60 = vmax.f32 %v4051_v9, 0.0  ;;  %v4054_v55 = vpop.f32.mrb[144].mxu1  ;;  %v4154_v34 = vmax.f32 %v3944_v20, 0.0  ;;  %v4281_v20 = vld [vmem:[%s7933_s5 + $0x60] sm:$0xff] }
 0x281   :  { %v4259_v57 = vmax.f32 %v4137_v62, %v4139_v33  ;;  %v4055_v2 = vadd.f32 %v4054_v55, %v7485_v47  ;;  %v4056_v21 = vpop.f32.mrb[145].mxu1  ;;  %v4169_v49 = vmax.f32 %v3948_v3, 0.0  ;;  %v4285_v3 = vld [vmem:[%s7933_s5 + $0x80] sm:$0xff] }
 0x282   :  { %v4260_v27 = vmax.f32 %v4138_v1, %v4140_v60  ;;  %v4057_v52 = vadd.f32 %v4056_v21, %v7485_v47  ;;  %4523 = vmatmul.mubr.f32.gmra.mrb[140].mxu0 %v7643_v17  ;;  %v3950_v47 = vadd.f32 %v7591_v42, %v7491_v46  ;;  %v3954_v42 = vadd.f32 %v7601_v45, %v7497_v7  ;;  %v7688_v45 = vld [vmem:[%s7933_s5 + $0x58] sm:$0xff] }
 0x283   :  { %v5643_v54 = vpack.c.bf16 %v4259_v57, %v4257_v38  ;;  %v4155_v59 = vmax.f32 %v4055_v2, 0.0  ;;  %5335 = vmatprep.mubr.msk.f32.mxu0 %vm4397_vm9, %v7650_v58  ;;  %v4284_v57 = vld [vmem:[%s7933_s5 + $0x78] sm:$0xff] }
 0x284   :  { %v4156_v53 = vmax.f32 %v4057_v52, 0.0  ;;  %v4060_v13 = vpop.f32.mrb[146].mxu1  ;;  %v5641_v25 = vpack.c.bf16 %v4260_v27, %v4258_v23  ;;  %v4170_v30 = vmax.f32 %v3950_v47, 0.0  ;;  %v4185_v8 = vmax.f32 %v3954_v42, 0.0  ;;  %v4283_v27 = vld [vmem:[%s7933_s5 + $0x70] sm:$0xff]  ;;  %v4298_v47 = vld [vmem:[%s7933_s5 + $0xe8] sm:$0xff] }
 0x285   :  { %v4261_v16 = vmax.f32 %v4153_v5, %v4155_v59  ;;  %v4061_v50 = vadd.f32 %v4060_v13, %v7491_v46  ;;  %v4062_v32 = vpop.f32.mrb[147].mxu1  ;;  %v4286_v5 = vld [vmem:[%s7933_s5 + $0x88] sm:$0xff]  ;;  %v4287_v59 = vld [vmem:[%s7933_s5 + $0x90] sm:$0xff]  ;;  %v4300_v13 = vld [vmem:[%s7933_s5 + $0xf8] sm:$0xff] }
 0x286   :  { %v4262_v15 = vmax.f32 %v4154_v34, %v4156_v53  ;;  %v4063_v18 = vadd.f32 %v4062_v32, %v7491_v46  ;;  %4529 = vmatmul.mubr.f32.gmra.mrb[142].mxu0 %v7662_v11  ;;  %5642 = vmatprep.subr.bf16.mxu1 %v5641_v25  ;;  %v3956_v46 = vadd.f32 %v7609_v39, %v7497_v7  ;;  %v4290_v34 = vld [vmem:[%s7933_s5 + $0xa8] sm:$0xff]  ;;  %v4297_v53 = vld [vmem:[%s7933_s5 + $0xe0] sm:$0xff]  ;;  %v4299_v25 = vld [vmem:[%s7933_s5 + $0xf0] sm:$0xff] }
 0x287   :  { %v4171_v35 = vmax.f32 %v4061_v50, 0.0  ;;  %5644 = vmatpush1.bf16.msra.mxu1 %v5643_v54  ;;  %5336 = vmatprep.mubr.msk.f32.mxu0 %vm4397_vm9, %v7669_v40  ;;  %v3960_v39 = vadd.f32 %v7624_v4, %v7503_v37  ;;  %v7707_v4 = vld [vmem:[%s7933_s5 + $0x68] sm:$0xff]  ;;  %v4288_v54 = vld [vmem:[%s7933_s5 + $0x98] sm:$0xff] }
 0x288   :  { %v4172_v48 = vmax.f32 %v4063_v18, 0.0  ;;  %v4066_v44 = vpop.f32.mrb[148].mxu1  ;;  %v4186_v31 = vmax.f32 %v3956_v46, 0.0 }
 0x289   :  { %v4263_v14 = vmax.f32 %v4169_v49, %v4171_v35  ;;  %v4067_v26 = vadd.f32 %v4066_v44, %v7497_v7  ;;  %v4068_v43 = vpop.f32.mrb[149].mxu1  ;;  %v4201_v1 = vmax.f32 %v3960_v39, 0.0 }
 0x28a   :  { %v4264_v41 = vmax.f32 %v4170_v30, %v4172_v48  ;;  %v4069_v6 = vadd.f32 %v4068_v43, %v7497_v7  ;;  %4535 = vmatmul.mubr.f32.gmra.mrb[144].mxu0 %v7681_v0  ;;  %v3962_v7 = vadd.f32 %v7632_v51, %v7503_v37 }
 0x28b   :  { %v5647_v28 = vpack.c.bf16 %v4263_v14, %v4261_v16  ;;  %v4187_v22 = vmax.f32 %v4067_v26, 0.0  ;;  %5337 = vmatprep.mubr.msk.f32.mxu0 %vm4397_vm9, %v7688_v45  ;;  %v4320_v26 = vpop.permute.xlu0 %4319 }
 0x28c   :  { %v4188_v38 = vmax.f32 %v4069_v6, 0.0  ;;  %v4072_v24 = vpop.f32.mrb[150].mxu1  ;;  %v5645_v12 = vpack.c.bf16 %v4264_v41, %v4262_v15  ;;  %v4202_v60 = vmax.f32 %v3962_v7, 0.0 }
 0x28d   :  { %v4265_v23 = vmax.f32 %v4185_v8, %v4187_v22  ;;  %v4073_v9 = vadd.f32 %v4072_v24, %v7503_v37  ;;  %v4074_v62 = vpop.f32.mrb[151].mxu1 }
 0x28e   :  { %v4266_v61 = vmax.f32 %v4186_v31, %v4188_v38  ;;  %v4075_v33 = vadd.f32 %v4074_v62, %v7503_v37  ;;  %4541 = vmatmul.mubr.f32.gmra.mrb[146].mxu0 %v7700_v63  ;;  %5646 = vmatprep.subr.bf16.mxu1 %v5645_v12 }
 0x28f   :  { %v4203_v51 = vmax.f32 %v4073_v9, 0.0  ;;  %5648 = vmatpush1.bf16.msra.mxu1 %v5647_v28  ;;  %5338 = vmatprep.mubr.msk.f32.mxu0 %vm4397_vm9, %v7707_v4 }
 0x290   :  { %v4204_v55 = vmax.f32 %v4075_v33, 0.0 }
 0x291   :  { %v4267_v37 = vmax.f32 %v4201_v1, %v4203_v51 }
 0x292   :  { %v4268_v2 = vmax.f32 %v4202_v60, %v4204_v55  ;;  %4547 = vmatmul.mubr.f32.gmra.mrb[148].mxu0 %v4281_v20 }
 0x293   :  { %v5651_v21 = vpack.c.bf16 %v4267_v37, %v4265_v23  ;;  %5339 = vmatprep.mubr.msk.f32.mxu0 %vm4397_vm9, %v4284_v57 }
 0x294   :  { %v5649_v52 = vpack.c.bf16 %v4268_v2, %v4266_v61 }
 0x296   :  { %4553 = vmatmul.mubr.f32.gmra.mrb[150].mxu0 %v4283_v27  ;;  %5650 = vmatprep.subr.bf16.mxu1 %v5649_v52 }
 0x297   :  { %5652 = vmatpush1.bf16.msra.mxu1 %v5651_v21  ;;  %5340 = vmatprep.mubr.msk.f32.mxu0 %vm4397_vm9, %v4286_v5 }
 0x29a   :  { %4559 = vmatmul.mubr.f32.gmra.mrb[152].mxu0 %v4285_v3  ;;  %4672 = vmatmul.mubr.f32.vlgmr.msra.gmra.mrb[152].mxu1 %v7598_v56  ;;  %v4289_v56 = vld [vmem:[%s7933_s5 + $0xa0] sm:$0xff] }
 0x29b   :  { %5341 = vmatprep.mubr.msk.f32.mxu0 %vm4397_vm9, %v4288_v54  ;;  %5349 = vmatprep.mubr.msk.f32.mxu1 %vm4397_vm9, %v7606_v29  ;;  %v4292_v29 = vld [vmem:[%s7933_s5 + $0xb8] sm:$0xff] }
 0x29e   :  { %4565 = vmatmul.mubr.f32.gmra.mrb[154].mxu0 %v4287_v59  ;;  %4678 = vmatmul.mubr.f32.gmra.mrb[154].mxu1 %v7620_v10  ;;  %v4291_v10 = vld [vmem:[%s7933_s5 + $0xb0] sm:$0xff] }
 0x29f   :  { %5342 = vmatprep.mubr.msk.f32.mxu0 %vm4397_vm9, %v4290_v34  ;;  %5350 = vmatprep.mubr.msk.f32.mxu1 %vm4397_vm9, %v7629_v36  ;;  %v4294_v36 = vld [vmem:[%s7933_s5 + $0xc8] sm:$0xff] }
 0x2a2   :  { %4571 = vmatmul.mubr.f32.gmra.mrb[156].mxu0 %v4289_v56  ;;  %4684 = vmatmul.mubr.f32.gmra.mrb[156].mxu1 %v7643_v17  ;;  %v4293_v17 = vld [vmem:[%s7933_s5 + $0xc0] sm:$0xff] }
 0x2a3   :  { %5343 = vmatprep.mubr.msk.f32.mxu0 %vm4397_vm9, %v4292_v29  ;;  %5351 = vmatprep.mubr.msk.f32.mxu1 %vm4397_vm9, %v7650_v58  ;;  %v4296_v58 = vld [vmem:[%s7933_s5 + $0xd8] sm:$0xff] }
 0x2a6   :  { %4577 = vmatmul.mubr.f32.gmra.mrb[158].mxu0 %v4291_v10  ;;  %4690 = vmatmul.mubr.f32.gmra.mrb[158].mxu1 %v7662_v11  ;;  %v4295_v11 = vld [vmem:[%s7933_s5 + $0xd0] sm:$0xff] }
 0x2a7   :  { %5344 = vmatprep.mubr.msk.f32.mxu0 %vm4397_vm9, %v4294_v36  ;;  %5352 = vmatprep.mubr.msk.f32.mxu1 %vm4397_vm9, %v7669_v40 }
 0x2aa   :  { %4583 = vmatmul.mubr.f32.gmra.mrb[160].mxu0 %v4293_v17  ;;  %4696 = vmatmul.mubr.f32.gmra.mrb[160].mxu1 %v7681_v0 }
 0x2ab   :  { %5345 = vmatprep.mubr.msk.f32.mxu0 %vm4397_vm9, %v4296_v58  ;;  %5353 = vmatprep.mubr.msk.f32.mxu1 %vm4397_vm9, %v7688_v45 }
 0x2ae   :  { %4589 = vmatmul.mubr.f32.gmra.mrb[162].mxu0 %v4295_v11  ;;  %4702 = vmatmul.mubr.f32.gmra.mrb[162].mxu1 %v7700_v63  ;;  %v4325_v63 = vpop.permute.xlu1 %4324 }
 0x2af   :  { %5346 = vmatprep.mubr.msk.f32.mxu0 %vm4397_vm9, %v4298_v47  ;;  %5354 = vmatprep.mubr.msk.f32.mxu1 %vm4397_vm9, %v7707_v4 }
 0x2b2   :  { %4595 = vmatmul.mubr.f32.gmra.mrb[164].mxu0 %v4297_v53  ;;  %4708 = vmatmul.mubr.f32.gmra.mrb[164].mxu1 %v4281_v20  ;;  %v4330_v20 = vpop.permute.xlu0 %4329 }
 0x2b3   :  { %5347 = vmatprep.mubr.msk.f32.mxu0 %vm4397_vm9, %v4300_v13  ;;  %5355 = vmatprep.mubr.msk.f32.mxu1 %vm4397_vm9, %v4284_v57 }
 0x2b6   :  { %4601 = vmatmul.mubr.f32.gmra.mrb[166].mxu0 %v4299_v25  ;;  %4714 = vmatmul.mubr.f32.gmra.mrb[166].mxu1 %v4283_v27 }
 0x2b7   :  { %5356 = vmatprep.mubr.msk.f32.mxu1 %vm4397_vm9, %v4286_v5  ;;  %4984 = vmatprep.mubr.f32.mxu0 %v5745_v19 }
 0x2ba   :  { %4720 = vmatmul.mubr.f32.gmra.mrb[168].mxu1 %v4285_v3 }
 0x2bb   :  { %5357 = vmatprep.mubr.msk.f32.mxu1 %vm4397_vm9, %v4288_v54 }
 0x2be   :  { %4726 = vmatmul.mubr.f32.gmra.mrb[170].mxu1 %v4287_v59 }
 0x2bf   :  { %5358 = vmatprep.mubr.msk.f32.mxu1 %vm4397_vm9, %v4290_v34 }
 0x2c2   :  { %4732 = vmatmul.mubr.f32.gmra.mrb[172].mxu1 %v4289_v56 }
 0x2c3   :  { %5359 = vmatprep.mubr.msk.f32.mxu1 %vm4397_vm9, %v4292_v29  ;;  %v4335_v29 = vpop.permute.xlu1 %4334 }
 0x2c6   :  { %4738 = vmatmul.mubr.f32.gmra.mrb[174].mxu1 %v4291_v10 }
 0x2c7   :  { %5360 = vmatprep.mubr.msk.f32.mxu1 %vm4397_vm9, %v4294_v36 }
 0x2ca   :  { %4744 = vmatmul.mubr.f32.gmra.mrb[176].mxu1 %v4293_v17 }
 0x2cb   :  { %5361 = vmatprep.mubr.msk.f32.mxu1 %vm4397_vm9, %v4296_v58 }
 0x2ce   :  { %4750 = vmatmul.mubr.f32.gmra.mrb[178].mxu1 %v4295_v11 }
 0x2cf   :  { %5362 = vmatprep.mubr.msk.f32.mxu1 %vm4397_vm9, %v4298_v47 }
 0x2d2   :  { %4756 = vmatmul.mubr.f32.gmra.mrb[180].mxu1 %v4297_v53 }
 0x2d3   :  { %5363 = vmatprep.mubr.msk.f32.mxu1 %vm4397_vm9, %v4300_v13 }
 0x2d6   :  { %4762 = vmatmul.mubr.f32.gmra.mrb[182].mxu1 %v4299_v25 }
 0x2d7   :  { %5123 = vmatprep.mubr.f32.mxu1 %v5745_v19 }
 0x34d   :  { %v4512_v40 = vpop.f32.mrb[136].mxu0 }
 0x34e   :  { %v4514_v16 = vpop.f32.mrb[137].mxu0  ;;  %v4513_v43 = vadd.f32 %v4512_v40, %v4320_v26 }
 0x34f   :  { %v4515_v41 = vadd.f32 %v4514_v16, %v4320_v26 }
 0x350   :  { %v4768_v7 = vmax.f32 %v4513_v43, 0.0  ;;  %v4340_v43 = vpop.permute.xlu0 %4339 }
 0x351   :  { %v4518_v50 = vpop.f32.mrb[138].mxu0  ;;  %v4769_v12 = vmax.f32 %v4515_v41, 0.0 }
 0x352   :  { %v4520_v32 = vpop.f32.mrb[139].mxu0  ;;  %v4519_v38 = vadd.f32 %v4518_v50, %v4325_v63 }
 0x353   :  { %v4521_v4 = vadd.f32 %v4520_v32, %v4325_v63 }
 0x354   :  { %v4772_v57 = vmax.f32 %v4519_v38, 0.0 }
 0x355   :  { %v4524_v15 = vpop.f32.mrb[140].mxu0  ;;  %v4773_v21 = vmax.f32 %v4521_v4, 0.0 }
 0x356   :  { %v4526_v18 = vpop.f32.mrb[141].mxu0  ;;  %v4525_v37 = vadd.f32 %v4524_v15, %v4330_v20 }
 0x357   :  { %v4527_v27 = vadd.f32 %v4526_v18, %v4330_v20 }
 0x358   :  { %v4776_v17 = vmax.f32 %v4525_v37, 0.0 }
 0x359   :  { %v4530_v49 = vpop.f32.mrb[142].mxu0  ;;  %v4777_v53 = vmax.f32 %v4527_v27, 0.0 }
 0x35a   :  { %v4532_v42 = vpop.f32.mrb[143].mxu0  ;;  %v4531_v58 = vadd.f32 %v4530_v49, %v4335_v29 }
 0x35b   :  { %v4533_v13 = vadd.f32 %v4532_v42, %v4335_v29 }
 0x35d   :  { %v7809_v35 = vpop.f32.mrb[144].mxu0  ;;  %v4781_v42 = vmax.f32 %v4533_v13, 0.0 }
 0x35e   :  { %v7811_v0 = vpop.f32.mrb[145].mxu0  ;;  %v4537_v49 = vadd.f32 %v7809_v35, %v4340_v43 }
 0x361   :  { %v7813_v30 = vpop.f32.mrb[146].mxu0 }
 0x362   :  { %v7815_v46 = vpop.f32.mrb[147].mxu0 }
 0x365   :  { %v7817_v48 = vpop.f32.mrb[148].mxu0 }
 0x366   :  { %v7819_v44 = vpop.f32.mrb[149].mxu0 }
 0x369   :  { %v7821_v45 = vpop.f32.mrb[150].mxu0 }
 0x36a   :  { %v7823_v14 = vpop.f32.mrb[151].mxu0 }
 0x36d   :  { %v7825_v6 = vpop.f32.mrb[152].mxu0  ;;  %v4673_v8 = vpop.f32.mrb[152].mxu1 }
 0x36e   :  { %v4674_v39 = vadd.f32 %v4673_v8, %v4320_v26  ;;  %v7827_v28 = vpop.f32.mrb[153].mxu0  ;;  %v4675_v22 = vpop.f32.mrb[153].mxu1 }
 0x36f   :  { %v4676_v31 = vadd.f32 %v4675_v22, %v4320_v26 }
 0x370   :  { %v4770_v24 = vmax.f32 %v4674_v39, 0.0  ;;  %v4780_v39 = vmax.f32 %v4531_v58, 0.0 }
 0x371   :  { %v4771_v23 = vmax.f32 %v4676_v31, 0.0  ;;  %v7829_v9 = vpop.f32.mrb[154].mxu0  ;;  %v4679_v62 = vpop.f32.mrb[154].mxu1 }
 0x372   :  { %v4832_v61 = vmax.f32 %v4768_v7, %v4770_v24  ;;  %v4680_v33 = vadd.f32 %v4679_v62, %v4325_v63  ;;  %v7831_v1 = vpop.f32.mrb[155].mxu0  ;;  %v4681_v51 = vpop.f32.mrb[155].mxu1 }
 0x373   :  { %v4833_v60 = vmax.f32 %v4769_v12, %v4771_v23  ;;  %v4682_v55 = vadd.f32 %v4681_v51, %v4325_v63  ;;  %v4539_v63 = vadd.f32 %v7811_v0, %v4340_v43  ;;  %v4345_v62 = vpop.permute.xlu1 %4344  ;;  %v4784_v51 = vmax.f32 %v4537_v49, 0.0 }
 0x374   :  { %v4774_v2 = vmax.f32 %v4680_v33, 0.0  ;;  %v4543_v35 = vadd.f32 %v7813_v30, %v4345_v62  ;;  %v4545_v0 = vadd.f32 %v7815_v46, %v4345_v62 }
 0x375   :  { %v4775_v52 = vmax.f32 %v4682_v55, 0.0  ;;  %v7833_v5 = vpop.f32.mrb[156].mxu0  ;;  %v4685_v3 = vpop.f32.mrb[156].mxu1  ;;  %v4785_v55 = vmax.f32 %v4539_v63, 0.0 }
 0x376   :  { %v4834_v54 = vmax.f32 %v4772_v57, %v4774_v2  ;;  %v4686_v59 = vadd.f32 %v4685_v3, %v4330_v20  ;;  %v7835_v34 = vpop.f32.mrb[157].mxu0  ;;  %v4687_v56 = vpop.f32.mrb[157].mxu1  ;;  %v4788_v30 = vmax.f32 %v4543_v35, 0.0  ;;  %v4789_v46 = vmax.f32 %v4545_v0, 0.0 }
 0x377   :  { %v4835_v10 = vmax.f32 %v4773_v21, %v4775_v52  ;;  %v4688_v36 = vadd.f32 %v4687_v56, %v4330_v20 }
 0x378   :  { %v5655_v11 = vpack.c.bf16 %v4834_v54, %v4832_v61  ;;  %v4778_v47 = vmax.f32 %v4686_v59, 0.0  ;;  %v4350_v59 = vpop.permute.xlu0 %4349 }
 0x379   :  { %v4779_v25 = vmax.f32 %v4688_v36, 0.0  ;;  %v7837_v40 = vpop.f32.mrb[158].mxu0  ;;  %v4691_v16 = vpop.f32.mrb[158].mxu1  ;;  %v5653_v50 = vpack.c.bf16 %v4835_v10, %v4833_v60  ;;  %v4549_v10 = vadd.f32 %v7817_v48, %v4350_v59 }
 0x37a   :  { %v4836_v32 = vmax.f32 %v4776_v17, %v4778_v47  ;;  %v4692_v15 = vadd.f32 %v4691_v16, %v4335_v29  ;;  %v7839_v18 = vpop.f32.mrb[159].mxu0  ;;  %v4693_v26 = vpop.f32.mrb[159].mxu1  ;;  %v4551_v17 = vadd.f32 %v7819_v44, %v4350_v59 }
 0x37b   :  { %v4837_v41 = vmax.f32 %v4777_v53, %v4779_v25  ;;  %v4694_v8 = vadd.f32 %v4693_v26, %v4335_v29  ;;  %5654 = vmatprep.subr.bf16.mxu0 %v5653_v50  ;;  %v4355_v50 = vpop.permute.xlu1 %4354  ;;  %v4792_v26 = vmax.f32 %v4549_v10, 0.0 }
 0x37c   :  { %v4782_v22 = vmax.f32 %v4692_v15, 0.0  ;;  %5656 = vmatpush1.bf16.msra.mxu0 %v5655_v11  ;;  %v4555_v48 = vadd.f32 %v7821_v45, %v4355_v50  ;;  %v4557_v44 = vadd.f32 %v7823_v14, %v4355_v50 }
 0x37d   :  { %v4783_v31 = vmax.f32 %v4694_v8, 0.0  ;;  %v7843_v7 = vpop.f32.mrb[160].mxu0  ;;  %v4697_v38 = vpop.f32.mrb[160].mxu1  ;;  %v4793_v8 = vmax.f32 %v4551_v17, 0.0 }
 0x37e   :  { %v4838_v24 = vmax.f32 %v4780_v39, %v4782_v22  ;;  %v4698_v12 = vadd.f32 %v4697_v38, %v4340_v43  ;;  %v7845_v4 = vpop.f32.mrb[161].mxu0  ;;  %v4699_v23 = vpop.f32.mrb[161].mxu1  ;;  %v4796_v45 = vmax.f32 %v4555_v48, 0.0  ;;  %v4797_v14 = vmax.f32 %v4557_v44, 0.0 }
 0x37f   :  { %v4839_v61 = vmax.f32 %v4781_v42, %v4783_v31  ;;  %v4700_v33 = vadd.f32 %v4699_v23, %v4340_v43 }
 0x380   :  { %v5659_v20 = vpack.c.bf16 %v4838_v24, %v4836_v32  ;;  %v4786_v60 = vmax.f32 %v4698_v12, 0.0  ;;  %v4360_v12 = vpop.permute.xlu0 %4359 }
 0x381   :  { %v4787_v57 = vmax.f32 %v4700_v33, 0.0  ;;  %v7849_v37 = vpop.f32.mrb[162].mxu0  ;;  %v4703_v2 = vpop.f32.mrb[162].mxu1  ;;  %v5657_v21 = vpack.c.bf16 %v4839_v61, %v4837_v41  ;;  %v4561_v61 = vadd.f32 %v7825_v6, %v4360_v12 }
 0x382   :  { %v4840_v27 = vmax.f32 %v4784_v51, %v4786_v60  ;;  %v4704_v52 = vadd.f32 %v4703_v2, %v4345_v62  ;;  %v7851_v3 = vpop.f32.mrb[163].mxu0  ;;  %v4705_v54 = vpop.f32.mrb[163].mxu1  ;;  %v4563_v51 = vadd.f32 %v7827_v28, %v4360_v12 }
 0x383   :  { %v4841_v56 = vmax.f32 %v4785_v55, %v4787_v57  ;;  %v4706_v29 = vadd.f32 %v4705_v54, %v4345_v62  ;;  %5658 = vmatprep.subr.bf16.mxu0 %v5657_v21  ;;  %v4365_v57 = vpop.permute.xlu1 %4364 }
 0x384   :  { %v4790_v36 = vmax.f32 %v4704_v52, 0.0  ;;  %5660 = vmatpush1.bf16.msra.mxu0 %v5659_v20  ;;  %v4567_v52 = vadd.f32 %v7829_v9, %v4365_v57  ;;  %v4569_v6 = vadd.f32 %v7831_v1, %v4365_v57  ;;  %v4370_v17 = vpop.permute.xlu0 %4369 }
 0x385   :  { %v4791_v58 = vmax.f32 %v4706_v29, 0.0  ;;  %v7855_v11 = vpop.f32.mrb[164].mxu0  ;;  %v4709_v47 = vpop.f32.mrb[164].mxu1 }
 0x386   :  { %v4842_v53 = vmax.f32 %v4788_v30, %v4790_v36  ;;  %v4710_v13 = vadd.f32 %v4709_v47, %v4350_v59  ;;  %v7857_v25 = vpop.f32.mrb[165].mxu0  ;;  %v4711_v16 = vpop.f32.mrb[165].mxu1  ;;  %v4805_v9 = vmax.f32 %v4569_v6, 0.0 }
 0x387   :  { %v4843_v32 = vmax.f32 %v4789_v46, %v4791_v58  ;;  %v4712_v15 = vadd.f32 %v4711_v16, %v4350_v59 }
 0x388   :  { %v5663_v43 = vpack.c.bf16 %v4842_v53, %v4840_v27  ;;  %v4794_v41 = vmax.f32 %v4710_v13, 0.0  ;;  %v4800_v27 = vmax.f32 %v4561_v61, 0.0  ;;  %v4804_v53 = vmax.f32 %v4567_v52, 0.0 }
 0x389   :  { %v4795_v39 = vmax.f32 %v4712_v15, 0.0  ;;  %v7861_v49 = vpop.f32.mrb[166].mxu0  ;;  %v4715_v22 = vpop.f32.mrb[166].mxu1  ;;  %v5661_v42 = vpack.c.bf16 %v4843_v32, %v4841_v56  ;;  %v4801_v56 = vmax.f32 %v4563_v51, 0.0  ;;  %v4573_v13 = vadd.f32 %v7833_v5, %v4370_v17 }
 0x38a   :  { %v4844_v63 = vmax.f32 %v4792_v26, %v4794_v41  ;;  %v4716_v31 = vadd.f32 %v4715_v22, %v4355_v50  ;;  %v7863_v38 = vpop.f32.mrb[167].mxu0  ;;  %v4717_v24 = vpop.f32.mrb[167].mxu1 }
 0x38b   :  { %v4845_v23 = vmax.f32 %v4793_v8, %v4795_v39  ;;  %v4718_v62 = vadd.f32 %v4717_v24, %v4355_v50  ;;  %5662 = vmatprep.subr.bf16.mxu0 %v5661_v42  ;;  %v4575_v50 = vadd.f32 %v7835_v34, %v4370_v17  ;;  %v4808_v44 = vmax.f32 %v4573_v13, 0.0 }
 0x38c   :  { %v4798_v33 = vmax.f32 %v4716_v31, 0.0  ;;  %5664 = vmatpush1.bf16.msra.mxu0 %v5663_v43  ;;  %v4375_v43 = vpop.permute.xlu1 %4374 }
 0x38d   :  { %v4799_v35 = vmax.f32 %v4718_v62, 0.0  ;;  %v4721_v20 = vpop.f32.mrb[168].mxu1  ;;  %v4579_v39 = vadd.f32 %v7837_v40, %v4375_v43  ;;  %v4581_v5 = vadd.f32 %v7839_v18, %v4375_v43 }
 0x38e   :  { %v4846_v60 = vmax.f32 %v4796_v45, %v4798_v33  ;;  %v4722_v55 = vadd.f32 %v4721_v20, %v4360_v12  ;;  %v4723_v0 = vpop.f32.mrb[169].mxu1  ;;  %v4380_v45 = vpop.permute.xlu0 %4379 }
 0x38f   :  { %v4847_v2 = vmax.f32 %v4797_v14, %v4799_v35  ;;  %v4724_v21 = vadd.f32 %v4723_v0, %v4360_v12  ;;  %v4812_v14 = vmax.f32 %v4579_v39, 0.0  ;;  %v4585_v51 = vadd.f32 %v7843_v7, %v4380_v45 }
 0x390   :  { %v5667_v54 = vpack.c.bf16 %v4846_v60, %v4844_v63  ;;  %v4802_v59 = vmax.f32 %v4722_v55, 0.0  ;;  %v4809_v63 = vmax.f32 %v4575_v50, 0.0  ;;  %v4813_v40 = vmax.f32 %v4581_v5, 0.0 }
 0x391   :  { %v4803_v29 = vmax.f32 %v4724_v21, 0.0  ;;  %v4727_v30 = vpop.f32.mrb[170].mxu1  ;;  %v5665_v10 = vpack.c.bf16 %v4847_v2, %v4845_v23  ;;  %v4587_v20 = vadd.f32 %v7845_v4, %v4380_v45  ;;  %v4385_v2 = vpop.permute.xlu1 %4384  ;;  %v4816_v52 = vmax.f32 %v4585_v51, 0.0  ;;  %v4865_v51 = vld [vmem:[%s7935_s7 + $0x8] sm:$0xff] }
 0x392   :  { %v4848_v28 = vmax.f32 %v4800_v27, %v4802_v59  ;;  %v4728_v36 = vadd.f32 %v4727_v30, %v4365_v57  ;;  %v4729_v46 = vpop.f32.mrb[171].mxu1  ;;  %v4593_v7 = vadd.f32 %v7851_v3, %v4385_v2 }
 0x393   :  { %v4849_v58 = vmax.f32 %v4801_v56, %v4803_v29  ;;  %v4730_v47 = vadd.f32 %v4729_v46, %v4365_v57  ;;  %5666 = vmatprep.subr.bf16.mxu0 %v5665_v10  ;;  %v4817_v6 = vmax.f32 %v4587_v20, 0.0  ;;  %v4390_v46 = vpop.permute.xlu0 %4389  ;;  %v4868_v20 = vld [vmem:[%s7935_s7 + $0x20] sm:$0xff] }
 0x394   :  { %v4806_v16 = vmax.f32 %v4728_v36, 0.0  ;;  %5668 = vmatpush1.bf16.msra.mxu0 %v5667_v54  ;;  %v4591_v54 = vadd.f32 %v7849_v37, %v4385_v2  ;;  %v4821_v37 = vmax.f32 %v4593_v7, 0.0 }
 0x395   :  { %v4807_v32 = vmax.f32 %v4730_v47, 0.0  ;;  %v4733_v1 = vpop.f32.mrb[172].mxu1 }
 0x396   :  { %v4850_v15 = vmax.f32 %v4804_v53, %v4806_v16  ;;  %v4734_v26 = vadd.f32 %v4733_v1, %v4370_v17  ;;  %v4735_v48 = vpop.f32.mrb[173].mxu1  ;;  %v4820_v47 = vmax.f32 %v4591_v54, 0.0  ;;  %v4597_v53 = vadd.f32 %v7855_v11, %v4390_v46 }
 0x397   :  { %v4851_v41 = vmax.f32 %v4805_v9, %v4807_v32  ;;  %v4736_v8 = vadd.f32 %v4735_v48, %v4370_v17  ;;  %v4599_v16 = vadd.f32 %v7857_v25, %v4390_v46 }
 0x398   :  { %v5671_v22 = vpack.c.bf16 %v4850_v15, %v4848_v28  ;;  %v4810_v42 = vmax.f32 %v4734_v26, 0.0  ;;  %v4395_v15 = vpop.permute.xlu1 %4394 }
 0x399   :  { %v4811_v31 = vmax.f32 %v4736_v8, 0.0  ;;  %v4739_v24 = vpop.f32.mrb[174].mxu1  ;;  %v5669_v12 = vpack.c.bf16 %v4851_v41, %v4849_v58  ;;  %v4603_v41 = vadd.f32 %v7861_v49, %v4395_v15  ;;  %v4825_v39 = vmax.f32 %v4599_v16, 0.0 }
 0x39a   :  { %v4852_v34 = vmax.f32 %v4808_v44, %v4810_v42  ;;  %v4740_v23 = vadd.f32 %v4739_v24, %v4375_v43  ;;  %v4741_v62 = vpop.f32.mrb[175].mxu1  ;;  %v4605_v11 = vadd.f32 %v7863_v38, %v4395_v15  ;;  %v4864_v38 = vld [vmem:[%s7935_s7] sm:$0xff] }
 0x39b   :  { %v4853_v61 = vmax.f32 %v4809_v63, %v4811_v31  ;;  %v4742_v33 = vadd.f32 %v4741_v62, %v4375_v43  ;;  %5670 = vmatprep.subr.bf16.mxu0 %v5669_v12  ;;  %v4824_v43 = vmax.f32 %v4597_v53, 0.0 }
 0x39c   :  { %v4814_v35 = vmax.f32 %v4740_v23, 0.0  ;;  %5672 = vmatpush1.bf16.msra.mxu0 %v5671_v22  ;;  %v4829_v62 = vmax.f32 %v4605_v11, 0.0 }
 0x39d   :  { %v4815_v60 = vmax.f32 %v4742_v33, 0.0  ;;  %v4745_v18 = vpop.f32.mrb[176].mxu1 }
 0x39e   :  { %v4854_v55 = vmax.f32 %v4812_v14, %v4814_v35  ;;  %v4746_v0 = vadd.f32 %v4745_v18, %v4380_v45  ;;  %v4747_v57 = vpop.f32.mrb[177].mxu1  ;;  %v4866_v35 = vld [vmem:[%s7935_s7 + $0x10] sm:$0xff] }
 0x39f   :  { %v4855_v21 = vmax.f32 %v4813_v40, %v4815_v60  ;;  %v4748_v27 = vadd.f32 %v4747_v57, %v4380_v45  ;;  %v4867_v40 = vld [vmem:[%s7935_s7 + $0x18] sm:$0xff]  ;;  %v4869_v60 = vld [vmem:[%s7935_s7 + $0x28] sm:$0xff]  ;;  %v4870_v18 = vld [vmem:[%s7935_s7 + $0x30] sm:$0xff] }
 0x3a0   :  { %v5675_v59 = vpack.c.bf16 %v4854_v55, %v4852_v34  ;;  %v4818_v56 = vmax.f32 %v4746_v0, 0.0  ;;  %v4828_v34 = vmax.f32 %v4603_v41, 0.0  ;;  %v4871_v55 = vld [vmem:[%s7935_s7 + $0x38] sm:$0xff] }
 0x3a1   :  { %v4819_v29 = vmax.f32 %v4748_v27, 0.0  ;;  %v4751_v30 = vpop.f32.mrb[178].mxu1  ;;  %v5673_v10 = vpack.c.bf16 %v4855_v21, %v4853_v61  ;;  %v4888_v27 = vpop.permute.xlu1 %4887 }
 0x3a2   :  { %v4856_v4 = vmax.f32 %v4816_v52, %v4818_v56  ;;  %v4752_v28 = vadd.f32 %v4751_v30, %v4385_v2  ;;  %v4753_v36 = vpop.f32.mrb[179].mxu1 }
 0x3a3   :  { %v4857_v17 = vmax.f32 %v4817_v6, %v4819_v29  ;;  %v4754_v58 = vadd.f32 %v4753_v36, %v4385_v2  ;;  %5674 = vmatprep.subr.bf16.mxu0 %v5673_v10  ;;  %v4883_v2 = vpop.permute.xlu0 %4882 }
 0x3a4   :  { %v4822_v13 = vmax.f32 %v4752_v28, 0.0  ;;  %5676 = vmatpush1.bf16.msra.mxu0 %v5675_v59 }
 0x3a5   :  { %v4823_v9 = vmax.f32 %v4754_v58, 0.0  ;;  %v4757_v3 = vpop.f32.mrb[180].mxu1  ;;  %v4898_v58 = vpop.permute.xlu1 %4897 }
 0x3a6   :  { %v4858_v50 = vmax.f32 %v4820_v47, %v4822_v13  ;;  %v4758_v32 = vadd.f32 %v4757_v3, %v4390_v46  ;;  %v4759_v1 = vpop.f32.mrb[181].mxu1 }
 0x3a7   :  { %v4859_v26 = vmax.f32 %v4821_v37, %v4823_v9  ;;  %v4760_v48 = vadd.f32 %v4759_v1, %v4390_v46  ;;  %v4893_v36 = vpop.permute.xlu0 %4892 }
 0x3a8   :  { %v5679_v8 = vpack.c.bf16 %v4858_v50, %v4856_v4  ;;  %v4826_v44 = vmax.f32 %v4758_v32, 0.0 }
 0x3a9   :  { %v4827_v22 = vmax.f32 %v4760_v48, 0.0  ;;  %v4763_v42 = vpop.f32.mrb[182].mxu1  ;;  %v5677_v63 = vpack.c.bf16 %v4859_v26, %v4857_v17 }
 0x3aa   :  { %v4860_v25 = vmax.f32 %v4824_v43, %v4826_v44  ;;  %v4764_v5 = vadd.f32 %v4763_v42, %v4395_v15  ;;  %v4765_v31 = vpop.f32.mrb[183].mxu1 }
 0x3ab   :  { %v4861_v24 = vmax.f32 %v4825_v39, %v4827_v22  ;;  %v4766_v12 = vadd.f32 %v4765_v31, %v4395_v15  ;;  %5678 = vmatprep.subr.bf16.mxu0 %v5677_v63  ;;  %v4903_v48 = vpop.permute.xlu0 %4902 }
 0x3ac   :  { %v4830_v23 = vmax.f32 %v4764_v5, 0.0  ;;  %5680 = vmatpush1.bf16.msra.mxu0 %v5679_v8  ;;  %v4908_v8 = vpop.permute.xlu1 %4907 }
 0x3ad   :  { %v4831_v45 = vmax.f32 %v4766_v12, 0.0 }
 0x3ae   :  { %v4862_v49 = vmax.f32 %v4828_v34, %v4830_v23 }
 0x3af   :  { %v4863_v61 = vmax.f32 %v4829_v62, %v4831_v45  ;;  %v4913_v23 = vpop.permute.xlu0 %4912 }
 0x3b0   :  { %v5683_v33 = vpack.c.bf16 %v4862_v49, %v4860_v25  ;;  %v4918_v49 = vpop.permute.xlu1 %4917 }
 0x3b1   :  { %v5681_v14 = vpack.c.bf16 %v4863_v61, %v4861_v24 }
 0x3b3   :  { %5682 = vmatprep.subr.bf16.mxu0 %v5681_v14 }
 0x3b4   :  { %5684 = vmatpush1.bf16.msra.mxu0 %v5683_v33 }
 0x3b7   :  { %4985 = vmatmul.mubr.f32.vlgmr.msra.gmra.mrb[168].mxu0 %v4864_v38 }
 0x3b8   :  { %4990 = vmatprep.mubr.f32.mxu0 %v5745_v19 }
 0x3bb   :  { %4991 = vmatmul.mubr.f32.gmra.mrb[170].mxu0 %v4865_v51 }
 0x3bc   :  { %4996 = vmatprep.mubr.f32.mxu0 %v5745_v19 }
 0x3bf   :  { %4997 = vmatmul.mubr.f32.gmra.mrb[172].mxu0 %v4866_v35 }
 0x3c0   :  { %5002 = vmatprep.mubr.f32.mxu0 %v5745_v19 }
 0x3c3   :  { %5003 = vmatmul.mubr.f32.gmra.mrb[174].mxu0 %v4867_v40 }
 0x3c4   :  { %5008 = vmatprep.mubr.f32.mxu0 %v5745_v19 }
 0x3c7   :  { %5009 = vmatmul.mubr.f32.gmra.mrb[176].mxu0 %v4868_v20 }
 0x3c8   :  { %5014 = vmatprep.mubr.f32.mxu0 %v5745_v19 }
 0x3cb   :  { %5015 = vmatmul.mubr.f32.gmra.mrb[178].mxu0 %v4869_v60 }
 0x3cc   :  { %5020 = vmatprep.mubr.f32.mxu0 %v5745_v19 }
 0x3cf   :  { %5021 = vmatmul.mubr.f32.gmra.mrb[180].mxu0 %v4870_v18 }
 0x3d0   :  { %5026 = vmatprep.mubr.f32.mxu0 %v5745_v19 }
 0x3d3   :  { %5027 = vmatmul.mubr.f32.gmra.mrb[182].mxu0 %v4871_v55 }
 0x48a   :  { %v4986_v0 = vpop.f32.mrb[168].mxu0 }
 0x48b   :  { %v4988_v57 = vpop.f32.mrb[169].mxu0  ;;  %v4987_v21 = vadd.f32 %v4986_v0, %v4883_v2  ;;  %v5049_v0 = vld [vmem:[%s7937_s9] sm:$0x1f] }
 0x48c   :  { %v4989_v52 = vadd.f32 %v4988_v57, %v4883_v2  ;;  %v5054_v57 = vpop.permute.xlu0 %5053 }
 0x48d   :  { %v5033_v7 = vmax.f32 %v4987_v21, 0.0 }
 0x48e   :  { %v4992_v54 = vpop.f32.mrb[170].mxu0  ;;  %v5034_v30 = vmax.f32 %v4989_v52, 0.0 }
 0x48f   :  { %v4993_v59 = vadd.f32 %v4992_v54, %v4888_v27  ;;  %v4994_v56 = vpop.f32.mrb[171].mxu0 }
 0x490   :  { %v4995_v6 = vadd.f32 %v4994_v56, %v4888_v27 }
 0x491   :  { %v5035_v29 = vmax.f32 %v4993_v59, 0.0 }
 0x492   :  { %v5036_v10 = vmax.f32 %v4995_v6, 0.0  ;;  %v4998_v19 = vpop.f32.mrb[172].mxu0 }
 0x493   :  { %v5687_v4 = vpack.c.bf16 %v5035_v29, %v5033_v7  ;;  %v5000_v28 = vpop.f32.mrb[173].mxu0  ;;  %v4999_v17 = vadd.f32 %v4998_v19, %v4893_v36 }
 0x494   :  { %v5685_v46 = vpack.c.bf16 %v5036_v10, %v5034_v30  ;;  %v5001_v47 = vadd.f32 %v5000_v28, %v4893_v36 }
 0x495   :  { %v5037_v9 = vmax.f32 %v4999_v17, 0.0 }
 0x496   :  { %v5004_v53 = vpop.f32.mrb[174].mxu0  ;;  %5686 = vmatprep.subr.bf16.mxu1 %v5685_v46  ;;  %v5038_v50 = vmax.f32 %v5001_v47, 0.0 }
 0x497   :  { %v5005_v13 = vadd.f32 %v5004_v53, %v4898_v58  ;;  %v5006_v37 = vpop.f32.mrb[175].mxu0  ;;  %5688 = vmatpush1.bf16.msra.mxu1 %v5687_v4 }
 0x498   :  { %v5007_v16 = vadd.f32 %v5006_v37, %v4898_v58 }
 0x499   :  { %v5039_v3 = vmax.f32 %v5005_v13, 0.0 }
 0x49a   :  { %v5040_v32 = vmax.f32 %v5007_v16, 0.0  ;;  %v5010_v1 = vpop.f32.mrb[176].mxu0 }
 0x49b   :  { %v5691_v15 = vpack.c.bf16 %v5039_v3, %v5037_v9  ;;  %v5012_v26 = vpop.f32.mrb[177].mxu0  ;;  %v5011_v41 = vadd.f32 %v5010_v1, %v4903_v48 }
 0x49c   :  { %v5689_v43 = vpack.c.bf16 %v5040_v32, %v5038_v50  ;;  %v5013_v44 = vadd.f32 %v5012_v26, %v4903_v48 }
 0x49d   :  { %v5041_v63 = vmax.f32 %v5011_v41, 0.0 }
 0x49e   :  { %v5016_v39 = vpop.f32.mrb[178].mxu0  ;;  %5690 = vmatprep.subr.bf16.mxu1 %v5689_v43  ;;  %v5042_v5 = vmax.f32 %v5013_v44, 0.0 }
 0x49f   :  { %v5017_v11 = vadd.f32 %v5016_v39, %v4908_v8  ;;  %v5018_v22 = vpop.f32.mrb[179].mxu0  ;;  %5692 = vmatpush1.bf16.msra.mxu1 %v5691_v15 }
 0x4a0   :  { %v5019_v42 = vadd.f32 %v5018_v22, %v4908_v8 }
 0x4a1   :  { %v5043_v25 = vmax.f32 %v5017_v11, 0.0 }
 0x4a2   :  { %v5044_v31 = vmax.f32 %v5019_v42, 0.0  ;;  %v5022_v24 = vpop.f32.mrb[180].mxu0 }
 0x4a3   :  { %v5695_v12 = vpack.c.bf16 %v5043_v25, %v5041_v63  ;;  %v5024_v34 = vpop.f32.mrb[181].mxu0  ;;  %v5023_v45 = vadd.f32 %v5022_v24, %v4913_v23 }
 0x4a4   :  { %v5693_v62 = vpack.c.bf16 %v5044_v31, %v5042_v5  ;;  %v5025_v61 = vadd.f32 %v5024_v34, %v4913_v23 }
 0x4a5   :  { %v5045_v35 = vmax.f32 %v5023_v45, 0.0 }
 0x4a6   :  { %v5028_v33 = vpop.f32.mrb[182].mxu0  ;;  %5694 = vmatprep.subr.bf16.mxu1 %v5693_v62  ;;  %v5046_v20 = vmax.f32 %v5025_v61, 0.0 }
 0x4a7   :  { %v5029_v14 = vadd.f32 %v5028_v33, %v4918_v49  ;;  %v5030_v38 = vpop.f32.mrb[183].mxu0  ;;  %5696 = vmatpush1.bf16.msra.mxu1 %v5695_v12 }
 0x4a8   :  { %v5031_v51 = vadd.f32 %v5030_v38, %v4918_v49 }
 0x4a9   :  { %v5047_v40 = vmax.f32 %v5029_v14, 0.0 }
 0x4aa   :  { %v5048_v60 = vmax.f32 %v5031_v51, 0.0 }
 0x4ab   :  { %v5699_v18 = vpack.c.bf16 %v5047_v40, %v5045_v35 }
 0x4ac   :  { %v5697_v55 = vpack.c.bf16 %v5048_v60, %v5046_v20 }
 0x4ae   :  { %5698 = vmatprep.subr.bf16.mxu1 %v5697_v55 }
 0x4af   :  { %5700 = vmatpush1.bf16.msra.mxu1 %v5699_v18 }
 0x4b2   :  { %5364 = vmatmul.mubr.msk.f32.vlgmr.msra.gmra.mrb[184].mxu1 %vm4397_vm9, %v5049_v0 }
 0x585   :  { %v5125_v2 = vpop.f32.mrb[184].mxu1 }
 0x586   :  { %v5126_v21 = vadd.f32 %v5125_v2, %v5054_v57  ;;  %v5127_v27 = vpop.f32.mrb[185].mxu1 }
 0x587   :  { %v5128_v52 = vadd.f32 %v5127_v27, %v5054_v57 }
 0x588   :  { %5130 = vst [vmem:[#allocation2] sm:$0x1f] %v5126_v21 }
 0x589   :  { %5131 = vst [vmem:[#allocation2 + $0x8] sm:$0x1f] %v5128_v52 }
 0x58a   :  { %5731 = shalt.err (!%p5728_p4)
}
 0x58b   :  { %s5732_s8 = scalar_lea.hbm %s7939_s11, 256 }
 0x58c   :  { %p5733_p5 = scmp.ne.s32.totalorder %s7939_s11, %s5732_s8  ;;  %p5736_p6 = scmp.lt.u32.totalorder %s5732_s8, %s7939_s11 }
 0x58e   :  { %p5738_p7 = pnand %p5736_p6, %p5733_p5 }
 0x590   :  { %5741 = shalt.err (!%p5738_p7)
}
 0x591   :  { %5141 = dma.vmem_to_hbm [thread:$0]  %s5139_s3, 256, %s7939_s11, [#allocation3]  }
 0x592   :  { %5742 = dma.done.wait [#allocation3], 256  }
 0x593   :  { %5743 = vsyncadd [#allocation3], 4294967040 }
 0x594   :  { %5145 = vsyncpa [#allocation3], 1 }

</bundles_post_ra>
